<compile_context>
chip_gen: v7x
topology: tpu7x:2x2x1
jax: 0.10.0
libtpu: 0.0.40
codegen_flags: <defaults>
</compile_context>

<pallas_src>
import functools
import math

import jax
import jax.numpy as jnp
import numpy as np
from jax.experimental import pallas as pl
from jax.experimental.pallas import tpu as pltpu

LANE = 128      # TPU vreg lane width
SUBLANE = 8     # TPU vreg sublane grain


def _round_up(x, m):
    return (x + m - 1) // m * m


# ----------------------------------------------------------------------------
# GELU (tanh form): 3-4 VPU ops + one EUP tanh, well within 1e-2 of exact erf.
# ----------------------------------------------------------------------------
def _gelu_tanh(x):
    c = 0.7978845608028654  # sqrt(2/pi)
    return 0.5 * x * (1.0 + jnp.tanh(c * (x + 0.044715 * x * x * x)))


# ----------------------------------------------------------------------------
# Pallas kernel
# ----------------------------------------------------------------------------
def _rnn_denoise_kernel(S, B, E, GP, O,
                        x_ref, hs_ref, w_gru_ref, w_mlp_ref, misc_ref,
                        out_ref, gi_scr, hid_scr):
    f32 = jnp.float32
    bf16 = jnp.bfloat16
    E2 = 2 * E
    E3 = 3 * E

    # packed rows (hoisted out of the recurrence loop)
    w_x_row = misc_ref[0:1, :]                 # [1, GP]
    b_ih = misc_ref[1:2, :]                    # [1, GP]
    b_hh = misc_ref[2:3, :]                    # [1, GP]
    freqs = misc_ref[3:4, 0:E]                 # [1, E]

    # ---- 1) trig time embedding + GRU input projection for ALL timesteps ----
    # No lane-misaligned [x|sin|cos] concat: the K=1+2E matmul is split into two
    # K=E matmuls plus an outer-product term for the raw x column.
    x_col = x_ref[...]                         # [S*B, 1]   (row = s*B + b)
    v = jnp.exp(x_col)                         # EUP
    ph = v * freqs                             # [S*B, E]
    gi_scr[...] = (jnp.dot(jnp.sin(ph), w_gru_ref[0:E, :],
                           preferred_element_type=f32)
                   + jnp.dot(jnp.cos(ph), w_gru_ref[E:E2, :],
                             preferred_element_type=f32)
                   + x_col * w_x_row
                   + b_ih)                     # [S*B, GP]; lanes 3E..GP unused

    # ---- 2) GRU recurrence; torch gate order r|z|n packed in one lane slab ----
    # TODO(synk): hold w_hh resident in the MXU across the S steps via
    #   pltpu.matmul_push_rhs / matmul_acc_lhs / matmul_pop; skipped here because
    #   the explicit-MXU path has per-generation tile constraints (128^2 vs 256^2
    #   MXUs, MRF vs MRB).  The RHS is already 3x smaller than v2, which shrinks
    #   the per-step push cost accordingly.
    w_hh = w_gru_ref[E2:E3, :]                 # [E, GP]
    h = hs_ref[0:B, :]                         # [B, E] f32 (serial state)
    step = hs_ref[B:2 * B, :]                  # [B, E]
    # TODO(synk): switch to lax.fori_loop(unroll=2-4) + pl.ds/pl.multiple_of on
    #   the gi_scr/hid_scr row starts if S grows beyond ~16 (vreg pressure).
    for s in range(S):                         # S is small -> static unroll
        gi = gi_scr[s * B:(s + 1) * B, :]      # [B, GP] sublane-aligned slice
        gh = jnp.dot(h, w_hh, preferred_element_type=f32) + b_hh       # [B, GP]
        # one fused sigmoid over the whole gate slab (r and z are slices of it;
        # the extra n/padding lanes ride along in the same vreg for free)
        sig = jax.nn.sigmoid(gi + gh)
        r = sig[:, 0:E]
        z = sig[:, E:E2]
        # compiler-inserted lane realignments for the offset gate slices land on
        # the otherwise-idle XLU
        n = jnp.tanh(gi[:, E2:E3] + r * gh[:, E2:E3])
        h = (1.0 - z) * n + z * h              # [B, E]
        # store hidden + step_embed; the add is off the carried dependency chain
        hid_scr[s * B:(s + 1) * B, :] = h + step

    # ---- 3) output MLP in transposed form -> lane-dense [O, S*B] store ----
    hid_t = jnp.transpose(hid_scr[...])        # [E, S*B]    (one-time XLU)
    w1 = w_mlp_ref[0:E2, 0:E].astype(bf16)
    b1c = w_mlp_ref[0:E2, E2:E2 + 1]           # [2E, 1]
    h1_t = jnp.dot(w1, hid_t.astype(bf16),
                   preferred_element_type=f32) + b1c                   # [2E, S*B]
    h1_t = _gelu_tanh(h1_t)
    if O == 1:
        # degenerate N=1 projection as VPU multiply + XLU reduce (no MXU pass)
        w2c = w_mlp_ref[0:E2, E2 + 1:E2 + 2]   # [2E, 1]
        b2s = w_mlp_ref[0:1, E2 + 2:E2 + 3]    # [1, 1]
        out = jnp.sum(h1_t * w2c, axis=0, keepdims=True) + b2s
    else:
        w2 = w_mlp_ref[E2:E2 + O, 0:E2].astype(bf16)
        b2c = w_mlp_ref[E2:E2 + O, E2:E2 + 1]
        out = jnp.dot(w2, h1_t.astype(bf16), preferred_element_type=f32) + b2c
    out_ref[...] = out.astype(out_ref.dtype)   # [O, S*B] lane-dense store


# ----------------------------------------------------------------------------
# one-time parameter packing (hoisted out of the per-call path)
# ----------------------------------------------------------------------------
def pack_params(params):
    f32 = jnp.float32
    E = params["w_hh"].shape[1]
    O = params["w2"].shape[0]
    E2 = 2 * E
    GP = _round_up(3 * E, LANE)                # r|z|n contiguous, zero-padded

    def gpad(a):                               # [..., 3E] -> [..., GP]
        return jnp.pad(a.astype(f32),
                       [(0, 0)] * (a.ndim - 1) + [(0, GP - 3 * E)])

    w_ih = params["w_ih"].astype(f32)          # [3E, 1+2E], features [x|sin|cos]
    w_gru = jnp.concatenate([
        gpad(w_ih[:, 1:1 + E].T),              # sin block -> rows 0:E
        gpad(w_ih[:, 1 + E:1 + 2 * E].T),      # cos block -> rows E:2E
        gpad(params["w_hh"].astype(f32).T),    # hh        -> rows 2E:3E
    ], axis=0)                                 # [3E, GP]

    misc = jnp.zeros((8, GP), f32)
    misc = misc.at[0, :].set(gpad(w_ih[:, 0]))                  # w_x row
    misc = misc.at[1, :].set(gpad(params["b_ih"].astype(f32)))  # b_ih
    misc = misc.at[2, :].set(gpad(params["b_hh"].astype(f32)))  # b_hh
    misc = misc.at[3, :E].set(params["freqs"].astype(f32))      # trig freqs

    WM = E2 + 8
    if O == 1:
        w_mlp = jnp.zeros((E2, WM), f32)
        w_mlp = w_mlp.at[:, :E].set(params["w1"].astype(f32))
        w_mlp = w_mlp.at[:, E2].set(params["b1"].astype(f32))        # b1 column
        w_mlp = w_mlp.at[:, E2 + 1].set(params["w2"].astype(f32)[0]) # w2 column
        w_mlp = w_mlp.at[0, E2 + 2].set(params["b2"].astype(f32)[0]) # b2 scalar
    else:
        w_mlp = jnp.zeros((E2 + O, WM), f32)
        w_mlp = w_mlp.at[:E2, :E].set(params["w1"].astype(f32))
        w_mlp = w_mlp.at[:E2, E2].set(params["b1"].astype(f32))
        w_mlp = w_mlp.at[E2:, :E2].set(params["w2"].astype(f32))
        w_mlp = w_mlp.at[E2:, E2].set(params["b2"].astype(f32))

    return dict(w_gru=w_gru, misc=misc, w_mlp=w_mlp,
                step_table=params["step_table"].astype(f32),
                E=E, O=O, GP=GP)


# ----------------------------------------------------------------------------
# per-call wrapper (jitted): only x/t/cond handling + the pallas_call
# ----------------------------------------------------------------------------
def make_rnn_denoise_fn(params):
    packed = pack_params(params)
    E, O, GP = packed["E"], packed["O"], packed["GP"]
    w_gru, misc, w_mlp = packed["w_gru"], packed["misc"], packed["w_mlp"]
    step_table = packed["step_table"]

    @jax.jit
    def forward(x, t, cond):
        """x: [B, S, 1] f32, t: [B] int32, cond (GRU h0): [1, B, E] -> [B, S, O]."""
        f32 = jnp.float32
        B0, S, _ = x.shape
        # pad B so (a) per-step row slices are sublane-aligned and (b) S*B is a
        # multiple of 128 -> lane-dense MLP epilogue + unmasked output store.
        need = LANE // math.gcd(S, LANE)
        b_mult = SUBLANE * need // math.gcd(SUBLANE, need)
        B = _round_up(max(B0, 1), b_mult)
        SB = S * B
        pad_b = B - B0

        xp = jnp.pad(x.astype(f32), ((0, pad_b), (0, 0), (0, 0)))
        # time-major x column (row = s*B + b)
        x_col = jnp.transpose(xp[:, :, 0]).reshape(SB, 1)
        h0 = jnp.pad(cond[0].astype(f32), ((0, pad_b), (0, 0)))          # [B, E]
        step = jnp.pad(jnp.take(step_table, t, axis=0),
                       ((0, pad_b), (0, 0)))                             # [B, E]
        hs0 = jnp.concatenate([h0, step], axis=0)                        # [2B, E]

        args = (x_col, hs0, w_gru, w_mlp, misc)
        kernel = functools.partial(_rnn_denoise_kernel, S, B, E, GP, O)
        # TODO(synk): at larger B*S, add a batch-block grid axis marked
        #   "parallel" (second TensorCore on v7x) and tile gi_scr over time
        #   blocks / raise vmem_limit_bytes (v7x 64 MiB VMEM, v5e 16 MiB scoped).
        out_k = pl.pallas_call(
            kernel,
            out_shape=jax.ShapeDtypeStruct((O, SB), f32),
            grid=(1,),
            in_specs=[pl.BlockSpec(a.shape, lambda i: (0, 0)) for a in args],
            out_specs=pl.BlockSpec((O, SB), lambda i: (0, 0)),
            scratch_shapes=[pltpu.VMEM((SB, GP), f32),   # gi slab
                            pltpu.VMEM((SB, E), f32)],   # hidden slab
            compiler_params=pltpu.CompilerParams(
                dimension_semantics=("arbitrary",)),
        )(*args)

        out = jnp.transpose(out_k.reshape(O, S, B), (2, 1, 0))   # -> [B, S, O]
        return out[:B0]

    return forward


# ----------------------------------------------------------------------------
# deterministic parameter init (shapes follow RNNDenoise_Fn.__init__)
# ----------------------------------------------------------------------------
def init_params(key, embed_size, output_size, max_steps=1000):
    E = embed_size
    D = 1 + 2 * E
    ks = jax.random.split(key, 9)
    s = 0.1
    return {
        "freqs": jnp.exp(-jnp.log(10000.0) *
                         jnp.arange(E, dtype=jnp.float32) / E),          # TrigonoTimeEmbedding
        "step_table": jax.random.normal(ks[0], (max_steps, E), jnp.float32) * s,
        "w_ih": jax.random.normal(ks[1], (3 * E, D), jnp.float32) * s,   # GRU weight_ih_l0
        "b_ih": jax.random.normal(ks[2], (3 * E,), jnp.float32) * s,
        "w_hh": jax.random.normal(ks[3], (3 * E, E), jnp.float32) * s,   # GRU weight_hh_l0
        "b_hh": jax.random.normal(ks[4], (3 * E,), jnp.float32) * s,
        "w1": jax.random.normal(ks[5], (2 * E, E), jnp.float32) * s,     # Linear(E, 2E)
        "b1": jax.random.normal(ks[6], (2 * E,), jnp.float32) * s,
        "w2": jax.random.normal(ks[7], (output_size, 2 * E), jnp.float32) * s,  # Linear(2E, O)
        "b2": jax.random.normal(ks[8], (output_size,), jnp.float32) * s,
    }


# ----------------------------------------------------------------------------
# pure-JAX reference (mirrors the PyTorch forward; exact-erf GELU, f32, fully
# independent of the kernel's tanh-GELU / bf16 approximations)
# ----------------------------------------------------------------------------
def reference_forward(params, x, t, cond):
    E = params["w_hh"].shape[1]
    v = jnp.exp(x[..., 0])                                   # [B, S]
    a = v[..., None] * params["freqs"]                       # [B, S, E]
    trig = jnp.concatenate([jnp.sin(a), jnp.cos(a)], axis=-1)
    feat = jnp.concatenate([x, trig], axis=-1)               # [B, S, 1+2E]
    h = cond[0]
    w_ih_t, w_hh_t = params["w_ih"].T, params["w_hh"].T
    hs = []
    for s in range(x.shape[1]):
        gi = feat[:, s, :] @ w_ih_t + params["b_ih"]
        gh = h @ w_hh_t + params["b_hh"]
        r = jax.nn.sigmoid(gi[:, :E] + gh[:, :E])
        z = jax.nn.sigmoid(gi[:, E:2 * E] + gh[:, E:2 * E])
        n = jnp.tanh(gi[:, 2 * E:] + r * gh[:, 2 * E:])
        h = (1.0 - z) * n + z * h
        hs.append(h)
    hidden = jnp.stack(hs, axis=1)                           # [B, S, E]
    step_emb = jnp.take(params["step_table"], t, axis=0)
    hidden = hidden + step_emb[:, None, :]
    h1 = jax.nn.gelu(hidden @ params["w1"].T + params["b1"], approximate=False)
    return h1 @ params["w2"].T + params["b2"]


if __name__ == "__main__":
    B, S, E, O, MAX_STEPS = 8, 8, 32, 1, 1000

    key = jax.random.PRNGKey(0)
    kp, kx, kt, kc = jax.random.split(key, 4)
    params = init_params(kp, E, O, MAX_STEPS)

    x = jax.random.normal(kx, (B, S, 1), jnp.float32) * 0.5
    t = jax.random.randint(kt, (B,), 0, MAX_STEPS, dtype=jnp.int32)
    cond = jax.random.normal(kc, (1, B, E), jnp.float32) * 0.1

    fwd = make_rnn_denoise_fn(params)          # weight packing happens once here
    out = fwd(x, t, cond)
    out = jax.block_until_ready(out)

    ref = reference_forward(params, x, t, cond)
    assert out.shape == (B, S, O)
    np.testing.assert_allclose(np.asarray(out), np.asarray(ref), rtol=1e-2, atol=1e-2)

    print("KERNEL_OK")
</pallas_src>

<mosaic_0001>
module attributes {stable_mosaic.version = 11 : i64} {
  func.func @_rnn_denoise_kernel(%arg0: i32, %arg1: memref<128x1xf32, #tpu.memory_space<vmem>>, %arg2: memref<32x32xf32, #tpu.memory_space<vmem>>, %arg3: memref<96x128xf32, #tpu.memory_space<vmem>>, %arg4: memref<64x72xf32, #tpu.memory_space<vmem>>, %arg5: memref<8x128xf32, #tpu.memory_space<vmem>>, %arg6: memref<1x128xf32, #tpu.memory_space<vmem>>, %arg7: memref<128x128xf32, #tpu.memory_space<vmem>>, %arg8: memref<128x32xf32, #tpu.memory_space<vmem>>) attributes {dimension_semantics = [#tpu.dimension_semantics<arbitrary>], iteration_bounds = array<i64: 1>, scalar_prefetch = 0 : i64, scratch_operands = 2 : i64, tpu.core_type = #tpu.core_type<tc>, window_params = [{pipeline_mode = #tpu.pipeline_mode<synchronous>, transform_indices = @transform_0, window_bounds = array<i64: 128, 1>}, {pipeline_mode = #tpu.pipeline_mode<synchronous>, transform_indices = @transform_1, window_bounds = array<i64: 32, 32>}, {pipeline_mode = #tpu.pipeline_mode<synchronous>, transform_indices = @transform_2, window_bounds = array<i64: 96, 128>}, {pipeline_mode = #tpu.pipeline_mode<synchronous>, transform_indices = @transform_3, window_bounds = array<i64: 64, 72>}, {pipeline_mode = #tpu.pipeline_mode<synchronous>, transform_indices = @transform_4, window_bounds = array<i64: 8, 128>}, {pipeline_mode = #tpu.pipeline_mode<synchronous>, transform_indices = @transform_5, window_bounds = array<i64: 1, 128>}]} {
    %c0 = arith.constant 0 : index
    %c0_0 = arith.constant 0 : index
    %0 = vector.load %arg5[%c0, %c0_0] : memref<8x128xf32, #tpu.memory_space<vmem>>, vector<1x128xf32>
    %c1 = arith.constant 1 : index
    %c0_1 = arith.constant 0 : index
    %1 = vector.load %arg5[%c1, %c0_1] : memref<8x128xf32, #tpu.memory_space<vmem>>, vector<1x128xf32>
    %c2 = arith.constant 2 : index
    %c0_2 = arith.constant 0 : index
    %2 = vector.load %arg5[%c2, %c0_2] : memref<8x128xf32, #tpu.memory_space<vmem>>, vector<1x128xf32>
    %c3 = arith.constant 3 : index
    %c0_3 = arith.constant 0 : index
    %3 = vector.load %arg5[%c3, %c0_3] : memref<8x128xf32, #tpu.memory_space<vmem>>, vector<1x32xf32>
    %c0_4 = arith.constant 0 : index
    %c0_5 = arith.constant 0 : index
    %4 = vector.load %arg1[%c0_4, %c0_5] : memref<128x1xf32, #tpu.memory_space<vmem>>, vector<128x1xf32>
    %5 = math.exp %4 : vector<128x1xf32>
    %6 = vector.broadcast %5 : vector<128x1xf32> to vector<128x32xf32>
    %7 = vector.broadcast %3 : vector<1x32xf32> to vector<128x32xf32>
    %8 = arith.mulf %6, %7 : vector<128x32xf32>
    %9 = math.sin %8 : vector<128x32xf32>
    %c0_6 = arith.constant 0 : index
    %c0_7 = arith.constant 0 : index
    %10 = vector.load %arg3[%c0_6, %c0_7] : memref<96x128xf32, #tpu.memory_space<vmem>>, vector<32x128xf32>
    %cst = arith.constant dense<0.000000e+00> : vector<128x128xf32>
    %11 = tpu.matmul %9, %10, %cst {dimension_numbers = #tpu.dot_dimension_numbers<[1], [0], [0], [1], [0, 0, 1, 1], [], []>} : vector<128x32xf32>, vector<32x128xf32>, vector<128x128xf32> -> vector<128x128xf32>
    %12 = math.cos %8 : vector<128x32xf32>
    %c32 = arith.constant 32 : index
    %c0_8 = arith.constant 0 : index
    %13 = vector.load %arg3[%c32, %c0_8] : memref<96x128xf32, #tpu.memory_space<vmem>>, vector<32x128xf32>
    %cst_9 = arith.constant dense<0.000000e+00> : vector<128x128xf32>
    %14 = tpu.matmul %12, %13, %cst_9 {dimension_numbers = #tpu.dot_dimension_numbers<[1], [0], [0], [1], [0, 0, 1, 1], [], []>} : vector<128x32xf32>, vector<32x128xf32>, vector<128x128xf32> -> vector<128x128xf32>
    %15 = arith.addf %11, %14 : vector<128x128xf32>
    %16 = vector.broadcast %4 : vector<128x1xf32> to vector<128x128xf32>
    %17 = vector.broadcast %0 : vector<1x128xf32> to vector<128x128xf32>
    %18 = arith.mulf %16, %17 : vector<128x128xf32>
    %19 = arith.addf %15, %18 : vector<128x128xf32>
    %20 = vector.broadcast %1 : vector<1x128xf32> to vector<128x128xf32>
    %21 = arith.addf %19, %20 : vector<128x128xf32>
    %c0_10 = arith.constant 0 : index
    %c0_11 = arith.constant 0 : index
    %22 = vector.load %arg7[%c0_10, %c0_11] : memref<128x128xf32, #tpu.memory_space<vmem>>, vector<128x128xf32>
    tpu.vector_store %arg7[%c0_10, %c0_11], %21 {strides = array<i32>} : memref<128x128xf32, #tpu.memory_space<vmem>>, vector<128x128xf32>,
    %c64 = arith.constant 64 : index
    %c0_12 = arith.constant 0 : index
    %23 = vector.load %arg3[%c64, %c0_12] : memref<96x128xf32, #tpu.memory_space<vmem>>, vector<32x128xf32>
    %c0_13 = arith.constant 0 : index
    %c0_14 = arith.constant 0 : index
    %24 = vector.load %arg2[%c0_13, %c0_14] : memref<32x32xf32, #tpu.memory_space<vmem>>, vector<16x32xf32>
    %c16 = arith.constant 16 : index
    %c0_15 = arith.constant 0 : index
    %25 = vector.load %arg2[%c16, %c0_15] : memref<32x32xf32, #tpu.memory_space<vmem>>, vector<16x32xf32>
    %c0_16 = arith.constant 0 : index
    %c0_17 = arith.constant 0 : index
    %26 = vector.load %arg7[%c0_16, %c0_17] : memref<128x128xf32, #tpu.memory_space<vmem>>, vector<16x128xf32>
    %cst_18 = arith.constant dense<0.000000e+00> : vector<16x128xf32>
    %27 = tpu.matmul %24, %23, %cst_18 {dimension_numbers = #tpu.dot_dimension_numbers<[1], [0], [0], [1], [0, 0, 1, 1], [], []>} : vector<16x32xf32>, vector<32x128xf32>, vector<16x128xf32> -> vector<16x128xf32>
    %28 = vector.broadcast %2 : vector<1x128xf32> to vector<16x128xf32>
    %29 = arith.addf %27, %28 : vector<16x128xf32>
    %30 = arith.addf %26, %29 : vector<16x128xf32>
    %31 = arith.negf %30 : vector<16x128xf32>
    %32 = math.exp %31 : vector<16x128xf32>
    %cst_19 = arith.constant 1.000000e+00 : f32
    %33 = vector.broadcast %cst_19 : f32 to vector<16x128xf32>
    %34 = arith.addf %33, %32 : vector<16x128xf32>
    %35 = arith.divf %33, %34 : vector<16x128xf32>
    %36 = vector.extract_strided_slice %35 {offsets = [0, 0], sizes = [16, 32], strides = [1, 1]} : vector<16x128xf32> to vector<16x32xf32>
    %37 = vector.extract_strided_slice %35 {offsets = [0, 32], sizes = [16, 32], strides = [1, 1]} : vector<16x128xf32> to vector<16x32xf32>
    %38 = vector.extract_strided_slice %26 {offsets = [0, 64], sizes = [16, 32], strides = [1, 1]} : vector<16x128xf32> to vector<16x32xf32>
    %39 = vector.extract_strided_slice %29 {offsets = [0, 64], sizes = [16, 32], strides = [1, 1]} : vector<16x128xf32> to vector<16x32xf32>
    %40 = arith.mulf %36, %39 : vector<16x32xf32>
    %41 = arith.addf %38, %40 : vector<16x32xf32>
    %42 = math.tanh %41 : vector<16x32xf32>
    %cst_20 = arith.constant 1.000000e+00 : f32
    %43 = vector.broadcast %cst_20 : f32 to vector<16x32xf32>
    %44 = arith.subf %43, %37 : vector<16x32xf32>
    %45 = arith.mulf %44, %42 : vector<16x32xf32>
    %46 = arith.mulf %37, %24 : vector<16x32xf32>
    %47 = arith.addf %45, %46 : vector<16x32xf32>
    %48 = arith.addf %47, %25 : vector<16x32xf32>
    %c0_21 = arith.constant 0 : index
    %c0_22 = arith.constant 0 : index
    %49 = vector.load %arg8[%c0_21, %c0_22] : memref<128x32xf32, #tpu.memory_space<vmem>>, vector<16x32xf32>
    tpu.vector_store %arg8[%c0_21, %c0_22], %48 {strides = array<i32>} : memref<128x32xf32, #tpu.memory_space<vmem>>, vector<16x32xf32>,
    %c16_23 = arith.constant 16 : index
    %c0_24 = arith.constant 0 : index
    %50 = vector.load %arg7[%c16_23, %c0_24] : memref<128x128xf32, #tpu.memory_space<vmem>>, vector<16x128xf32>
    %cst_25 = arith.constant dense<0.000000e+00> : vector<16x128xf32>
    %51 = tpu.matmul %47, %23, %cst_25 {dimension_numbers = #tpu.dot_dimension_numbers<[1], [0], [0], [1], [0, 0, 1, 1], [], []>} : vector<16x32xf32>, vector<32x128xf32>, vector<16x128xf32> -> vector<16x128xf32>
    %52 = vector.broadcast %2 : vector<1x128xf32> to vector<16x128xf32>
    %53 = arith.addf %51, %52 : vector<16x128xf32>
    %54 = arith.addf %50, %53 : vector<16x128xf32>
    %55 = arith.negf %54 : vector<16x128xf32>
    %56 = math.exp %55 : vector<16x128xf32>
    %cst_26 = arith.constant 1.000000e+00 : f32
    %57 = vector.broadcast %cst_26 : f32 to vector<16x128xf32>
    %58 = arith.addf %57, %56 : vector<16x128xf32>
    %59 = arith.divf %57, %58 : vector<16x128xf32>
    %60 = vector.extract_strided_slice %59 {offsets = [0, 0], sizes = [16, 32], strides = [1, 1]} : vector<16x128xf32> to vector<16x32xf32>
    %61 = vector.extract_strided_slice %59 {offsets = [0, 32], sizes = [16, 32], strides = [1, 1]} : vector<16x128xf32> to vector<16x32xf32>
    %62 = vector.extract_strided_slice %50 {offsets = [0, 64], sizes = [16, 32], strides = [1, 1]} : vector<16x128xf32> to vector<16x32xf32>
    %63 = vector.extract_strided_slice %53 {offsets = [0, 64], sizes = [16, 32], strides = [1, 1]} : vector<16x128xf32> to vector<16x32xf32>
    %64 = arith.mulf %60, %63 : vector<16x32xf32>
    %65 = arith.addf %62, %64 : vector<16x32xf32>
    %66 = math.tanh %65 : vector<16x32xf32>
    %cst_27 = arith.constant 1.000000e+00 : f32
    %67 = vector.broadcast %cst_27 : f32 to vector<16x32xf32>
    %68 = arith.subf %67, %61 : vector<16x32xf32>
    %69 = arith.mulf %68, %66 : vector<16x32xf32>
    %70 = arith.mulf %61, %47 : vector<16x32xf32>
    %71 = arith.addf %69, %70 : vector<16x32xf32>
    %72 = arith.addf %71, %25 : vector<16x32xf32>
    %c16_28 = arith.constant 16 : index
    %c0_29 = arith.constant 0 : index
    %73 = vector.load %arg8[%c16_28, %c0_29] : memref<128x32xf32, #tpu.memory_space<vmem>>, vector<16x32xf32>
    tpu.vector_store %arg8[%c16_28, %c0_29], %72 {strides = array<i32>} : memref<128x32xf32, #tpu.memory_space<vmem>>, vector<16x32xf32>,
    %c32_30 = arith.constant 32 : index
    %c0_31 = arith.constant 0 : index
    %74 = vector.load %arg7[%c32_30, %c0_31] : memref<128x128xf32, #tpu.memory_space<vmem>>, vector<16x128xf32>
    %cst_32 = arith.constant dense<0.000000e+00> : vector<16x128xf32>
    %75 = tpu.matmul %71, %23, %cst_32 {dimension_numbers = #tpu.dot_dimension_numbers<[1], [0], [0], [1], [0, 0, 1, 1], [], []>} : vector<16x32xf32>, vector<32x128xf32>, vector<16x128xf32> -> vector<16x128xf32>
    %76 = vector.broadcast %2 : vector<1x128xf32> to vector<16x128xf32>
    %77 = arith.addf %75, %76 : vector<16x128xf32>
    %78 = arith.addf %74, %77 : vector<16x128xf32>
    %79 = arith.negf %78 : vector<16x128xf32>
    %80 = math.exp %79 : vector<16x128xf32>
    %cst_33 = arith.constant 1.000000e+00 : f32
    %81 = vector.broadcast %cst_33 : f32 to vector<16x128xf32>
    %82 = arith.addf %81, %80 : vector<16x128xf32>
    %83 = arith.divf %81, %82 : vector<16x128xf32>
    %84 = vector.extract_strided_slice %83 {offsets = [0, 0], sizes = [16, 32], strides = [1, 1]} : vector<16x128xf32> to vector<16x32xf32>
    %85 = vector.extract_strided_slice %83 {offsets = [0, 32], sizes = [16, 32], strides = [1, 1]} : vector<16x128xf32> to vector<16x32xf32>
    %86 = vector.extract_strided_slice %74 {offsets = [0, 64], sizes = [16, 32], strides = [1, 1]} : vector<16x128xf32> to vector<16x32xf32>
    %87 = vector.extract_strided_slice %77 {offsets = [0, 64], sizes = [16, 32], strides = [1, 1]} : vector<16x128xf32> to vector<16x32xf32>
    %88 = arith.mulf %84, %87 : vector<16x32xf32>
    %89 = arith.addf %86, %88 : vector<16x32xf32>
    %90 = math.tanh %89 : vector<16x32xf32>
    %cst_34 = arith.constant 1.000000e+00 : f32
    %91 = vector.broadcast %cst_34 : f32 to vector<16x32xf32>
    %92 = arith.subf %91, %85 : vector<16x32xf32>
    %93 = arith.mulf %92, %90 : vector<16x32xf32>
    %94 = arith.mulf %85, %71 : vector<16x32xf32>
    %95 = arith.addf %93, %94 : vector<16x32xf32>
    %96 = arith.addf %95, %25 : vector<16x32xf32>
    %c32_35 = arith.constant 32 : index
    %c0_36 = arith.constant 0 : index
    %97 = vector.load %arg8[%c32_35, %c0_36] : memref<128x32xf32, #tpu.memory_space<vmem>>, vector<16x32xf32>
    tpu.vector_store %arg8[%c32_35, %c0_36], %96 {strides = array<i32>} : memref<128x32xf32, #tpu.memory_space<vmem>>, vector<16x32xf32>,
    %c48 = arith.constant 48 : index
    %c0_37 = arith.constant 0 : index
    %98 = vector.load %arg7[%c48, %c0_37] : memref<128x128xf32, #tpu.memory_space<vmem>>, vector<16x128xf32>
    %cst_38 = arith.constant dense<0.000000e+00> : vector<16x128xf32>
    %99 = tpu.matmul %95, %23, %cst_38 {dimension_numbers = #tpu.dot_dimension_numbers<[1], [0], [0], [1], [0, 0, 1, 1], [], []>} : vector<16x32xf32>, vector<32x128xf32>, vector<16x128xf32> -> vector<16x128xf32>
    %100 = vector.broadcast %2 : vector<1x128xf32> to vector<16x128xf32>
    %101 = arith.addf %99, %100 : vector<16x128xf32>
    %102 = arith.addf %98, %101 : vector<16x128xf32>
    %103 = arith.negf %102 : vector<16x128xf32>
    %104 = math.exp %103 : vector<16x128xf32>
    %cst_39 = arith.constant 1.000000e+00 : f32
    %105 = vector.broadcast %cst_39 : f32 to vector<16x128xf32>
    %106 = arith.addf %105, %104 : vector<16x128xf32>
    %107 = arith.divf %105, %106 : vector<16x128xf32>
    %108 = vector.extract_strided_slice %107 {offsets = [0, 0], sizes = [16, 32], strides = [1, 1]} : vector<16x128xf32> to vector<16x32xf32>
    %109 = vector.extract_strided_slice %107 {offsets = [0, 32], sizes = [16, 32], strides = [1, 1]} : vector<16x128xf32> to vector<16x32xf32>
    %110 = vector.extract_strided_slice %98 {offsets = [0, 64], sizes = [16, 32], strides = [1, 1]} : vector<16x128xf32> to vector<16x32xf32>
    %111 = vector.extract_strided_slice %101 {offsets = [0, 64], sizes = [16, 32], strides = [1, 1]} : vector<16x128xf32> to vector<16x32xf32>
    %112 = arith.mulf %108, %111 : vector<16x32xf32>
    %113 = arith.addf %110, %112 : vector<16x32xf32>
    %114 = math.tanh %113 : vector<16x32xf32>
    %cst_40 = arith.constant 1.000000e+00 : f32
    %115 = vector.broadcast %cst_40 : f32 to vector<16x32xf32>
    %116 = arith.subf %115, %109 : vector<16x32xf32>
    %117 = arith.mulf %116, %114 : vector<16x32xf32>
    %118 = arith.mulf %109, %95 : vector<16x32xf32>
    %119 = arith.addf %117, %118 : vector<16x32xf32>
    %120 = arith.addf %119, %25 : vector<16x32xf32>
    %c48_41 = arith.constant 48 : index
    %c0_42 = arith.constant 0 : index
    %121 = vector.load %arg8[%c48_41, %c0_42] : memref<128x32xf32, #tpu.memory_space<vmem>>, vector<16x32xf32>
    tpu.vector_store %arg8[%c48_41, %c0_42], %120 {strides = array<i32>} : memref<128x32xf32, #tpu.memory_space<vmem>>, vector<16x32xf32>,
    %c64_43 = arith.constant 64 : index
    %c0_44 = arith.constant 0 : index
    %122 = vector.load %arg7[%c64_43, %c0_44] : memref<128x128xf32, #tpu.memory_space<vmem>>, vector<16x128xf32>
    %cst_45 = arith.constant dense<0.000000e+00> : vector<16x128xf32>
    %123 = tpu.matmul %119, %23, %cst_45 {dimension_numbers = #tpu.dot_dimension_numbers<[1], [0], [0], [1], [0, 0, 1, 1], [], []>} : vector<16x32xf32>, vector<32x128xf32>, vector<16x128xf32> -> vector<16x128xf32>
    %124 = vector.broadcast %2 : vector<1x128xf32> to vector<16x128xf32>
    %125 = arith.addf %123, %124 : vector<16x128xf32>
    %126 = arith.addf %122, %125 : vector<16x128xf32>
    %127 = arith.negf %126 : vector<16x128xf32>
    %128 = math.exp %127 : vector<16x128xf32>
    %cst_46 = arith.constant 1.000000e+00 : f32
    %129 = vector.broadcast %cst_46 : f32 to vector<16x128xf32>
    %130 = arith.addf %129, %128 : vector<16x128xf32>
    %131 = arith.divf %129, %130 : vector<16x128xf32>
    %132 = vector.extract_strided_slice %131 {offsets = [0, 0], sizes = [16, 32], strides = [1, 1]} : vector<16x128xf32> to vector<16x32xf32>
    %133 = vector.extract_strided_slice %131 {offsets = [0, 32], sizes = [16, 32], strides = [1, 1]} : vector<16x128xf32> to vector<16x32xf32>
    %134 = vector.extract_strided_slice %122 {offsets = [0, 64], sizes = [16, 32], strides = [1, 1]} : vector<16x128xf32> to vector<16x32xf32>
    %135 = vector.extract_strided_slice %125 {offsets = [0, 64], sizes = [16, 32], strides = [1, 1]} : vector<16x128xf32> to vector<16x32xf32>
    %136 = arith.mulf %132, %135 : vector<16x32xf32>
    %137 = arith.addf %134, %136 : vector<16x32xf32>
    %138 = math.tanh %137 : vector<16x32xf32>
    %cst_47 = arith.constant 1.000000e+00 : f32
    %139 = vector.broadcast %cst_47 : f32 to vector<16x32xf32>
    %140 = arith.subf %139, %133 : vector<16x32xf32>
    %141 = arith.mulf %140, %138 : vector<16x32xf32>
    %142 = arith.mulf %133, %119 : vector<16x32xf32>
    %143 = arith.addf %141, %142 : vector<16x32xf32>
    %144 = arith.addf %143, %25 : vector<16x32xf32>
    %c64_48 = arith.constant 64 : index
    %c0_49 = arith.constant 0 : index
    %145 = vector.load %arg8[%c64_48, %c0_49] : memref<128x32xf32, #tpu.memory_space<vmem>>, vector<16x32xf32>
    tpu.vector_store %arg8[%c64_48, %c0_49], %144 {strides = array<i32>} : memref<128x32xf32, #tpu.memory_space<vmem>>, vector<16x32xf32>,
    %c80 = arith.constant 80 : index
    %c0_50 = arith.constant 0 : index
    %146 = vector.load %arg7[%c80, %c0_50] : memref<128x128xf32, #tpu.memory_space<vmem>>, vector<16x128xf32>
    %cst_51 = arith.constant dense<0.000000e+00> : vector<16x128xf32>
    %147 = tpu.matmul %143, %23, %cst_51 {dimension_numbers = #tpu.dot_dimension_numbers<[1], [0], [0], [1], [0, 0, 1, 1], [], []>} : vector<16x32xf32>, vector<32x128xf32>, vector<16x128xf32> -> vector<16x128xf32>
    %148 = vector.broadcast %2 : vector<1x128xf32> to vector<16x128xf32>
    %149 = arith.addf %147, %148 : vector<16x128xf32>
    %150 = arith.addf %146, %149 : vector<16x128xf32>
    %151 = arith.negf %150 : vector<16x128xf32>
    %152 = math.exp %151 : vector<16x128xf32>
    %cst_52 = arith.constant 1.000000e+00 : f32
    %153 = vector.broadcast %cst_52 : f32 to vector<16x128xf32>
    %154 = arith.addf %153, %152 : vector<16x128xf32>
    %155 = arith.divf %153, %154 : vector<16x128xf32>
    %156 = vector.extract_strided_slice %155 {offsets = [0, 0], sizes = [16, 32], strides = [1, 1]} : vector<16x128xf32> to vector<16x32xf32>
    %157 = vector.extract_strided_slice %155 {offsets = [0, 32], sizes = [16, 32], strides = [1, 1]} : vector<16x128xf32> to vector<16x32xf32>
    %158 = vector.extract_strided_slice %146 {offsets = [0, 64], sizes = [16, 32], strides = [1, 1]} : vector<16x128xf32> to vector<16x32xf32>
    %159 = vector.extract_strided_slice %149 {offsets = [0, 64], sizes = [16, 32], strides = [1, 1]} : vector<16x128xf32> to vector<16x32xf32>
    %160 = arith.mulf %156, %159 : vector<16x32xf32>
    %161 = arith.addf %158, %160 : vector<16x32xf32>
    %162 = math.tanh %161 : vector<16x32xf32>
    %cst_53 = arith.constant 1.000000e+00 : f32
    %163 = vector.broadcast %cst_53 : f32 to vector<16x32xf32>
    %164 = arith.subf %163, %157 : vector<16x32xf32>
    %165 = arith.mulf %164, %162 : vector<16x32xf32>
    %166 = arith.mulf %157, %143 : vector<16x32xf32>
    %167 = arith.addf %165, %166 : vector<16x32xf32>
    %168 = arith.addf %167, %25 : vector<16x32xf32>
    %c80_54 = arith.constant 80 : index
    %c0_55 = arith.constant 0 : index
    %169 = vector.load %arg8[%c80_54, %c0_55] : memref<128x32xf32, #tpu.memory_space<vmem>>, vector<16x32xf32>
    tpu.vector_store %arg8[%c80_54, %c0_55], %168 {strides = array<i32>} : memref<128x32xf32, #tpu.memory_space<vmem>>, vector<16x32xf32>,
    %c96 = arith.constant 96 : index
    %c0_56 = arith.constant 0 : index
    %170 = vector.load %arg7[%c96, %c0_56] : memref<128x128xf32, #tpu.memory_space<vmem>>, vector<16x128xf32>
    %cst_57 = arith.constant dense<0.000000e+00> : vector<16x128xf32>
    %171 = tpu.matmul %167, %23, %cst_57 {dimension_numbers = #tpu.dot_dimension_numbers<[1], [0], [0], [1], [0, 0, 1, 1], [], []>} : vector<16x32xf32>, vector<32x128xf32>, vector<16x128xf32> -> vector<16x128xf32>
    %172 = vector.broadcast %2 : vector<1x128xf32> to vector<16x128xf32>
    %173 = arith.addf %171, %172 : vector<16x128xf32>
    %174 = arith.addf %170, %173 : vector<16x128xf32>
    %175 = arith.negf %174 : vector<16x128xf32>
    %176 = math.exp %175 : vector<16x128xf32>
    %cst_58 = arith.constant 1.000000e+00 : f32
    %177 = vector.broadcast %cst_58 : f32 to vector<16x128xf32>
    %178 = arith.addf %177, %176 : vector<16x128xf32>
    %179 = arith.divf %177, %178 : vector<16x128xf32>
    %180 = vector.extract_strided_slice %179 {offsets = [0, 0], sizes = [16, 32], strides = [1, 1]} : vector<16x128xf32> to vector<16x32xf32>
    %181 = vector.extract_strided_slice %179 {offsets = [0, 32], sizes = [16, 32], strides = [1, 1]} : vector<16x128xf32> to vector<16x32xf32>
    %182 = vector.extract_strided_slice %170 {offsets = [0, 64], sizes = [16, 32], strides = [1, 1]} : vector<16x128xf32> to vector<16x32xf32>
    %183 = vector.extract_strided_slice %173 {offsets = [0, 64], sizes = [16, 32], strides = [1, 1]} : vector<16x128xf32> to vector<16x32xf32>
    %184 = arith.mulf %180, %183 : vector<16x32xf32>
    %185 = arith.addf %182, %184 : vector<16x32xf32>
    %186 = math.tanh %185 : vector<16x32xf32>
    %cst_59 = arith.constant 1.000000e+00 : f32
    %187 = vector.broadcast %cst_59 : f32 to vector<16x32xf32>
    %188 = arith.subf %187, %181 : vector<16x32xf32>
    %189 = arith.mulf %188, %186 : vector<16x32xf32>
    %190 = arith.mulf %181, %167 : vector<16x32xf32>
    %191 = arith.addf %189, %190 : vector<16x32xf32>
    %192 = arith.addf %191, %25 : vector<16x32xf32>
    %c96_60 = arith.constant 96 : index
    %c0_61 = arith.constant 0 : index
    %193 = vector.load %arg8[%c96_60, %c0_61] : memref<128x32xf32, #tpu.memory_space<vmem>>, vector<16x32xf32>
    tpu.vector_store %arg8[%c96_60, %c0_61], %192 {strides = array<i32>} : memref<128x32xf32, #tpu.memory_space<vmem>>, vector<16x32xf32>,
    %c112 = arith.constant 112 : index
    %c0_62 = arith.constant 0 : index
    %194 = vector.load %arg7[%c112, %c0_62] : memref<128x128xf32, #tpu.memory_space<vmem>>, vector<16x128xf32>
    %cst_63 = arith.constant dense<0.000000e+00> : vector<16x128xf32>
    %195 = tpu.matmul %191, %23, %cst_63 {dimension_numbers = #tpu.dot_dimension_numbers<[1], [0], [0], [1], [0, 0, 1, 1], [], []>} : vector<16x32xf32>, vector<32x128xf32>, vector<16x128xf32> -> vector<16x128xf32>
    %196 = vector.broadcast %2 : vector<1x128xf32> to vector<16x128xf32>
    %197 = arith.addf %195, %196 : vector<16x128xf32>
    %198 = arith.addf %194, %197 : vector<16x128xf32>
    %199 = arith.negf %198 : vector<16x128xf32>
    %200 = math.exp %199 : vector<16x128xf32>
    %cst_64 = arith.constant 1.000000e+00 : f32
    %201 = vector.broadcast %cst_64 : f32 to vector<16x128xf32>
    %202 = arith.addf %201, %200 : vector<16x128xf32>
    %203 = arith.divf %201, %202 : vector<16x128xf32>
    %204 = vector.extract_strided_slice %203 {offsets = [0, 0], sizes = [16, 32], strides = [1, 1]} : vector<16x128xf32> to vector<16x32xf32>
    %205 = vector.extract_strided_slice %203 {offsets = [0, 32], sizes = [16, 32], strides = [1, 1]} : vector<16x128xf32> to vector<16x32xf32>
    %206 = vector.extract_strided_slice %194 {offsets = [0, 64], sizes = [16, 32], strides = [1, 1]} : vector<16x128xf32> to vector<16x32xf32>
    %207 = vector.extract_strided_slice %197 {offsets = [0, 64], sizes = [16, 32], strides = [1, 1]} : vector<16x128xf32> to vector<16x32xf32>
    %208 = arith.mulf %204, %207 : vector<16x32xf32>
    %209 = arith.addf %206, %208 : vector<16x32xf32>
    %210 = math.tanh %209 : vector<16x32xf32>
    %cst_65 = arith.constant 1.000000e+00 : f32
    %211 = vector.broadcast %cst_65 : f32 to vector<16x32xf32>
    %212 = arith.subf %211, %205 : vector<16x32xf32>
    %213 = arith.mulf %212, %210 : vector<16x32xf32>
    %214 = arith.mulf %205, %191 : vector<16x32xf32>
    %215 = arith.addf %213, %214 : vector<16x32xf32>
    %216 = arith.addf %215, %25 : vector<16x32xf32>
    %c112_66 = arith.constant 112 : index
    %c0_67 = arith.constant 0 : index
    %217 = vector.load %arg8[%c112_66, %c0_67] : memref<128x32xf32, #tpu.memory_space<vmem>>, vector<16x32xf32>
    tpu.vector_store %arg8[%c112_66, %c0_67], %216 {strides = array<i32>} : memref<128x32xf32, #tpu.memory_space<vmem>>, vector<16x32xf32>,
    %c0_68 = arith.constant 0 : index
    %c0_69 = arith.constant 0 : index
    %218 = vector.load %arg8[%c0_68, %c0_69] : memref<128x32xf32, #tpu.memory_space<vmem>>, vector<128x32xf32>
    %219 = tpu.transpose %218, [1, 0] : vector<128x32xf32> -> vector<32x128xf32>
    %c0_70 = arith.constant 0 : index
    %c0_71 = arith.constant 0 : index
    %220 = vector.load %arg4[%c0_70, %c0_71] : memref<64x72xf32, #tpu.memory_space<vmem>>, vector<64x32xf32>
    %221 = arith.truncf %220 : vector<64x32xf32> to vector<64x32xbf16>
    %c0_72 = arith.constant 0 : index
    %c64_73 = arith.constant 64 : index
    %222 = vector.load %arg4[%c0_72, %c64_73] : memref<64x72xf32, #tpu.memory_space<vmem>>, vector<64x1xf32>
    %223 = arith.truncf %219 : vector<32x128xf32> to vector<32x128xbf16>
    %cst_74 = arith.constant dense<0.000000e+00> : vector<64x128xf32>
    %224 = tpu.matmul %221, %223, %cst_74 {dimension_numbers = #tpu.dot_dimension_numbers<[1], [0], [0], [1], [0, 0, 1, 1], [], []>} : vector<64x32xbf16>, vector<32x128xbf16>, vector<64x128xf32> -> vector<64x128xf32>
    %225 = vector.broadcast %222 : vector<64x1xf32> to vector<64x128xf32>
    %226 = arith.addf %224, %225 : vector<64x128xf32>
    %cst_75 = arith.constant 5.000000e-01 : f32
    %227 = vector.broadcast %cst_75 : f32 to vector<64x128xf32>
    %228 = arith.mulf %227, %226 : vector<64x128xf32>
    %cst_76 = arith.constant 4.471500e-02 : f32
    %229 = vector.broadcast %cst_76 : f32 to vector<64x128xf32>
    %230 = arith.mulf %229, %226 : vector<64x128xf32>
    %231 = arith.mulf %230, %226 : vector<64x128xf32>
    %232 = arith.mulf %231, %226 : vector<64x128xf32>
    %233 = arith.addf %226, %232 : vector<64x128xf32>
    %cst_77 = arith.constant 0.797884583 : f32
    %234 = vector.broadcast %cst_77 : f32 to vector<64x128xf32>
    %235 = arith.mulf %234, %233 : vector<64x128xf32>
    %236 = math.tanh %235 : vector<64x128xf32>
    %cst_78 = arith.constant 1.000000e+00 : f32
    %237 = vector.broadcast %cst_78 : f32 to vector<64x128xf32>
    %238 = arith.addf %237, %236 : vector<64x128xf32>
    %239 = arith.mulf %228, %238 : vector<64x128xf32>
    %c0_79 = arith.constant 0 : index
    %c65 = arith.constant 65 : index
    %240 = vector.load %arg4[%c0_79, %c65] : memref<64x72xf32, #tpu.memory_space<vmem>>, vector<64x1xf32>
    %c0_80 = arith.constant 0 : index
    %c66 = arith.constant 66 : index
    %241 = vector.load %arg4[%c0_80, %c66] : memref<64x72xf32, #tpu.memory_space<vmem>>, vector<1x1xf32>
    %242 = vector.broadcast %240 : vector<64x1xf32> to vector<64x128xf32>
    %243 = arith.mulf %239, %242 : vector<64x128xf32>
    %cst_81 = arith.constant dense<0.000000e+00> : vector<128xf32>
    %244 = vector.multi_reduction <add>, %243, %cst_81 [0] : vector<64x128xf32> to vector<128xf32>
    %245 = vector.shape_cast %244 : vector<128xf32> to vector<1x128xf32>
    %246 = vector.broadcast %241 : vector<1x1xf32> to vector<1x128xf32>
    %247 = arith.addf %245, %246 : vector<1x128xf32>
    %c0_82 = arith.constant 0 : index
    %c0_83 = arith.constant 0 : index
    %248 = vector.load %arg6[%c0_82, %c0_83] : memref<1x128xf32, #tpu.memory_space<vmem>>, vector<1x128xf32>
    tpu.vector_store %arg6[%c0_82, %c0_83], %247 {strides = array<i32>} : memref<1x128xf32, #tpu.memory_space<vmem>>, vector<1x128xf32>,
    return
  }
  func.func @transform_0(%arg0: i32) -> (i32, i32) {
    %c0_i32 = arith.constant 0 : i32
    %c0_i32_0 = arith.constant 0 : i32
    %c0_i32_1 = arith.constant 0 : i32
    return %c0_i32, %c0_i32_0 : i32, i32
  }
  func.func @transform_1(%arg0: i32) -> (i32, i32) {
    %c0_i32 = arith.constant 0 : i32
    %c0_i32_0 = arith.constant 0 : i32
    %c0_i32_1 = arith.constant 0 : i32
    return %c0_i32, %c0_i32_0 : i32, i32
  }
  func.func @transform_2(%arg0: i32) -> (i32, i32) {
    %c0_i32 = arith.constant 0 : i32
    %c0_i32_0 = arith.constant 0 : i32
    %c0_i32_1 = arith.constant 0 : i32
    return %c0_i32, %c0_i32_0 : i32, i32
  }
  func.func @transform_3(%arg0: i32) -> (i32, i32) {
    %c0_i32 = arith.constant 0 : i32
    %c0_i32_0 = arith.constant 0 : i32
    %c0_i32_1 = arith.constant 0 : i32
    return %c0_i32, %c0_i32_0 : i32, i32
  }
  func.func @transform_4(%arg0: i32) -> (i32, i32) {
    %c0_i32 = arith.constant 0 : i32
    %c0_i32_0 = arith.constant 0 : i32
    %c0_i32_1 = arith.constant 0 : i32
    return %c0_i32, %c0_i32_0 : i32, i32
  }
  func.func @transform_5(%arg0: i32) -> (i32, i32) {
    %c0_i32 = arith.constant 0 : i32
    %c0_i32_0 = arith.constant 0 : i32
    %c0_i32_1 = arith.constant 0 : i32
    return %c0_i32, %c0_i32_0 : i32, i32
  }
}

</mosaic_0001>

<bundles_post_ra>
// kernel: forward.1
= control target key start
LH: loop header
LB: loop body
LE: loop exit
PB: predicated region body
PF: predicated region fallthrough
CT: control target
= control target key end

     0   :  { %v6442_v0 = vmov 0   ;;  %s6449_s8 = smov 64   ;;  %s6451_s13 = smov 96   ;;  %s9137_s0 = inlined_call_operand.vmem [shape: f32[128,1], index: 0, kind: input, shape index: {}]   ;;  %s9138_s4 = inlined_call_operand.vmem [shape: f32[8,128], index: 4, kind: input, shape index: {}]   ;;  %s9139_s2 = inlined_call_operand.vmem [shape: f32[96,128], index: 2, kind: input, shape index: {}]   ;;  %s9140_s1 = inlined_call_operand.vmem [shape: f32[32,32], index: 1, kind: input, shape index: {}]   ;;  %s9141_s3 = inlined_call_operand.vmem [shape: f32[64,72], index: 3, kind: input, shape index: {}]   ;;  %s9142_s5 = inlined_call_operand.vmem [shape: f32[1,128], index: 5, kind: output, shape index: {}]  }
   0x1   :  { %6214 = vset.pattern.permute.xlu1 %v6442_v0  ;;  %6213 = vset.pattern.permute.xlu0 %v6442_v0  ;;  %v39_v1 = vld [vmem:[%s9137_s0 + $0x70] sm:$0xff]  ;;  %v37_v2 = vld [vmem:[%s9137_s0 + $0x60] sm:$0xff]  ;;  %v40_v3 = vld [vmem:[%s9137_s0 + $0x78] sm:$0xff] }
   0x2   :  { %v69_v4 = vmul.f32 1.442695, %v39_v1  ;;  %v65_v5 = vmul.f32 1.442695, %v37_v2  ;;  %v71_v6 = vmul.f32 1.442695, %v40_v3 }
   0x3   :  { %v38_v7 = vld [vmem:[%s9137_s0 + $0x68] sm:$0xff]  ;;  %v6505_v10 = vld [vmem:[%s9137_s0] sm:$0xff]  ;;  %v28_v13 = vld [vmem:[%s9137_s0 + $0x18] sm:$0xff] }
   0x4   :  { %v6500_v8 = vld [vmem:[%s9137_s0 + $0x8] sm:$0xff]  ;;  %6219 = vpow2.f32 %v69_v4  ;;  %v67_v9 = vmul.f32 1.442695, %v38_v7  ;;  %v41_v12 = vmul.f32 1.442695, %v6505_v10  ;;  %v27_v14 = vld [vmem:[%s9137_s0 + $0x10] sm:$0xff] }
   0x5   :  { %6221 = vpow2.f32 %v65_v5  ;;  %v43_v11 = vmul.f32 1.442695, %v6500_v8  ;;  %v47_v15 = vmul.f32 1.442695, %v28_v13  ;;  %v45_v16 = vmul.f32 1.442695, %v27_v14 }
   0x6   :  { %6223 = vpow2.f32 %v71_v6  ;;  %v30_v17 = vld [vmem:[%s9137_s0 + $0x28] sm:$0xff]  ;;  %v29_v18 = vld [vmem:[%s9137_s0 + $0x20] sm:$0xff]  ;;  %v32_v23 = vld [vmem:[%s9137_s0 + $0x38] sm:$0xff]  ;;  %v9150_v14 = vmov 2102212464  }
   0x7   :  { %6225 = vpow2.f32 %v67_v9  ;;  %v51_v20 = vmul.f32 1.442695, %v30_v17  ;;  %v49_v22 = vmul.f32 1.442695, %v29_v18  ;;  %v31_v25 = vld [vmem:[%s9137_s0 + $0x30] sm:$0xff]  ;;  %v34_v29 = vld [vmem:[%s9137_s0 + $0x48] sm:$0xff] }
   0x8   :  { %6227 = vpow2.f32 %v43_v11  ;;  %v55_v27 = vmul.f32 1.442695, %v32_v23  ;;  %v53_v28 = vmul.f32 1.442695, %v31_v25  ;;  %v33_v31 = vld [vmem:[%s9137_s0 + $0x40] sm:$0xff]  ;;  %v36_v35 = vld [vmem:[%s9137_s0 + $0x58] sm:$0xff] }
   0x9   :  { %6229 = vpow2.f32 %v41_v12  ;;  %v59_v33 = vmul.f32 1.442695, %v34_v29  ;;  %v57_v34 = vmul.f32 1.442695, %v33_v31  ;;  %v35_v37 = vld [vmem:[%s9137_s0 + $0x50] sm:$0xff] }
   0xa   :  { %6231 = vpow2.f32 %v47_v15  ;;  %v63_v39 = vmul.f32 1.442695, %v36_v35  ;;  %v61_v40 = vmul.f32 1.442695, %v35_v37  ;;  %v6544_v49 = vld [vmem:[%s9138_s4 + $0x3] ss:$0 sm:$0xff] }
   0xb   :  { %6233 = vpow2.f32 %v45_v16  ;;  %v9154_v12 = vmov 2131351028   ;;  %v9148_v16 = vmov 920167782  }
   0xc   :  { %6235 = vpow2.f32 %v51_v20 }
   0xd   :  { %6237 = vpow2.f32 %v49_v22 }
   0xe   :  { %v6220_v19 = vpop.eup %6219  ;;  %6239 = vpow2.f32 %v55_v27 }
   0xf   :  { %v6222_v21 = vpop.eup %6221  ;;  %145 = vperm.xlu1 %6214, %v6220_v19   ;;  %6241 = vpow2.f32 %v53_v28 }
  0x10   :  { %v6224_v24 = vpop.eup %6223  ;;  %135 = vperm.xlu0 %6213, %v6222_v21   ;;  %6243 = vpow2.f32 %v59_v33 }
  0x11   :  { %v6226_v26 = vpop.eup %6225  ;;  %6245 = vpow2.f32 %v57_v34 }
  0x12   :  { %v6228_v30 = vpop.eup %6227  ;;  %6247 = vpow2.f32 %v63_v39 }
  0x13   :  { %150 = vperm.xlu1 %6214, %v6224_v24   ;;  %v6230_v32 = vpop.eup %6229  ;;  %6249 = vpow2.f32 %v61_v40  ;;  %v9152_v24 = vmov 1326507024  }
  0x14   :  { %140 = vperm.xlu0 %6213, %v6226_v26   ;;  %v6232_v36 = vpop.eup %6231 }
  0x15   :  { %v6234_v38 = vpop.eup %6233 }
  0x16   :  { %v6236_v41 = vpop.eup %6235 }
  0x17   :  { %80 = vperm.xlu1 %6214, %v6228_v30   ;;  %v6238_v42 = vpop.eup %6237 }
  0x18   :  { %75 = vperm.xlu0 %6213, %v6230_v32   ;;  %v6240_v43 = vpop.eup %6239 }
  0x19   :  { %v6242_v44 = vpop.eup %6241 }
  0x1a   :  { %v6244_v45 = vpop.eup %6243 }
  0x1b   :  { %90 = vperm.xlu1 %6214, %v6232_v36   ;;  %v6246_v46 = vpop.eup %6245 }
  0x1c   :  { %85 = vperm.xlu0 %6213, %v6234_v38   ;;  %v6248_v47 = vpop.eup %6247 }
  0x1d   :  { %v6250_v48 = vpop.eup %6249 }
  0x1f   :  { %100 = vperm.xlu1 %6214, %v6236_v41  }
  0x20   :  { %95 = vperm.xlu0 %6213, %v6238_v42  }
  0x23   :  { %110 = vperm.xlu1 %6214, %v6240_v43  }
  0x24   :  { %105 = vperm.xlu0 %6213, %v6242_v44  }
  0x27   :  { %120 = vperm.xlu1 %6214, %v6244_v45  }
  0x28   :  { %115 = vperm.xlu0 %6213, %v6246_v46  }
  0x2b   :  { %130 = vperm.xlu1 %6214, %v6248_v47  }
  0x2c   :  { %125 = vperm.xlu0 %6213, %v6250_v48  }
  0x2f   :  { %3887 = vperm.xlu1 %6214, %v6500_v8   ;;  %v9159_v8 = vmov 683565275  }
  0x30   :  { %3882 = vperm.xlu0 %6213, %v6505_v10   ;;  %v9157_v10 = vmov 2475754826  }
  0x8e   :  { %v146_v50 = vpop.permute.xlu1 %145 }
  0x8f   :  { %v6547_v51 = vmul.f32 %v6544_v49, %v146_v50  ;;  %v6549_v52 = vpop.permute.xlu0 %135 }
  0x91   :  { %9273 = vst [vmem:[#allocation4_spill] sm:$0xff] %v6547_v51  ;;  %v1632_v53 = vand.u32 2139095040, %v6547_v51  ;;  %v9146_v54 = vand.u32 2147483647, %v6547_v51 }
  0x92   :  { %v151_v55 = vpop.permute.xlu1 %150 }
  0x93   :  { %v1633_v56 = vshrl.u32 %v1632_v53, 23  ;;  %v6554_v57 = vmul.f32 %v6544_v49, %v151_v55  ;;  %v141_v59 = vpop.permute.xlu0 %140  ;;  %v1636_v60 = vand.u32 8388607, %v9146_v54 }
  0x94   :  { %v6560_v63 = vmul.f32 %v6544_v49, %v141_v59 }
  0x95   :  { %9274 = vst [vmem:[#allocation5_spill] sm:$0xff] %v6554_v57  ;;  %v5635_v58 = vadd.s32 4294967169, %v1633_v56  ;;  %v1736_v62 = vand.u32 2139095040, %v6554_v57  ;;  %v1637_v0 = vor.u32 8388608, %v1636_v60  ;;  %v9145_v5 = vand.u32 2147483647, %v6554_v57 }
  0x96   :  { %9275 = vst [vmem:[#allocation6_spill] sm:$0xff] %v6560_v63  ;;  %v1528_v6 = vand.u32 2139095040, %v6560_v63 }
  0x97   :  { %v1639_v61 = vadd.s32 1, %v5635_v58  ;;  %v1737_v3 = vshrl.u32 %v1736_v62, 23  ;;  %v1677_v18 = vshll.u32 %v1637_v0, 8  ;;  %v1740_v26 = vand.u32 8388607, %v9145_v5 }
  0x98   :  { %v1529_v27 = vshrl.u32 %v1528_v6, 23 }
  0x99   :  { %vm1640_vm0 = vcmp.gt.s32.totalorder %v1639_v61, 0  ;;  %v5639_v22 = vadd.s32 4294967169, %v1737_v3  ;;  %v1741_v43 = vor.u32 8388608, %v1740_v26 }
  0x9a   :  { %v1641_v1 = vsel %vm1640_vm0, %v1639_v61, 0  ;;  %v5631_v40 = vadd.s32 4294967169, %v1529_v27  ;;  %v9147_v61 = vand.u32 2147483647, %v6560_v63 }
  0x9b   :  { %v1643_v2 = vand.u32 31, %v1641_v1  ;;  %v1642_v4 = vshrl.u32 %v1641_v1, 5  ;;  %v1743_v37 = vadd.s32 1, %v5639_v22  ;;  %v6591_v1 = vshll.u32 %v1741_v43, 8 }
  0x9c   :  { %v1535_v56 = vadd.s32 1, %v5631_v40 }
  0x9d   :  { %v1644_v7 = vsub.s32 32, %v1643_v2  ;;  %v1646_v9 = vshll.u32 %v9159_v8, %v1643_v2  ;;  %v1649_v11 = vshll.u32 %v9157_v10, %v1643_v2  ;;  %v1652_v13 = vshll.u32 %v9154_v12, %v1643_v2 }
  0x9e   :  { %v1655_v15 = vshll.u32 %v9150_v14, %v1643_v2  ;;  %v1658_v17 = vshll.u32 %v9148_v16, %v1643_v2  ;;  %vm1661_vm1 = vcmp.lt.s32.totalorder %v1642_v4, 1  ;;  %vm1664_vm2 = vcmp.lt.s32.totalorder %v1642_v4, 4 }
  0x9f   :  { %v1647_v19 = vshrl.u32 %v9157_v10, %v1644_v7  ;;  %v1650_v20 = vshrl.u32 %v9154_v12, %v1644_v7  ;;  %v1653_v21 = vshrl.u32 %v9150_v14, %v1644_v7  ;;  %v1656_v23 = vshrl.u32 %v9148_v16, %v1644_v7 }
  0xa0   :  { %v1659_v25 = vshrl.u32 %v9152_v24, %v1644_v7  ;;  %v1645_v31 = vshrl.u32 %v9159_v8, %v1644_v7  ;;  %vm1663_vm3 = vcmp.lt.s32.totalorder %v1642_v4, 3  ;;  %vm1662_vm4 = vcmp.lt.s32.totalorder %v1642_v4, 2 }
  0xa1   :  { %v1648_v28 = vor.u32 %v1647_v19, %v1646_v9  ;;  %v1651_v29 = vor.u32 %v1650_v20, %v1649_v11  ;;  %v1654_v30 = vor.u32 %v1653_v21, %v1652_v13  ;;  %v1657_v32 = vor.u32 %v1656_v23, %v1655_v15 }
  0xa2   :  { %v1660_v33 = vor.u32 %v1659_v25, %v1658_v17  ;;  %vm1744_vm5 = vcmp.gt.s32.totalorder %v1743_v37, 0  ;;  %vm1536_vm6 = vcmp.gt.s32.totalorder %v1535_v56, 0 }
  0xa3   :  { %v1666_v34 = vsel %vm1664_vm2, %v1654_v30, 2102212464  ;;  %v1669_v35 = vsel %vm1661_vm1, %v1648_v28, %v1651_v29  ;;  %v1673_v36 = vsel %vm1661_vm1, %v1651_v29, %v1654_v30  ;;  %v1670_v38 = vsel %vm1664_vm2, %v1657_v32, 920167782 }
  0xa4   :  { %v1674_v39 = vsel %vm1664_vm2, %v1660_v33, 1326507024  ;;  %v1671_v41 = vsel %vm1663_vm3, %v1654_v30, %v1670_v38  ;;  %v1665_v44 = vsel %vm1661_vm1, %v1645_v31, %v1648_v28  ;;  %v1667_v45 = vsel %vm1663_vm3, %v1651_v29, %v1666_v34 }
  0xa5   :  { %v1675_v42 = vsel %vm1663_vm3, %v1657_v32, %v1674_v39  ;;  %v1672_v46 = vsel %vm1662_vm4, %v1669_v35, %v1671_v41  ;;  %v1668_v58 = vsel %vm1662_vm4, %v1665_v44, %v1667_v45  ;;  %v1745_v59 = vsel %vm1744_vm5, %v1743_v37, 0 }
  0xa6   :  { %v1676_v47 = vsel %vm1662_vm4, %v1673_v36, %v1675_v42  ;;  %v6583_v53 = vmul.u32.u64.low %v1677_v18, %v1672_v46  ;;  %v6584_v55 = vmul.u32.u64.high %v1677_v18, %v1672_v46, %v6583_v53  ;;  %v1747_v60 = vand.u32 31, %v1745_v59 }
  0xa7   :  { %v6580_v48 = vmul.u32.u64.low %v1677_v18, %v1676_v47  ;;  %v6581_v50 = vmul.u32.u64.high %v1677_v18, %v1676_v47, %v6580_v48  ;;  %v1746_v0 = vshrl.u32 %v1745_v59, 5  ;;  %v1684_v2 = vmul.u32 %v1677_v18, %v1668_v58 }
  0xa8   :  { %v1687_v62 = vadd.s32 1, %v6584_v55  ;;  %v1748_v3 = vsub.s32 32, %v1747_v60  ;;  %v1750_v4 = vshll.u32 %v9159_v8, %v1747_v60  ;;  %v1537_v6 = vsel %vm1536_vm6, %v1535_v56, 0 }
  0xa9   :  { %vm1686_vm7 = vc.u32 %v6581_v50, %v6583_v53  ;;  %v1753_v9 = vshll.u32 %v9157_v10, %v1747_v60  ;;  %v1756_v11 = vshll.u32 %v9154_v12, %v1747_v60  ;;  %v1759_v13 = vshll.u32 %v9150_v14, %v1747_v60 }
  0xaa   :  { %v1688_v7 = vsel %vm1686_vm7, %v1687_v62, %v6584_v55  ;;  %v1751_v17 = vshrl.u32 %v9157_v10, %v1748_v3  ;;  %v1754_v19 = vshrl.u32 %v9154_v12, %v1748_v3  ;;  %v1762_v20 = vshll.u32 %v9148_v16, %v1747_v60 }
  0xab   :  { %v1689_v15 = vadd.s32 %v1688_v7, %v1684_v2  ;;  %v1757_v18 = vshrl.u32 %v9150_v14, %v1748_v3  ;;  %v1760_v21 = vshrl.u32 %v9148_v16, %v1748_v3  ;;  %v1763_v22 = vshrl.u32 %v9152_v24, %v1748_v3 }
  0xac   :  { %vm1765_vm8 = vcmp.lt.s32.totalorder %v1746_v0, 1  ;;  %v1749_v25 = vshrl.u32 %v9159_v8, %v1748_v3  ;;  %v1752_v26 = vor.u32 %v1751_v17, %v1750_v4  ;;  %v1755_v27 = vor.u32 %v1754_v19, %v1753_v9 }
  0xad   :  { %v1690_v23 = vadd.s32 536870912, %v1689_v15  ;;  %v1758_v28 = vor.u32 %v1757_v18, %v1756_v11  ;;  %v1761_v29 = vor.u32 %v1760_v21, %v1759_v13  ;;  %v1764_v30 = vor.u32 %v1763_v22, %v1762_v20 }
  0xae   :  { %vm1766_vm9 = vcmp.lt.s32.totalorder %v1746_v0, 2  ;;  %vm1767_vm10 = vcmp.lt.s32.totalorder %v1746_v0, 3  ;;  %vm1768_vm11 = vcmp.lt.s32.totalorder %v1746_v0, 4  ;;  %v1773_v32 = vsel %vm1765_vm8, %v1752_v26, %v1755_v27 }
  0xaf   :  { %v6605_v31 = vshrl.u32 %v1690_v23, 30  ;;  %v1770_v33 = vsel %vm1768_vm11, %v1758_v28, 2102212464  ;;  %v1774_v34 = vsel %vm1768_vm11, %v1761_v29, 920167782  ;;  %v1777_v35 = vsel %vm1765_vm8, %v1755_v27, %v1758_v28 }
  0xb0   :  { %v1778_v36 = vsel %vm1768_vm11, %v1764_v30, 1326507024  ;;  %v1769_v38 = vsel %vm1765_vm8, %v1749_v25, %v1752_v26  ;;  %v1775_v39 = vsel %vm1767_vm10, %v1758_v28, %v1774_v34  ;;  %v1771_v41 = vsel %vm1767_vm10, %v1755_v27, %v1770_v33  ;;  %v81_v28 = vpop.permute.xlu1 %80 }
  0xb1   :  { %9276 = vst [vmem:[#allocation7_spill] sm:$0xff] %v6605_v31  ;;  %v1692_v37 = vshll.u32 %v6605_v31, 30  ;;  %v1779_v40 = vsel %vm1767_vm10, %v1761_v29, %v1778_v36  ;;  %v1776_v42 = vsel %vm1766_vm9, %v1773_v32, %v1775_v39  ;;  %v1539_v44 = vand.u32 31, %v1537_v6 }
  0xb2   :  { %v1780_v43 = vsel %vm1766_vm9, %v1777_v35, %v1779_v40  ;;  %v6615_v45 = vmul.f32 %v6544_v49, %v6549_v52  ;;  %v6622_v48 = vmul.u32.u64.low %v6591_v1, %v1776_v42  ;;  %v6623_v55 = vmul.u32.u64.high %v6591_v1, %v1776_v42, %v6622_v48 }
  0xb3   :  { %v6618_v46 = vmul.u32.u64.low %v6591_v1, %v1780_v43  ;;  %v6619_v47 = vmul.u32.u64.high %v6591_v1, %v1780_v43, %v6618_v46  ;;  %v1532_v56 = vand.u32 8388607, %v9147_v61  ;;  %v1540_v58 = vsub.s32 32, %v1539_v44 }
  0xb4   :  { %v6628_v59 = vsub.s32 %v1689_v15, %v1692_v37  ;;  %v1772_v60 = vsel %vm1766_vm9, %v1769_v38, %v1771_v41  ;;  %v6631_v62 = vshrl.u32 %v1537_v6, 5  ;;  %v1542_v52 = vshll.u32 %v9159_v8, %v1539_v44 }
  0xb5   :  { %v1543_v2 = vshrl.u32 %v9157_v10, %v1540_v58  ;;  %v1545_v3 = vshll.u32 %v9157_v10, %v1539_v44  ;;  %v1546_v4 = vshrl.u32 %v9154_v12, %v1540_v58  ;;  %v1549_v7 = vshrl.u32 %v9150_v14, %v1540_v58 }
  0xb6   :  { %vm1790_vm12 = vc.u32 %v6619_v47, %v6622_v48  ;;  %v1548_v9 = vshll.u32 %v9154_v12, %v1539_v44  ;;  %v1551_v0 = vshll.u32 %v9150_v14, %v1539_v44  ;;  %v1552_v6 = vshrl.u32 %v9148_v16, %v1540_v58 }
  0xb7   :  { %v1791_v11 = vadd.s32 1, %v6623_v55  ;;  %v1544_v13 = vor.u32 %v1543_v2, %v1542_v52  ;;  %v1547_v15 = vor.u32 %v1546_v4, %v1545_v3  ;;  %v1788_v17 = vmul.u32 %v6591_v1, %v1772_v60 }
  0xb8   :  { %v1550_v19 = vor.u32 %v1549_v7, %v1548_v9  ;;  %v1553_v20 = vor.u32 %v1552_v6, %v1551_v0  ;;  %v1555_v18 = vshrl.u32 %v9152_v24, %v1540_v58  ;;  %v1424_v21 = vand.u32 2139095040, %v6615_v45 }
  0xb9   :  { %v1792_v22 = vsel %vm1790_vm12, %v1791_v11, %v6623_v55  ;;  %v1533_v23 = vor.u32 8388608, %v1532_v56  ;;  %v1554_v25 = vshll.u32 %v9148_v16, %v1539_v44  ;;  %v1695_v26 = vsub.s32 0, %v6628_v59 }
  0xba   :  { %v1793_v27 = vadd.s32 %v1792_v22, %v1788_v17  ;;  %vm1557_vm13 = vcmp.lt.s32.totalorder %v6631_v62, 1  ;;  %vm1560_vm14 = vcmp.lt.s32.totalorder %v6631_v62, 4  ;;  %vm1559_vm15 = vcmp.lt.s32.totalorder %v6631_v62, 3 }
  0xbb   :  { %v1556_v1 = vor.u32 %v1555_v18, %v1554_v25  ;;  %v1565_v29 = vsel %vm1557_vm13, %v1544_v13, %v1547_v15  ;;  %v1566_v30 = vsel %vm1560_vm14, %v1553_v20, 920167782  ;;  %vm1558_vm0 = vcmp.lt.s32.totalorder %v6631_v62, 2  ;;  %v91_v62 = vpop.permute.xlu1 %90 }
  0xbc   :  { %v1794_v32 = vadd.s32 536870912, %v1793_v27  ;;  %v1567_v33 = vsel %vm1559_vm15, %v1550_v19, %v1566_v30  ;;  %v6663_v35 = vmul.f32 %v6544_v49, %v81_v28  ;;  %v1569_v37 = vsel %vm1557_vm13, %v1547_v15, %v1550_v19 }
  0xbd   :  { %v1568_v34 = vsel %vm1558_vm0, %v1565_v29, %v1567_v33  ;;  %v1573_v38 = vshll.u32 %v1533_v23, 8  ;;  %v5636_v39 = vmin.u32 %v1695_v26, %v6628_v59  ;;  %v1425_v40 = vshrl.u32 %v1424_v21, 23 }
  0xbe   :  { %v6665_v36 = vshrl.u32 %v1794_v32, 30  ;;  %v1570_v41 = vsel %vm1560_vm14, %v1556_v1, 1326507024  ;;  %v280_v56 = vand.u32 2139095040, %v6663_v35  ;;  %v1562_v9 = vsel %vm1560_vm14, %v1550_v19, 2102212464 }
  0xbf   :  { %v1571_v43 = vsel %vm1559_vm15, %v1553_v20, %v1570_v41  ;;  %v6675_v44 = vmul.u32.u64.low %v1573_v38, %v1568_v34  ;;  %v6676_v46 = vmul.u32.u64.high %v1573_v38, %v1568_v34, %v6675_v44  ;;  %v5627_v52 = vadd.s32 4294967169, %v1425_v40 }
  0xc0   :  { %9277 = vst [vmem:[#allocation8_spill] sm:$0xff] %v6665_v36  ;;  %v1796_v42 = vshll.u32 %v6665_v36, 30  ;;  %v1572_v55 = vsel %vm1558_vm0, %v1569_v37, %v1571_v43  ;;  %v281_v4 = vshrl.u32 %v280_v56, 23  ;;  %v1697_v7 = vclz %v5636_v39 }
  0xc1   :  { %v6684_v2 = vmul.u32.u64.low %v1573_v38, %v1572_v55  ;;  %v6685_v3 = vmul.u32.u64.high %v1573_v38, %v1572_v55, %v6684_v2  ;;  %v1541_v6 = vshrl.u32 %v9159_v8, %v1540_v58  ;;  %v1431_v17 = vadd.s32 1, %v5627_v52 }
  0xc2   :  { %v6682_v60 = vsub.s32 %v1793_v27, %v1796_v42  ;;  %v5583_v11 = vadd.s32 4294967169, %v281_v4  ;;  %v1563_v18 = vsel %vm1559_vm15, %v1547_v15, %v1562_v9  ;;  %v5637_v22 = vadd.s32 4294967294, %v1697_v7  ;;  %v76_v27 = vpop.permute.xlu0 %75 }
  0xc3   :  { %v1561_v20 = vsel %vm1557_vm13, %v1541_v6, %v1544_v13  ;;  %v1583_v23 = vadd.s32 1, %v6676_v46  ;;  %v9144_v25 = vand.u32 2147483647, %v6663_v35  ;;  %vm1582_vm1 = vc.u32 %v6685_v3, %v6675_v44 }
  0xc4   :  { %v1799_v0 = vsub.s32 0, %v6682_v60  ;;  %v287_v21 = vadd.s32 1, %v5583_v11  ;;  %v1564_v58 = vsel %vm1558_vm0, %v1561_v20, %v1563_v18  ;;  %vm1432_vm3 = vcmp.gt.s32.totalorder %v1431_v17, 0 }
  0xc5   :  { %vm5638_vm4 = vcmp.lt.s32.totalorder %v5637_v22, 0  ;;  %v1584_v15 = vsel %vm1582_vm1, %v1583_v23, %v6676_v46  ;;  %v284_v28 = vand.u32 8388607, %v9144_v25  ;;  %v1580_v29 = vmul.u32 %v1573_v38, %v1564_v58 }
  0xc6   :  { %v5640_v19 = vmin.u32 %v1799_v0, %v6682_v60  ;;  %vm288_vm2 = vcmp.gt.s32.totalorder %v287_v21, 0  ;;  %v6705_v32 = vsel %vm1432_vm3, %v1431_v17, 0  ;;  %v6708_v33 = vmul.f32 %v6544_v49, %v76_v27 }
  0xc7   :  { %v289_v26 = vsel %vm288_vm2, %v287_v21, 0  ;;  %v6710_v34 = vsel %vm5638_vm4, 0, %v5637_v22  ;;  %v1585_v37 = vadd.s32 %v1584_v15, %v1580_v29  ;;  %v285_v41 = vor.u32 8388608, %v284_v28 }
  0xc8   :  { %v291_v13 = vand.u32 31, %v289_v26  ;;  %v1801_v1 = vclz %v5640_v19  ;;  %9278 = vst [vmem:[#allocation9_spill] sm:$0xff] %v6708_v33  ;;  %v6717_v55 = vshrl.u32 %v289_v26, 5  ;;  %v6721_v52 = vmul.f32 %v6544_v49, %v91_v62 }
  0xc9   :  { %v1586_v0 = vadd.s32 536870912, %v1585_v37  ;;  %v1685_v20 = vadd.s32 %v6583_v53, %v6581_v50  ;;  %v1705_v18 = vsub.s32 4294967266, %v6710_v34  ;;  %v6731_v21 = vand.u32 31, %v6705_v32 }
  0xca   :  { %v292_v30 = vsub.s32 32, %v291_v13  ;;  %v294_v42 = vshll.u32 %v9159_v8, %v291_v13  ;;  %v297_v43 = vshll.u32 %v9157_v10, %v291_v13  ;;  %v5641_v46 = vadd.s32 4294967294, %v1801_v1  ;;  %9279 = vst [vmem:[#allocation10_spill] sm:$0xff] %v6721_v52 }
  0xcb   :  { %v300_v56 = vshll.u32 %v9154_v12, %v291_v13  ;;  %v303_v7 = vshll.u32 %v9150_v14, %v291_v13  ;;  %v306_v11 = vshll.u32 %v9148_v16, %v291_v13  ;;  %vm309_vm6 = vcmp.lt.s32.totalorder %v6717_v55, 1 }
  0xcc   :  { %v295_v39 = vshrl.u32 %v9157_v10, %v292_v30  ;;  %v298_v40 = vshrl.u32 %v9154_v12, %v292_v30  ;;  %v301_v38 = vshrl.u32 %v9150_v14, %v292_v30  ;;  %v304_v9 = vshrl.u32 %v9148_v16, %v292_v30 }
  0xcd   :  { %v307_v17 = vshrl.u32 %v9152_v24, %v292_v30  ;;  %vm5642_vm5 = vcmp.lt.s32.totalorder %v5641_v46, 0  ;;  %v488_v19 = vand.u32 2139095040, %v6721_v52  ;;  %v1701_v58 = vsub.s32 32, %v6710_v34 }
  0xce   :  { %v296_v2 = vor.u32 %v295_v39, %v294_v42  ;;  %v299_v4 = vor.u32 %v298_v40, %v297_v43  ;;  %v302_v6 = vor.u32 %v301_v38, %v300_v56  ;;  %v305_v22 = vor.u32 %v304_v9, %v303_v7 }
  0xcf   :  { %v308_v23 = vor.u32 %v307_v17, %v306_v11  ;;  %vm312_vm7 = vcmp.lt.s32.totalorder %v6717_v55, 4  ;;  %v6739_v50 = vshll.u32 %v285_v41, 8  ;;  %v6741_v53 = vshrl.u32 %v1586_v0, 30 }
  0xd0   :  { %v317_v26 = vsel %vm309_vm6, %v296_v2, %v299_v4  ;;  %vm311_vm8 = vcmp.lt.s32.totalorder %v6717_v55, 3  ;;  %v318_v13 = vsel %vm312_vm7, %v305_v22, 920167782  ;;  %v321_v27 = vsel %vm309_vm6, %v299_v4, %v302_v6 }
  0xd1   :  { %9280 = vst [vmem:[#allocation11_spill] sm:$0xff] %v6741_v53  ;;  %v1804_v15 = vsel %vm5642_vm5, 0, %v5641_v46  ;;  %vm310_vm9 = vcmp.lt.s32.totalorder %v6717_v55, 2  ;;  %v319_v28 = vsel %vm311_vm8, %v302_v6, %v318_v13  ;;  %v322_v1 = vsel %vm312_vm7, %v308_v23, 1326507024 }
  0xd2   :  { %v1706_v29 = vadd.s32 127, %v1705_v18  ;;  %v320_v62 = vsel %vm310_vm9, %v317_v26, %v319_v28  ;;  %v323_v39 = vsel %vm311_vm8, %v305_v22, %v322_v1  ;;  %v489_v40 = vshrl.u32 %v488_v19, 23 }
  0xd3   :  { %v324_v41 = vsel %vm310_vm9, %v321_v27, %v323_v39  ;;  %v6760_v42 = vmul.u32.u64.low %v6739_v50, %v320_v62  ;;  %v6761_v43 = vmul.u32.u64.high %v6739_v50, %v320_v62, %v6760_v42  ;;  %v176_v38 = vand.u32 2139095040, %v6708_v33  ;;  %v86_v39 = vpop.permute.xlu0 %85 }
  0xd4   :  { %v1809_v46 = vsub.s32 4294967266, %v1804_v15  ;;  %v1588_v56 = vshll.u32 %v6741_v53, 30  ;;  %v6767_v7 = vmul.u32.u64.low %v6739_v50, %v324_v41  ;;  %v6768_v9 = vmul.u32.u64.high %v6739_v50, %v324_v41, %v6767_v7 }
  0xd5   :  { %v6771_v0 = vsub.s32 32, %v6731_v21  ;;  %v314_v11 = vsel %vm312_vm7, %v302_v6, 2102212464  ;;  %v1703_v17 = vshrl.u32 %v1685_v20, %v1701_v58  ;;  %v6777_v18 = vshll.u32 %v9150_v14, %v6731_v21 }
  0xd6   :  { %v293_v22 = vshrl.u32 %v9159_v8, %v292_v30  ;;  %v5591_v23 = vadd.s32 4294967169, %v489_v40  ;;  %v1702_v19 = vshll.u32 %v6628_v59, %v6710_v34  ;;  %v1707_v26 = vshll.u32 %v1706_v29, 23 }
  0xd7   :  { %v1805_v13 = vsub.s32 32, %v1804_v15  ;;  %v177_v27 = vshrl.u32 %v176_v38, 23  ;;  %v1810_v28 = vadd.s32 127, %v1809_v46  ;;  %v6782_v1 = vsub.s32 %v1585_v37, %v1588_v56  ;;  %v101_v46 = vpop.permute.xlu1 %100 }
  0xd8   :  { %v313_v6 = vsel %vm309_vm6, %v293_v22, %v296_v2  ;;  %v315_v20 = vsel %vm311_vm8, %v299_v4, %v314_v11  ;;  %v6790_v58 = vshll.u32 %v9148_v16, %v6731_v21  ;;  %v1789_v30 = vadd.s32 %v6622_v48, %v6619_v47 }
  0xd9   :  { %v335_v59 = vadd.s32 1, %v6761_v43  ;;  %v9143_v34 = vand.u32 2147483647, %v6721_v52  ;;  %v6796_v29 = vor.u32 %v1703_v17, %v1702_v19  ;;  %v6800_v37 = vshrl.u32 %v9148_v16, %v6771_v0 }
  0xda   :  { %vm334_vm10 = vc.u32 %v6768_v9, %v6760_v42  ;;  %v495_v2 = vadd.s32 1, %v5591_v23  ;;  %v6804_v4 = vor.u32 4788187, %v1707_v26  ;;  %v1807_v62 = vshrl.u32 %v1789_v30, %v1805_v13 }
  0xdb   :  { %v316_v47 = vsel %vm310_vm9, %v313_v6, %v315_v20  ;;  %v5579_v48 = vadd.s32 4294967169, %v177_v27  ;;  %v6810_v40 = vshrl.u32 %v9152_v24, %v6771_v0  ;;  %v1811_v41 = vshll.u32 %v1810_v28, 23 }
  0xdc   :  { %v1591_v38 = vsub.s32 0, %v6782_v1  ;;  %vm496_vm11 = vcmp.gt.s32.totalorder %v495_v2, 0  ;;  %v1806_v56 = vshll.u32 %v6682_v60, %v1804_v15  ;;  %v336_v7 = vsel %vm334_vm10, %v335_v59, %v6761_v43 }
  0xdd   :  { %v492_v11 = vand.u32 8388607, %v9143_v34  ;;  %v497_v55 = vsel %vm496_vm11, %v495_v2, 0  ;;  %v1711_v17 = vcvt.s32.f32 %v6796_v29  ;;  %v332_v22 = vmul.u32 %v6739_v50, %v316_v47 }
  0xde   :  { %v499_v23 = vand.u32 31, %v497_v55  ;;  %v6820_v19 = vmul.f32 %v6544_v49, %v86_v39  ;;  %v1709_v26 = vand.u32 2147483647, %v6804_v4  ;;  %v6823_v13 = vor.u32 %v1807_v62, %v1806_v56 }
  0xdf   :  { %v6825_v27 = vadd.s32 1, %v5579_v48  ;;  %v6828_v60 = vmul.f32 %v6544_v49, %v101_v46  ;;  %v1812_v15 = vor.u32 4788187, %v1811_v41  ;;  %v5632_v43 = vmin.u32 %v1591_v38, %v6782_v1 }
  0xe0   :  { %9281 = vst [vmem:[#allocation12_spill] sm:$0xff] %v6820_v19  ;;  %v6831_v28 = vadd.s32 %v336_v7, %v332_v22  ;;  %v500_v6 = vsub.s32 32, %v499_v23  ;;  %v493_v50 = vor.u32 8388608, %v492_v11  ;;  %v498_v20 = vshrl.u32 %v497_v55, 5 }
  0xe1   :  { %9282 = vst [vmem:[#allocation13_spill] sm:$0xff] %v6828_v60  ;;  %v502_v30 = vshll.u32 %v9159_v8, %v499_v23  ;;  %v505_v59 = vshll.u32 %v9157_v10, %v499_v23  ;;  %v508_v62 = vshll.u32 %v9154_v12, %v499_v23  ;;  %v511_v47 = vshll.u32 %v9150_v14, %v499_v23 }
  0xe2   :  { %v503_v2 = vshrl.u32 %v9157_v10, %v500_v6  ;;  %v514_v48 = vshll.u32 %v9148_v16, %v499_v23  ;;  %v506_v39 = vshrl.u32 %v9154_v12, %v500_v6  ;;  %v509_v41 = vshrl.u32 %v9150_v14, %v500_v6 }
  0xe3   :  { %v512_v38 = vshrl.u32 %v9148_v16, %v500_v6  ;;  %v515_v46 = vshrl.u32 %v9152_v24, %v500_v6  ;;  %v1593_v56 = vclz %v5632_v43  ;;  %v338_v7 = vadd.s32 536870912, %v6831_v28 }
  0xe4   :  { %v504_v11 = vor.u32 %v503_v2, %v502_v30  ;;  %v384_v55 = vand.u32 2139095040, %v6820_v19  ;;  %v507_v22 = vor.u32 %v506_v39, %v505_v59  ;;  %v510_v34 = vor.u32 %v509_v41, %v508_v62 }
  0xe5   :  { %v513_v25 = vor.u32 %v512_v38, %v511_v47  ;;  %v516_v5 = vor.u32 %v515_v46, %v514_v48  ;;  %v501_v23 = vshrl.u32 %v9159_v8, %v500_v6  ;;  %vm517_vm12 = vcmp.lt.s32.totalorder %v498_v20, 1 }
  0xe6   :  { %vm520_vm13 = vcmp.lt.s32.totalorder %v498_v20, 4  ;;  %v533_v54 = vshll.u32 %v493_v50, 8  ;;  %vm519_vm14 = vcmp.lt.s32.totalorder %v498_v20, 3  ;;  %v525_v16 = vsel %vm517_vm12, %v504_v11, %v507_v22 }
  0xe7   :  { %v522_v61 = vsel %vm520_vm13, %v510_v34, 2102212464  ;;  %v526_v14 = vsel %vm520_vm13, %v513_v25, 920167782  ;;  %v6846_v24 = vshrl.u32 %v338_v7, 30  ;;  %vm518_vm15 = vcmp.lt.s32.totalorder %v498_v20, 2 }
  0xe8   :  { %v527_v43 = vsel %vm519_vm14, %v510_v34, %v526_v14  ;;  %v529_v30 = vsel %vm517_vm12, %v507_v22, %v510_v34  ;;  %v521_v2 = vsel %vm517_vm12, %v501_v23, %v504_v11  ;;  %v530_v62 = vsel %vm520_vm13, %v516_v5, 1326507024 }
  0xe9   :  { %9283 = vst [vmem:[#allocation14_spill] sm:$0xff] %v6846_v24  ;;  %v528_v59 = vsel %vm518_vm15, %v525_v16, %v527_v43  ;;  %v385_v47 = vshrl.u32 %v384_v55, 23  ;;  %v523_v48 = vsel %vm519_vm14, %v507_v22, %v522_v61  ;;  %v531_v39 = vsel %vm519_vm14, %v513_v25, %v530_v62 }
  0xea   :  { %v6849_v6 = vmul.u32.u64.low %v533_v54, %v528_v59  ;;  %v6850_v41 = vmul.u32.u64.high %v533_v54, %v528_v59, %v6849_v6  ;;  %v1813_v50 = vand.u32 2147483647, %v1812_v15  ;;  %v1815_v38 = vcvt.s32.f32 %v6823_v13 }
  0xeb   :  { %v532_v46 = vsel %vm518_vm15, %v529_v30, %v531_v39  ;;  %v5587_v7 = vadd.s32 4294967169, %v385_v47  ;;  %v5633_v12 = vadd.s32 4294967294, %v1593_v56  ;;  %v9156_v16 = vand.u32 2147483647, %v6820_v19 }
  0xec   :  { %v6855_v14 = vmul.u32.u64.low %v533_v54, %v532_v46  ;;  %v6856_v34 = vmul.u32.u64.high %v533_v54, %v532_v46, %v6855_v14  ;;  %v340_v5 = vshll.u32 %v6846_v24, 30  ;;  %v524_v61 = vsel %vm518_vm15, %v521_v2, %v523_v48 }
  0xed   :  { %v391_v25 = vadd.s32 1, %v5587_v7  ;;  %v696_v11 = vand.u32 2139095040, %v6828_v60  ;;  %v6863_v15 = vshrl.u32 %v6705_v32, 5  ;;  %v6867_v13 = vor.u32 %v6800_v37, %v6777_v18 }
  0xee   :  { %v1452_v56 = vor.u32 %v6810_v40, %v6790_v58  ;;  %v543_v55 = vadd.s32 1, %v6850_v41  ;;  %v6876_v20 = vmul.f32 %v1711_v17, %v1709_v26  ;;  %v6878_v22 = vmul.f32 %v1815_v38, %v1813_v50 }
  0xef   :  { %9284 = vst [vmem:[#allocation15_spill] sm:$0xff] %v6867_v13  ;;  %vm184_vm0 = vcmp.gt.s32.totalorder %v6825_v27, 0  ;;  %vm392_vm1 = vcmp.gt.s32.totalorder %v391_v25, 0  ;;  %vm5634_vm2 = vcmp.lt.s32.totalorder %v5633_v12, 0  ;;  %v540_v32 = vmul.u32 %v533_v54, %v524_v61 }
  0xf0   :  { %vm542_vm3 = vc.u32 %v6856_v34, %v6849_v6  ;;  %v388_v18 = vand.u32 8388607, %v9156_v16  ;;  %v6886_v58 = vsub.s32 %v6831_v28, %v340_v5  ;;  %v393_v37 = vsel %vm392_vm1, %v391_v25, 0 }
  0xf1   :  { %v544_v29 = vsel %vm542_vm3, %v543_v55, %v6850_v41  ;;  %v697_v4 = vshrl.u32 %v696_v11, 23  ;;  %vm1456_vm4 = vcmp.lt.s32.totalorder %v6863_v15, 4  ;;  %v6903_v26 = vadd.s32 %v6675_v44, %v6685_v3 }
  0xf2   :  { %v6890_v40 = vadd.s32 %v544_v29, %v540_v32  ;;  %v6895_v54 = vsel %vm1456_vm4, %v6867_v13, 920167782  ;;  %v6899_v17 = vsel %vm1456_vm4, %v1452_v56, 1326507024  ;;  %v395_v28 = vand.u32 31, %v393_v37 }
  0xf3   :  { %v1713_v23 = vxor.u32 2147483648, %v6876_v20  ;;  %v6908_v30 = vsel %vm5634_vm2, 0, %v5633_v12  ;;  %v185_v2 = vsel %vm184_vm0, %v6825_v27, 0  ;;  %v343_v59 = vsub.s32 0, %v6886_v58 }
  0xf4   :  { %v389_v62 = vor.u32 8388608, %v388_v18  ;;  %v396_v47 = vsub.s32 32, %v395_v28  ;;  %v5599_v48 = vadd.s32 4294967169, %v697_v4  ;;  %v546_v44 = vadd.s32 536870912, %v6890_v40 }
  0xf5   :  { %v394_v3 = vshrl.u32 %v393_v37, 5  ;;  %v398_v39 = vshll.u32 %v9159_v8, %v395_v28  ;;  %v401_v41 = vshll.u32 %v9157_v10, %v395_v28  ;;  %v9285_v12 = vmov 2131351028  }
  0xf6   :  { %v399_v50 = vshrl.u32 %v9157_v10, %v396_v47  ;;  %v402_v38 = vshrl.u32 %v9285_v12, %v396_v47  ;;  %v404_v46 = vshll.u32 %v9285_v12, %v395_v28  ;;  %v9286_v7 = vmov 2102212464  }
  0xf7   :  { %v405_v27 = vshrl.u32 %v9286_v7, %v396_v47  ;;  %vm1631_vm5 = vcmp.lt.s32.totalorder %v6547_v51, 0  ;;  %v407_v14 = vshll.u32 %v9286_v7, %v395_v28  ;;  %v9287_v5 = vmov 920167782  }
  0xf8   :  { %v408_v61 = vshrl.u32 %v9287_v5, %v396_v47  ;;  %v410_v25 = vshll.u32 %v9287_v5, %v395_v28  ;;  %v9288_v11 = vmov 1326507024   ;;  %v5584_v55 = vmin.u32 %v343_v59, %v6886_v58 }
  0xf9   :  { %v411_v56 = vshrl.u32 %v9288_v11, %v396_v47  ;;  %v400_v32 = vor.u32 %v399_v50, %v398_v39  ;;  %v403_v18 = vor.u32 %v402_v38, %v401_v41  ;;  %v406_v29 = vor.u32 %v405_v27, %v404_v46 }
  0xfa   :  { %v6927_v37 = vshrl.u32 %v546_v44, 30  ;;  %v409_v4 = vor.u32 %v408_v61, %v407_v14  ;;  %vm413_vm6 = vcmp.lt.s32.totalorder %v394_v3, 1  ;;  %vm1735_vm7 = vcmp.lt.s32.totalorder %v6554_v57, 0 }
  0xfb   :  { %v412_v16 = vor.u32 %v411_v56, %v410_v25  ;;  %vm416_vm8 = vcmp.lt.s32.totalorder %v394_v3, 4  ;;  %v421_v10 = vsel %vm413_vm6, %v400_v32, %v403_v18  ;;  %v429_v43 = vshll.u32 %v389_v62, 8 }
  0xfc   :  { %9289 = vst [vmem:[#allocation16_spill] sm:$0xff] %v6927_v37  ;;  %v703_v8 = vadd.s32 1, %v5599_v48  ;;  %v9290_v28 = vmov 683565275   ;;  %vm414_vm9 = vcmp.lt.s32.totalorder %v394_v3, 2  ;;  %vm415_vm10 = vcmp.lt.s32.totalorder %v394_v3, 3 }
  0xfd   :  { %v397_v24 = vshrl.u32 %v9290_v28, %v396_v47  ;;  %v422_v59 = vsel %vm416_vm8, %v409_v4, 920167782  ;;  %v418_v39 = vsel %vm416_vm8, %v406_v29, 2102212464  ;;  %v425_v44 = vsel %vm413_vm6, %v403_v18, %v406_v29 }
  0xfe   :  { %v423_v41 = vsel %vm415_vm10, %v406_v29, %v422_v59  ;;  %v426_v50 = vsel %vm416_vm8, %v412_v16, 1326507024  ;;  %v345_v38 = vclz %v5584_v55  ;;  %v548_v46 = vshll.u32 %v6927_v37, 30  ;;  %v96_v16 = vpop.permute.xlu0 %95 }
  0xff   :  { %v424_v27 = vsel %vm414_vm9, %v421_v10, %v423_v41  ;;  %v427_v14 = vsel %vm415_vm10, %v409_v4, %v426_v50  ;;  %v417_v61 = vsel %vm413_vm6, %v397_v24, %v400_v32  ;;  %v419_v25 = vsel %vm415_vm10, %v403_v18, %v418_v39 }
 0x100   :  { %v428_v62 = vsel %vm414_vm9, %v425_v44, %v427_v14  ;;  %v6937_v48 = vmul.u32.u64.low %v429_v43, %v424_v27  ;;  %v6938_v47 = vmul.u32.u64.high %v429_v43, %v424_v27, %v6937_v48  ;;  %vm704_vm11 = vcmp.gt.s32.totalorder %v703_v8, 0 }
 0x101   :  { %v6941_v56 = vmul.u32.u64.low %v429_v43, %v428_v62  ;;  %v6942_v59 = vmul.u32.u64.high %v429_v43, %v428_v62, %v6941_v56  ;;  %v6947_v55 = vsel %vm1631_vm5, %v1713_v23, %v6876_v20  ;;  %v6949_v10 = vshrl.u32 %v185_v2, 5 }
 0x102   :  { %9291 = vst [vmem:[#allocation17_spill] sm:$0xff] %v6947_v55  ;;  %v6951_v24 = vand.u32 31, %v185_v2  ;;  %v705_v32 = vsel %vm704_vm11, %v703_v8, 0  ;;  %v1601_v29 = vsub.s32 4294967266, %v6908_v30  ;;  %v5585_v4 = vadd.s32 4294967294, %v345_v38 }
 0x103   :  { %9292 = vst [vmem:[#allocation18_spill] sm:$0xff] %v6949_v10  ;;  %v6955_v18 = vsub.s32 %v6890_v40, %v548_v46  ;;  %v707_v39 = vand.u32 31, %v705_v32  ;;  %v420_v41 = vsel %vm414_vm9, %v417_v61, %v419_v25  ;;  %v439_v44 = vadd.s32 1, %v6938_v47 }
 0x104   :  { %9293 = vst [vmem:[#allocation19_spill] sm:$0xff] %v6951_v24  ;;  %v9163_v50 = vand.u32 2147483647, %v6828_v60  ;;  %v6961_v20 = vmul.f32 %v6544_v49, %v96_v16  ;;  %v9295_v23 = vxor.u32 2147483648, %v6878_v22  ;;  %v1597_v40 = vsub.s32 32, %v6908_v30 }
 0x105   :  { %vm438_vm12 = vc.u32 %v6942_v59, %v6937_v48  ;;  %v708_v2 = vsub.s32 32, %v707_v39  ;;  %v1598_v3 = vshll.u32 %v6782_v1, %v6908_v30  ;;  %v6976_v38 = vsub.s32 32, %v6951_v24 }
 0x106   :  { %9294 = vst [vmem:[#allocation20_spill] sm:$0xff] %v6961_v20  ;;  %v6968_v8 = vsel %vm1735_vm7, %v9295_v23, %v6878_v22  ;;  %v6980_v49 = vshll.u32 %v9286_v7, %v6951_v24  ;;  %v440_v46 = vsel %vm438_vm12, %v439_v44, %v6938_v47  ;;  %v1602_v22 = vadd.s32 127, %v1601_v29 }
 0x107   :  { %9296 = vst [vmem:[#allocation21_spill] sm:$0xff] %v6968_v8  ;;  %9297 = vst [vmem:[#allocation22_spill] sm:$0xff] %v6976_v38  ;;  %vm5586_vm13 = vcmp.lt.s32.totalorder %v5585_v4, 0  ;;  %v551_v27 = vsub.s32 0, %v6955_v18  ;;  %v436_v14 = vmul.u32 %v429_v43, %v420_v41  ;;  %v700_v61 = vand.u32 8388607, %v9163_v50 }
 0x108   :  { %v9298_v62 = vmov 2475754826   ;;  %v714_v1 = vshrl.u32 %v9285_v12, %v708_v2  ;;  %v592_v30 = vand.u32 2139095040, %v6961_v20  ;;  %v710_v16 = vshll.u32 %v9290_v28, %v707_v39 }
 0x109   :  { %v711_v25 = vshrl.u32 %v9298_v62, %v708_v2  ;;  %v6989_v56 = vadd.s32 %v440_v46, %v436_v14  ;;  %v713_v47 = vshll.u32 %v9298_v62, %v707_v39  ;;  %v717_v29 = vshrl.u32 %v9286_v7, %v708_v2 }
 0x10a   :  { %v706_v44 = vshrl.u32 %v705_v32, 5  ;;  %v716_v43 = vshll.u32 %v9285_v12, %v707_v39  ;;  %v719_v41 = vshll.u32 %v9286_v7, %v707_v39  ;;  %v720_v23 = vshrl.u32 %v9287_v5, %v708_v2 }
 0x10b   :  { %v6997_v50 = vsel %vm5586_vm13, 0, %v5585_v4  ;;  %v5592_v37 = vmin.u32 %v551_v27, %v6955_v18  ;;  %v712_v8 = vor.u32 %v711_v25, %v710_v16  ;;  %v715_v46 = vor.u32 %v714_v1, %v713_v47 }
 0x10c   :  { %v718_v14 = vor.u32 %v717_v29, %v716_v43  ;;  %v721_v36 = vor.u32 %v720_v23, %v719_v41  ;;  %v722_v57 = vshll.u32 %v9287_v5, %v707_v39  ;;  %v723_v55 = vshrl.u32 %v9288_v11, %v708_v2 }
 0x10d   :  { %v1599_v32 = vshrl.u32 %v6903_v26, %v1597_v40  ;;  %v333_v33 = vadd.s32 %v6760_v42, %v6768_v9  ;;  %v442_v51 = vadd.s32 536870912, %v6989_v56  ;;  %v701_v31 = vor.u32 8388608, %v700_v61 }
 0x10e   :  { %v1603_v4 = vshll.u32 %v1602_v22, 23  ;;  %v724_v53 = vor.u32 %v723_v55, %v722_v57  ;;  %vm725_vm14 = vcmp.lt.s32.totalorder %v706_v44, 1  ;;  %v593_v27 = vshrl.u32 %v592_v30, 23 }
 0x10f   :  { %v349_v25 = vsub.s32 32, %v6997_v50  ;;  %v553_v1 = vclz %v5592_v37  ;;  %vm728_vm15 = vcmp.lt.s32.totalorder %v706_v44, 4  ;;  %v733_v39 = vsel %vm725_vm14, %v712_v8, %v715_v46 }
 0x110   :  { %vm727_vm0 = vcmp.lt.s32.totalorder %v706_v44, 3  ;;  %v734_v16 = vsel %vm728_vm15, %v721_v36, 920167782  ;;  %v737_v26 = vsel %vm725_vm14, %v715_v46, %v718_v14  ;;  %v738_v40 = vsel %vm728_vm15, %v724_v53, 1326507024 }
 0x111   :  { %v7009_v47 = vshrl.u32 %v442_v51, 30  ;;  %vm726_vm1 = vcmp.lt.s32.totalorder %v706_v44, 2  ;;  %v735_v42 = vsel %vm727_vm0, %v718_v14, %v734_v16  ;;  %v741_v9 = vshll.u32 %v701_v31, 8 }
 0x112   :  { %v730_v57 = vsel %vm728_vm15, %v718_v14, 2102212464  ;;  %v736_v55 = vsel %vm726_vm1, %v733_v39, %v735_v42  ;;  %v739_v22 = vsel %vm727_vm0, %v721_v36, %v738_v40  ;;  %v5595_v37 = vadd.s32 4294967169, %v593_v27 }
 0x113   :  { %9299 = vst [vmem:[#allocation23_spill] sm:$0xff] %v7009_v47  ;;  %v353_v61 = vsub.s32 4294967266, %v6997_v50  ;;  %v5593_v30 = vadd.s32 4294967294, %v553_v1  ;;  %v709_v29 = vshrl.u32 %v9290_v28, %v708_v2  ;;  %v740_v43 = vsel %vm726_vm1, %v737_v26, %v739_v22 }
 0x114   :  { %v7017_v53 = vmul.u32.u64.low %v741_v9, %v740_v43  ;;  %v7018_v51 = vmul.u32.u64.high %v741_v9, %v740_v43, %v7017_v53  ;;  %v7020_v41 = vmul.u32.u64.low %v741_v9, %v736_v55  ;;  %v7021_v23 = vmul.u32.u64.high %v741_v9, %v736_v55, %v7020_v41 }
 0x115   :  { %v444_v31 = vshll.u32 %v7009_v47, 30  ;;  %v729_v14 = vsel %vm725_vm14, %v709_v29, %v712_v8  ;;  %v731_v36 = vsel %vm727_vm0, %v715_v46, %v730_v57  ;;  %v599_v27 = vadd.s32 1, %v5595_v37 }
 0x116   :  { %v7027_v39 = vor.u32 %v1599_v32, %v1598_v3  ;;  %v7029_v1 = vor.u32 4788187, %v1603_v4  ;;  %v200_v2 = vshrl.u32 %v9287_v5, %v6976_v38  ;;  %v7035_v16 = vshll.u32 %v9287_v5, %v6951_v24  ;;  %v111_v32 = vpop.permute.xlu1 %110 }
 0x117   :  { %v351_v26 = vshrl.u32 %v333_v33, %v349_v25  ;;  %v354_v40 = vadd.s32 127, %v353_v61  ;;  %v9178_v42 = vand.u32 2147483647, %v6961_v20  ;;  %vm600_vm2 = vcmp.gt.s32.totalorder %v599_v27, 0 }
 0x118   :  { %v732_v8 = vsel %vm726_vm1, %v729_v14, %v731_v36  ;;  %vm750_vm3 = vc.u32 %v7018_v51, %v7020_v41  ;;  %v751_v3 = vadd.s32 1, %v7021_v23  ;;  %v601_v46 = vsel %vm600_vm2, %v599_v27, 0 }
 0x119   :  { %v350_v4 = vshll.u32 %v6886_v58, %v6997_v50  ;;  %vm5594_vm6 = vcmp.lt.s32.totalorder %v5593_v30, 0  ;;  %v7045_v57 = vsub.s32 %v6989_v56, %v444_v31  ;;  %v603_v33 = vand.u32 31, %v601_v46  ;;  %v7062_v50 = vld [vmem:[%s9138_s4 + $0x3] ss:$0 sm:$0xff] }
 0x11a   :  { %v7049_v44 = vor.u32 %v200_v2, %v6980_v49  ;;  %v7053_v55 = vshrl.u32 %v9288_v11, %v6976_v38  ;;  %v752_v22 = vsel %vm750_vm3, %v751_v3, %v7021_v23  ;;  %v1605_v37 = vand.u32 2147483647, %v7029_v1  ;;  %v106_v2 = vpop.permute.xlu0 %105 }
 0x11b   :  { %v7057_v61 = vor.u32 %v351_v26, %v350_v4  ;;  %v748_v58 = vmul.u32 %v741_v9, %v732_v8  ;;  %v7065_v56 = vmul.f32 %v7062_v50, %v111_v32  ;;  %v355_v49 = vshll.u32 %v354_v40, 23 }
 0x11c   :  { %9300 = vst [vmem:[#allocation24_spill] sm:$0xff] %v7049_v44  ;;  %v7067_v29 = vsel %vm5594_vm6, 0, %v5593_v30  ;;  %v596_v43 = vand.u32 8388607, %v9178_v42  ;;  %v604_v53 = vsub.s32 32, %v603_v33  ;;  %v447_v23 = vsub.s32 0, %v7045_v57 }
 0x11d   :  { %9301 = vst [vmem:[#allocation25_spill] sm:$0xff] %v7065_v56  ;;  %v7072_v31 = vadd.s32 %v752_v22, %v748_v58  ;;  %v606_v9 = vshll.u32 %v9290_v28, %v603_v33  ;;  %v609_v14 = vshll.u32 %v9298_v62, %v603_v33  ;;  %v612_v1 = vshll.u32 %v9285_v12, %v603_v33 }
 0x11e   :  { %v607_v36 = vshrl.u32 %v9298_v62, %v604_v53  ;;  %v610_v27 = vshrl.u32 %v9285_v12, %v604_v53  ;;  %v613_v30 = vshrl.u32 %v9286_v7, %v604_v53  ;;  %v602_v26 = vshrl.u32 %v601_v46, 5 }
 0x11f   :  { %v615_v40 = vshll.u32 %v9286_v7, %v603_v33  ;;  %v616_v8 = vshrl.u32 %v9287_v5, %v604_v53  ;;  %v904_v3 = vand.u32 2139095040, %v7065_v56  ;;  %v356_v32 = vor.u32 4788187, %v355_v49 }
 0x120   :  { %v608_v4 = vor.u32 %v607_v36, %v606_v9  ;;  %v611_v22 = vor.u32 %v610_v27, %v609_v14  ;;  %v614_v58 = vor.u32 %v613_v30, %v612_v1  ;;  %vm208_vm8 = vcmp.lt.s32.totalorder %v6949_v10, 4 }
 0x121   :  { %v754_v42 = vadd.s32 536870912, %v7072_v31  ;;  %v597_v25 = vor.u32 8388608, %v596_v43  ;;  %v617_v47 = vor.u32 %v616_v8, %v615_v40  ;;  %v7086_v24 = vmul.f32 %v7062_v50, %v106_v2 }
 0x122   :  { %v561_v46 = vsub.s32 4294967266, %v7067_v29  ;;  %v5588_v38 = vmin.u32 %v447_v23, %v7045_v57  ;;  %v618_v20 = vshll.u32 %v9287_v5, %v603_v33  ;;  %v619_v49 = vshrl.u32 %v9288_v11, %v604_v53 }
 0x123   :  { %9302 = vst [vmem:[#allocation26_spill] sm:$0xff] %v7086_v24  ;;  %vm621_vm9 = vcmp.lt.s32.totalorder %v602_v26, 1  ;;  %vm623_vm10 = vcmp.lt.s32.totalorder %v602_v26, 3  ;;  %vm624_vm11 = vcmp.lt.s32.totalorder %v602_v26, 4  ;;  %v905_v9 = vshrl.u32 %v904_v3, 23 }
 0x124   :  { %v620_v14 = vor.u32 %v619_v49, %v618_v20  ;;  %v626_v36 = vsel %vm624_vm11, %v614_v58, 2102212464  ;;  %v629_v43 = vsel %vm621_vm9, %v608_v4, %v611_v22  ;;  %v630_v27 = vsel %vm624_vm11, %v617_v47, 920167782 }
 0x125   :  { %v7093_v1 = vshrl.u32 %v754_v42, 30  ;;  %v605_v30 = vshrl.u32 %v9290_v28, %v604_v53  ;;  %vm622_vm12 = vcmp.lt.s32.totalorder %v602_v26, 2  ;;  %v631_v23 = vsel %vm623_vm10, %v614_v58, %v630_v27 }
 0x126   :  { %v632_v33 = vsel %vm622_vm12, %v629_v43, %v631_v23  ;;  %v633_v2 = vsel %vm621_vm9, %v611_v22, %v614_v58  ;;  %v634_v40 = vsel %vm624_vm11, %v620_v14, 1326507024  ;;  %v637_v8 = vshll.u32 %v597_v25, 8 }
 0x127   :  { %9303 = vst [vmem:[#allocation27_spill] sm:$0xff] %v7093_v1  ;;  %v625_v3 = vsel %vm621_vm9, %v605_v30, %v608_v4  ;;  %v627_v20 = vsel %vm623_vm10, %v611_v22, %v626_v36  ;;  %v635_v49 = vsel %vm623_vm10, %v617_v47, %v634_v40  ;;  %v800_v42 = vand.u32 2139095040, %v7086_v24 }
 0x128   :  { %v636_v60 = vsel %vm622_vm12, %v633_v2, %v635_v49  ;;  %v7104_v53 = vmul.u32.u64.low %v637_v8, %v632_v33  ;;  %v7105_v19 = vmul.u32.u64.high %v637_v8, %v632_v33, %v7104_v53  ;;  %v5607_v27 = vadd.s32 4294967169, %v905_v9 }
 0x129   :  { %v204_v58 = vor.u32 %v7053_v55, %v7035_v16  ;;  %v756_v25 = vshll.u32 %v7093_v1, 30  ;;  %v7111_v14 = vmul.u32.u64.low %v637_v8, %v636_v60  ;;  %v7112_v4 = vmul.u32.u64.high %v637_v8, %v636_v60, %v7111_v14 }
 0x12a   :  { %v9304_v22 = vcvt.s32.f32 %v7027_v39  ;;  %v7121_v36 = vsel %vm208_vm8, %v7049_v44, 920167782  ;;  %v628_v43 = vsel %vm622_vm12, %v625_v3, %v627_v20  ;;  %v911_v9 = vadd.s32 1, %v5607_v27 }
 0x12b   :  { %9305 = vst [vmem:[#allocation28_spill] sm:$0xff] %v7121_v36  ;;  %v357_v30 = vand.u32 2147483647, %v356_v32  ;;  %v359_v16 = vcvt.s32.f32 %v7057_v61  ;;  %v562_v55 = vadd.s32 127, %v561_v46  ;;  %v449_v23 = vclz %v5588_v38 }
 0x12c   :  { %v7116_v47 = vmul.f32 %v9304_v22, %v1605_v37  ;;  %v647_v60 = vadd.s32 1, %v7105_v19  ;;  %v9191_v33 = vand.u32 2147483647, %v7065_v56  ;;  %vm912_vm13 = vcmp.gt.s32.totalorder %v911_v9, 0 }
 0x12d   :  { %v801_v39 = vshrl.u32 %v800_v42, 23  ;;  %v7128_v37 = vsub.s32 %v7072_v31, %v756_v25  ;;  %v644_v2 = vmul.u32 %v637_v8, %v628_v43  ;;  %vm646_vm14 = vc.u32 %v7112_v4, %v7104_v53 }
 0x12e   :  { %v913_v26 = vsel %vm912_vm13, %v911_v9, 0  ;;  %v7135_v61 = vsel %vm208_vm8, %v204_v58, 1326507024  ;;  %v648_v38 = vsel %vm646_vm14, %v647_v60, %v7105_v19  ;;  %v7138_v40 = vmul.f32 %v359_v16, %v357_v30 }
 0x12f   :  { %9306 = vst [vmem:[#allocation29_spill] sm:$0xff] %v7135_v61  ;;  %v915_v46 = vand.u32 31, %v913_v26  ;;  %v541_v31 = vadd.s32 %v6849_v6, %v6856_v34  ;;  %v557_v8 = vsub.s32 32, %v7067_v29  ;;  %v7143_v3 = vadd.s32 %v648_v38, %v644_v2 }
 0x130   :  { %v563_v20 = vshll.u32 %v562_v55, 23  ;;  %v5589_v49 = vadd.s32 4294967294, %v449_v23  ;;  %v908_v42 = vand.u32 8388607, %v9191_v33  ;;  %v759_v58 = vsub.s32 0, %v7128_v37 }
 0x131   :  { %v916_v27 = vsub.s32 32, %v915_v46  ;;  %v7148_v25 = vshrl.u32 %v913_v26, 5  ;;  %v918_v19 = vshll.u32 %v9290_v28, %v915_v46  ;;  %v5603_v14 = vadd.s32 4294967169, %v801_v39 }
 0x132   :  { %v921_v6 = vshll.u32 %v9298_v62, %v915_v46  ;;  %v650_v9 = vadd.s32 536870912, %v7143_v3  ;;  %v924_v30 = vshll.u32 %v9285_v12, %v915_v46  ;;  %v927_v16 = vshll.u32 %v9286_v7, %v915_v46 }
 0x133   :  { %v919_v22 = vshrl.u32 %v9298_v62, %v916_v27  ;;  %v922_v34 = vshrl.u32 %v9285_v12, %v916_v27  ;;  %v925_v43 = vshrl.u32 %v9286_v7, %v916_v27  ;;  %v928_v55 = vshrl.u32 %v9287_v5, %v916_v27 }
 0x134   :  { %v558_v23 = vshll.u32 %v6955_v18, %v7067_v29  ;;  %v559_v60 = vshrl.u32 %v541_v31, %v557_v8  ;;  %v7161_v26 = vor.u32 4788187, %v563_v20  ;;  %v5600_v38 = vmin.u32 %v759_v58, %v7128_v37 }
 0x135   :  { %v920_v39 = vor.u32 %v919_v22, %v918_v19  ;;  %v923_v2 = vor.u32 %v922_v34, %v921_v6  ;;  %v926_v33 = vor.u32 %v925_v43, %v924_v30  ;;  %v929_v32 = vor.u32 %v928_v55, %v927_v16 }
 0x136   :  { %vm1527_vm15 = vcmp.lt.s32.totalorder %v6560_v63, 0  ;;  %vm5590_vm0 = vcmp.lt.s32.totalorder %v5589_v49, 0  ;;  %v909_v1 = vor.u32 8388608, %v908_v42  ;;  %v930_v44 = vshll.u32 %v9287_v5, %v915_v46 }
 0x137   :  { %v931_v61 = vshrl.u32 %v9288_v11, %v916_v27  ;;  %v7167_v36 = vshrl.u32 %v650_v9, 30  ;;  %vm933_vm1 = vcmp.lt.s32.totalorder %v7148_v25, 1  ;;  %vm936_vm2 = vcmp.lt.s32.totalorder %v7148_v25, 4 }
 0x138   :  { %v807_v18 = vadd.s32 1, %v5603_v14  ;;  %vm935_vm3 = vcmp.lt.s32.totalorder %v7148_v25, 3  ;;  %v941_v31 = vsel %vm933_vm1, %v920_v39, %v923_v2  ;;  %v942_v8 = vsel %vm936_vm2, %v929_v32, 920167782 }
 0x139   :  { %9307 = vst [vmem:[#allocation30_spill] sm:$0xff] %v7167_v36  ;;  %v932_v29 = vor.u32 %v931_v61, %v930_v44  ;;  %v7176_v20 = vsel %vm5590_vm0, 0, %v5589_v49  ;;  %v761_v46 = vclz %v5600_v38  ;;  %vm934_vm6 = vcmp.lt.s32.totalorder %v7148_v25, 2 }
 0x13a   :  { %v943_v42 = vsel %vm935_vm3, %v926_v33, %v942_v8  ;;  %v945_v44 = vsel %vm933_vm1, %v923_v2, %v926_v33  ;;  %v949_v19 = vshll.u32 %v909_v1, 8  ;;  %v652_v14 = vshll.u32 %v7167_v36, 30 }
 0x13b   :  { %v944_v58 = vsel %vm934_vm6, %v941_v31, %v943_v42  ;;  %v946_v61 = vsel %vm936_vm2, %v932_v29, 1326507024  ;;  %v917_v49 = vshrl.u32 %v9290_v28, %v916_v27  ;;  %v938_v22 = vsel %vm936_vm2, %v926_v33, 2102212464 }
 0x13c   :  { %v947_v6 = vsel %vm935_vm3, %v929_v32, %v946_v61  ;;  %v7195_v43 = vmul.u32.u64.low %v949_v19, %v944_v58  ;;  %v7196_v9 = vmul.u32.u64.high %v949_v19, %v944_v58, %v7195_v43  ;;  %vm808_vm9 = vcmp.gt.s32.totalorder %v807_v18, 0 }
 0x13d   :  { %v948_v34 = vsel %vm934_vm6, %v945_v44, %v947_v6  ;;  %v453_v1 = vsub.s32 32, %v7176_v20  ;;  %v5601_v30 = vadd.s32 4294967294, %v761_v46  ;;  %v457_v27 = vsub.s32 4294967266, %v7176_v20  ;;  %v121_v44 = vpop.permute.xlu1 %120 }
 0x13e   :  { %v7200_v16 = vmul.u32.u64.low %v949_v19, %v948_v34  ;;  %v7201_v55 = vmul.u32.u64.high %v949_v19, %v948_v34, %v7200_v16  ;;  %v937_v33 = vsel %vm933_vm1, %v917_v49, %v920_v39  ;;  %v939_v32 = vsel %vm935_vm3, %v923_v2, %v938_v22 }
 0x13f   :  { %v809_v38 = vsel %vm808_vm9, %v807_v18, 0  ;;  %v9308_v29 = vxor.u32 2147483648, %v7116_v47  ;;  %v7216_v8 = vsub.s32 %v7143_v3, %v652_v14  ;;  %v9195_v46 = vand.u32 2147483647, %v7086_v24 }
 0x140   :  { %v811_v42 = vand.u32 31, %v809_v38  ;;  %v7220_v39 = vor.u32 %v559_v60, %v558_v23  ;;  %v437_v2 = vadd.s32 %v6937_v48, %v6942_v59  ;;  %v959_v18 = vadd.s32 1, %v7196_v9 }
 0x141   :  { %v7213_v31 = vsel %vm1527_vm15, %v9308_v29, %v7116_v47  ;;  %vm5602_vm10 = vcmp.lt.s32.totalorder %v5601_v30, 0  ;;  %v940_v47 = vsel %vm934_vm6, %v937_v33, %v939_v32  ;;  %vm958_vm11 = vc.u32 %v7201_v55, %v7195_v43 }
 0x142   :  { %9309 = vst [vmem:[#allocation31_spill] sm:$0xff] %v7213_v31  ;;  %v812_v3 = vsub.s32 32, %v811_v42  ;;  %v455_v60 = vshrl.u32 %v437_v2, %v453_v1  ;;  %v7232_v14 = vadd.s32 127, %v457_v27  ;;  %v655_v48 = vsub.s32 0, %v7216_v8 }
 0x143   :  { %v960_v59 = vsel %vm958_vm11, %v959_v18, %v7196_v9  ;;  %v804_v25 = vand.u32 8388607, %v9195_v46  ;;  %v7239_v49 = vmul.f32 %v7062_v50, %v121_v44  ;;  %v7241_v22 = vsel %vm5602_vm10, 0, %v5601_v30 }
 0x144   :  { %v956_v6 = vmul.u32 %v949_v19, %v940_v47  ;;  %v815_v34 = vshrl.u32 %v9298_v62, %v812_v3  ;;  %v818_v16 = vshrl.u32 %v9285_v12, %v812_v3  ;;  %v810_v1 = vshrl.u32 %v809_v38, 5  ;;  %v116_v19 = vpop.permute.xlu0 %115 }
 0x145   :  { %v814_v27 = vshll.u32 %v9290_v28, %v811_v42  ;;  %v817_v33 = vshll.u32 %v9298_v62, %v811_v42  ;;  %v821_v9 = vshrl.u32 %v9286_v7, %v812_v3  ;;  %v820_v29 = vshll.u32 %v9285_v12, %v811_v42 }
 0x146   :  { %v7248_v32 = vadd.s32 %v960_v59, %v956_v6  ;;  %v823_v2 = vshll.u32 %v9286_v7, %v811_v42  ;;  %v824_v30 = vshrl.u32 %v9287_v5, %v812_v3  ;;  %v459_v18 = vshll.u32 %v7232_v14, 23 }
 0x147   :  { %v5596_v44 = vmin.u32 %v655_v48, %v7216_v8  ;;  %v816_v38 = vor.u32 %v815_v34, %v814_v27  ;;  %v819_v47 = vor.u32 %v818_v16, %v817_v33  ;;  %vm279_vm12 = vcmp.lt.s32.totalorder %v6663_v35, 0 }
 0x148   :  { %v822_v46 = vor.u32 %v821_v9, %v820_v29  ;;  %v825_v61 = vor.u32 %v824_v30, %v823_v2  ;;  %v826_v59 = vshll.u32 %v9287_v5, %v811_v42  ;;  %v827_v6 = vshrl.u32 %v9288_v11, %v812_v3 }
 0x149   :  { %v765_v23 = vsub.s32 32, %v7241_v22  ;;  %v769_v58 = vsub.s32 4294967266, %v7241_v22  ;;  %v805_v36 = vor.u32 8388608, %v804_v25  ;;  %v7261_v10 = vmul.f32 %v7062_v50, %v116_v19 }
 0x14a   :  { %v962_v14 = vadd.s32 536870912, %v7248_v32  ;;  %v828_v48 = vor.u32 %v827_v6, %v826_v59  ;;  %vm829_vm13 = vcmp.lt.s32.totalorder %v810_v1, 1  ;;  %v1112_v34 = vand.u32 2139095040, %v7239_v49 }
 0x14b   :  { %v657_v16 = vclz %v5596_v44  ;;  %vm831_vm14 = vcmp.lt.s32.totalorder %v810_v1, 3  ;;  %vm832_vm0 = vcmp.lt.s32.totalorder %v810_v1, 4  ;;  %v837_v42 = vsel %vm829_vm13, %v816_v38, %v819_v47 }
 0x14c   :  { %v834_v27 = vsel %vm832_vm0, %v822_v46, 2102212464  ;;  %v838_v33 = vsel %vm832_vm0, %v825_v61, 920167782  ;;  %v841_v9 = vsel %vm829_vm13, %v819_v47, %v822_v46  ;;  %v842_v29 = vsel %vm832_vm0, %v828_v48, 1326507024 }
 0x14d   :  { %v813_v25 = vshrl.u32 %v9290_v28, %v812_v3  ;;  %vm830_vm1 = vcmp.lt.s32.totalorder %v810_v1, 2  ;;  %v839_v2 = vsel %vm831_vm14, %v822_v46, %v838_v33  ;;  %v845_v30 = vshll.u32 %v805_v36, 8 }
 0x14e   :  { %v7269_v19 = vshrl.u32 %v962_v14, 30  ;;  %v840_v59 = vsel %vm830_vm1, %v837_v42, %v839_v2  ;;  %v843_v44 = vsel %vm831_vm14, %v825_v61, %v842_v29  ;;  %v1113_v6 = vshrl.u32 %v1112_v34, 23 }
 0x14f   :  { %v5597_v31 = vadd.s32 4294967294, %v657_v16  ;;  %v833_v63 = vsel %vm829_vm13, %v813_v25, %v816_v38  ;;  %v835_v24 = vsel %vm831_vm14, %v819_v47, %v834_v27  ;;  %v844_v48 = vsel %vm830_vm1, %v841_v9, %v843_v44 }
 0x150   :  { %9310 = vst [vmem:[#allocation32_spill] sm:$0xff] %v7269_v19  ;;  %v7276_v56 = vmul.u32.u64.low %v845_v30, %v844_v48  ;;  %v7277_v3 = vmul.u32.u64.high %v845_v30, %v844_v48, %v7276_v56  ;;  %v7279_v13 = vmul.u32.u64.low %v845_v30, %v840_v59  ;;  %v7280_v46 = vmul.u32.u64.high %v845_v30, %v840_v59, %v7279_v13 }
 0x151   :  { %v9311_v36 = vxor.u32 2147483648, %v7138_v40  ;;  %v567_v38 = vcvt.s32.f32 %v7220_v39  ;;  %v770_v14 = vadd.s32 127, %v769_v58  ;;  %v5615_v47 = vadd.s32 4294967169, %v1113_v6 }
 0x152   :  { %v9312_v34 = vshll.u32 %v7045_v57, %v7176_v20  ;;  %v749_v56 = vadd.s32 %v7020_v41, %v7018_v51  ;;  %v964_v42 = vshll.u32 %v7269_v19, 30  ;;  %v836_v27 = vsel %vm830_vm1, %v833_v63, %v835_v24  ;;  %v131_v24 = vpop.permute.xlu1 %130 }
 0x153   :  { %v7288_v61 = vsel %vm279_vm12, %v9311_v36, %v7138_v40  ;;  %v9313_v33 = vand.u32 2147483647, %v7161_v26  ;;  %v7304_v9 = vor.u32 4788187, %v459_v18  ;;  %v1119_v58 = vadd.s32 1, %v5615_v47 }
 0x154   :  { %v7294_v16 = vor.u32 %v455_v60, %v9312_v34  ;;  %v1008_v39 = vand.u32 2139095040, %v7261_v10  ;;  %v767_v29 = vshrl.u32 %v749_v56, %v765_v23  ;;  %vm5598_vm2 = vcmp.lt.s32.totalorder %v5597_v31, 0 }
 0x155   :  { %v7302_v40 = vmul.f32 %v567_v38, %v9313_v33  ;;  %vm854_vm3 = vc.u32 %v7277_v3, %v7279_v13  ;;  %v855_v51 = vadd.s32 1, %v7280_v46  ;;  %v771_v41 = vshll.u32 %v770_v14, 23 }
 0x156   :  { %v852_v57 = vmul.u32 %v845_v30, %v836_v27  ;;  %v9207_v63 = vand.u32 2147483647, %v7239_v49  ;;  %vm1120_vm6 = vcmp.gt.s32.totalorder %v1119_v58, 0  ;;  %v7313_v20 = vsub.s32 %v7248_v32, %v964_v42 }
 0x157   :  { %v856_v60 = vsel %vm854_vm3, %v855_v51, %v7280_v46  ;;  %v1121_v23 = vsel %vm1120_vm6, %v1119_v58, 0  ;;  %v766_v1 = vshll.u32 %v7128_v37, %v7241_v22  ;;  %v7318_v18 = vsel %vm5598_vm2, 0, %v5597_v31 }
 0x158   :  { %v857_v25 = vadd.s32 %v856_v60, %v852_v57  ;;  %v1009_v2 = vshrl.u32 %v1008_v39, 23  ;;  %v645_v59 = vadd.s32 %v7104_v53, %v7112_v4  ;;  %v1123_v44 = vand.u32 31, %v1121_v23 }
 0x159   :  { %v7324_v6 = vmul.f32 %v7062_v50, %v131_v24  ;;  %v7326_v32 = vor.u32 %v767_v29, %v766_v1  ;;  %v7328_v48 = vor.u32 4788187, %v771_v41  ;;  %v1116_v37 = vand.u32 8388607, %v9207_v63 }
 0x15a   :  { %v858_v46 = vadd.s32 536870912, %v857_v25  ;;  %v661_v31 = vsub.s32 32, %v7318_v18  ;;  %v665_v22 = vsub.s32 4294967266, %v7318_v18  ;;  %v967_v36 = vsub.s32 0, %v7313_v20 }
 0x15b   :  { %v1124_v38 = vsub.s32 32, %v1123_v44  ;;  %v1126_v53 = vshll.u32 %v9290_v28, %v1123_v44  ;;  %v1129_v4 = vshll.u32 %v9298_v62, %v1123_v44  ;;  %v1132_v14 = vshll.u32 %v9285_v12, %v1123_v44 }
 0x15c   :  { %v5611_v47 = vadd.s32 4294967169, %v1009_v2  ;;  %v7338_v34 = vshrl.u32 %v858_v46, 30  ;;  %v1117_v33 = vor.u32 8388608, %v1116_v37  ;;  %v1122_v58 = vshrl.u32 %v1121_v23, 5 }
 0x15d   :  { %v1127_v56 = vshrl.u32 %v9298_v62, %v1124_v38  ;;  %v1130_v42 = vshrl.u32 %v9285_v12, %v1124_v38  ;;  %v1133_v27 = vshrl.u32 %v9286_v7, %v1124_v38  ;;  %v1135_v39 = vshll.u32 %v9286_v7, %v1123_v44 }
 0x15e   :  { %9314 = vst [vmem:[#allocation33_spill] sm:$0xff] %v7338_v34  ;;  %v1136_v29 = vshrl.u32 %v9287_v5, %v1124_v38  ;;  %v9208_v24 = vand.u32 2147483647, %v7261_v10  ;;  %v663_v60 = vshrl.u32 %v645_v59, %v661_v31  ;;  %v1138_v2 = vshll.u32 %v9287_v5, %v1123_v44 }
 0x15f   :  { %v1128_v51 = vor.u32 %v1127_v56, %v1126_v53  ;;  %v1131_v41 = vor.u32 %v1130_v42, %v1129_v4  ;;  %v1134_v57 = vor.u32 %v1133_v27, %v1132_v14  ;;  %v1139_v46 = vshrl.u32 %v9288_v11, %v1124_v38 }
 0x160   :  { %v1137_v1 = vor.u32 %v1136_v29, %v1135_v39  ;;  %v7348_v63 = vadd.s32 127, %v665_v22  ;;  %v5608_v37 = vmin.u32 %v967_v36, %v7313_v20  ;;  %v860_v23 = vshll.u32 %v7338_v34, 30 }
 0x161   :  { %v1015_v26 = vadd.s32 1, %v5611_v47  ;;  %v1140_v30 = vor.u32 %v1139_v46, %v1138_v2  ;;  %vm1141_vm9 = vcmp.lt.s32.totalorder %v1122_v58, 1  ;;  %vm1144_vm10 = vcmp.lt.s32.totalorder %v1122_v58, 4 }
 0x162   :  { %v1157_v53 = vshll.u32 %v1117_v33, 8  ;;  %vm1143_vm11 = vcmp.lt.s32.totalorder %v1122_v58, 3  ;;  %v1146_v4 = vsel %vm1144_vm10, %v1134_v57, 2102212464  ;;  %v1149_v59 = vsel %vm1141_vm9, %v1128_v51, %v1131_v41 }
 0x163   :  { %v1150_v31 = vsel %vm1144_vm10, %v1137_v1, 920167782  ;;  %v1125_v44 = vshrl.u32 %v9290_v28, %v1124_v38  ;;  %vm1142_vm13 = vcmp.lt.s32.totalorder %v1122_v58, 2  ;;  %v1153_v22 = vsel %vm1141_vm9, %v1131_v41, %v1134_v57 }
 0x164   :  { %v1151_v14 = vsel %vm1143_vm11, %v1134_v57, %v1150_v31  ;;  %v7355_v56 = vsub.s32 %v857_v25, %v860_v23  ;;  %v1154_v47 = vsel %vm1144_vm10, %v1140_v30, 1326507024  ;;  %vm1016_vm14 = vcmp.gt.s32.totalorder %v1015_v26, 0 }
 0x165   :  { %v1152_v36 = vsel %vm1142_vm13, %v1149_v59, %v1151_v14  ;;  %v969_v42 = vclz %v5608_v37  ;;  %v1145_v27 = vsel %vm1141_vm9, %v1125_v44, %v1128_v51  ;;  %v1147_v33 = vsel %vm1143_vm11, %v1131_v41, %v1146_v4 }
 0x166   :  { %v1155_v39 = vsel %vm1143_vm11, %v1137_v1, %v1154_v47  ;;  %v7360_v2 = vmul.u32.u64.low %v1157_v53, %v1152_v36  ;;  %v7361_v46 = vmul.u32.u64.high %v1157_v53, %v1152_v36, %v7360_v2  ;;  %v1017_v38 = vsel %vm1016_vm14, %v1015_v26, 0 }
 0x167   :  { %v1156_v29 = vsel %vm1142_vm13, %v1153_v22, %v1155_v39  ;;  %v1012_v25 = vand.u32 8388607, %v9208_v24  ;;  %v1320_v30 = vand.u32 2139095040, %v7324_v6  ;;  %v662_v51 = vshll.u32 %v7216_v8, %v7318_v18 }
 0x168   :  { %v7364_v31 = vmul.u32.u64.low %v1157_v53, %v1156_v29  ;;  %v7365_v57 = vmul.u32.u64.high %v1157_v53, %v1156_v29, %v7364_v31  ;;  %v863_v41 = vsub.s32 0, %v7355_v56  ;;  %v1019_v1 = vand.u32 31, %v1017_v38 }
 0x169   :  { %v9315_v23 = vand.u32 2147483647, %v7304_v9  ;;  %v9316_v26 = vcvt.s32.f32 %v7294_v16  ;;  %v1148_v14 = vsel %vm1142_vm13, %v1145_v27, %v1147_v33  ;;  %v7383_v22 = vor.u32 %v663_v60, %v662_v51 }
 0x16a   :  { %v667_v36 = vshll.u32 %v7348_v63, 23  ;;  %v1167_v8 = vadd.s32 1, %v7361_v46  ;;  %v1020_v18 = vsub.s32 32, %v1019_v1  ;;  %v5609_v47 = vadd.s32 4294967294, %v969_v42 }
 0x16b   :  { %v7378_v4 = vmul.f32 %v9316_v26, %v9315_v23  ;;  %v1013_v39 = vor.u32 8388608, %v1012_v25  ;;  %v1321_v16 = vshrl.u32 %v1320_v30, 23  ;;  %v5604_v29 = vmin.u32 %v863_v41, %v7355_v56 }
 0x16c   :  { %v1164_v31 = vmul.u32 %v1157_v53, %v1148_v14  ;;  %vm1166_vm0 = vc.u32 %v7365_v57, %v7360_v2  ;;  %v1023_v58 = vshrl.u32 %v9298_v62, %v1020_v18  ;;  %v1022_v63 = vshll.u32 %v9290_v28, %v1019_v1 }
 0x16d   :  { %v1168_v60 = vsel %vm1166_vm0, %v1167_v8, %v7361_v46  ;;  %v1025_v27 = vshll.u32 %v9298_v62, %v1019_v1  ;;  %v1026_v42 = vshrl.u32 %v9285_v12, %v1020_v18  ;;  %v1018_v25 = vshrl.u32 %v1017_v38, 5 }
 0x16e   :  { %v1169_v33 = vadd.s32 %v1168_v60, %v1164_v31  ;;  %v1028_v30 = vshll.u32 %v9285_v12, %v1019_v1  ;;  %v1029_v51 = vshrl.u32 %v9286_v7, %v1020_v18  ;;  %vm5610_vm1 = vcmp.lt.s32.totalorder %v5609_v47, 0 }
 0x16f   :  { %v1024_v53 = vor.u32 %v1023_v58, %v1022_v63  ;;  %v1027_v41 = vor.u32 %v1026_v42, %v1025_v27  ;;  %v5623_v23 = vadd.s32 4294967169, %v1321_v16  ;;  %v1031_v46 = vshll.u32 %v9286_v7, %v1019_v1 }
 0x170   :  { %v1170_v26 = vadd.s32 536870912, %v1169_v33  ;;  %v1030_v14 = vor.u32 %v1029_v51, %v1028_v30  ;;  %v1032_v8 = vshrl.u32 %v9287_v5, %v1020_v18  ;;  %vm9237_vm2 = vcmp.lt.s32.totalorder %v6721_v52, 0 }
 0x171   :  { %v865_v24 = vclz %v5604_v29  ;;  %v1034_v31 = vshll.u32 %v9287_v5, %v1019_v1  ;;  %v1035_v38 = vshrl.u32 %v9288_v11, %v1020_v18  ;;  %v1053_v60 = vshll.u32 %v1013_v39, 8 }
 0x172   :  { %v7403_v9 = vshrl.u32 %v1170_v26, 30  ;;  %v1033_v44 = vor.u32 %v1032_v8, %v1031_v46  ;;  %vm1037_vm3 = vcmp.lt.s32.totalorder %v1018_v25, 1  ;;  %vm1040_vm6 = vcmp.lt.s32.totalorder %v1018_v25, 4 }
 0x173   :  { %v1036_v16 = vor.u32 %v1035_v38, %v1034_v31  ;;  %v1042_v58 = vsel %vm1040_vm6, %v1030_v14, 2102212464  ;;  %v1045_v63 = vsel %vm1037_vm3, %v1024_v53, %v1027_v41  ;;  %v1327_v27 = vadd.s32 1, %v5623_v23 }
 0x174   :  { %9317 = vst [vmem:[#allocation34_spill] sm:$0xff] %v7403_v9  ;;  %v1021_v42 = vshrl.u32 %v9290_v28, %v1020_v18  ;;  %vm1039_vm9 = vcmp.lt.s32.totalorder %v1018_v25, 3  ;;  %v1046_v30 = vsel %vm1040_vm6, %v1033_v44, 920167782  ;;  %v1049_v51 = vsel %vm1037_vm3, %v1027_v41, %v1030_v14 }
 0x175   :  { %v1172_v29 = vshll.u32 %v7403_v9, 30  ;;  %vm1038_vm10 = vcmp.lt.s32.totalorder %v1018_v25, 2  ;;  %v1047_v1 = vsel %vm1039_vm9, %v1030_v14, %v1046_v30  ;;  %v1050_v59 = vsel %vm1040_vm6, %v1036_v16, 1326507024 }
 0x176   :  { %v1041_v39 = vsel %vm1037_vm3, %v1021_v42, %v1024_v53  ;;  %v1043_v26 = vsel %vm1039_vm9, %v1027_v41, %v1042_v58  ;;  %v1048_v37 = vsel %vm1038_vm10, %v1045_v63, %v1047_v1  ;;  %v1051_v46 = vsel %vm1039_vm9, %v1033_v44, %v1050_v59 }
 0x177   :  { %v7408_v8 = vsel %vm5610_vm1, 0, %v5609_v47  ;;  %v1052_v31 = vsel %vm1038_vm10, %v1049_v51, %v1051_v46  ;;  %v7410_v38 = vmul.u32.u64.low %v1053_v60, %v1048_v37  ;;  %v7411_v23 = vmul.u32.u64.high %v1053_v60, %v1048_v37, %v7410_v38 }
 0x178   :  { %v5605_v18 = vadd.s32 4294967294, %v865_v24  ;;  %v7414_v19 = vmul.u32.u64.low %v1053_v60, %v1052_v31  ;;  %v7415_v34 = vmul.u32.u64.high %v1053_v60, %v1052_v31, %v7414_v19  ;;  %vm1328_vm11 = vcmp.gt.s32.totalorder %v1327_v27, 0 }
 0x179   :  { %v7417_v25 = vor.u32 4788187, %v667_v36  ;;  %v7419_v14 = vsub.s32 %v1169_v33, %v1172_v29  ;;  %v1044_v53 = vsel %vm1038_vm10, %v1041_v39, %v1043_v26  ;;  %v1329_v41 = vsel %vm1328_vm11, %v1327_v27, 0  ;;  %v126_v27 = vpop.permute.xlu0 %125 }
 0x17a   :  { %v9318_v59 = vxor.u32 2147483648, %v7302_v40  ;;  %v977_v24 = vsub.s32 4294967266, %v7408_v8  ;;  %v1331_v47 = vand.u32 31, %v1329_v41  ;;  %v9320_v19 = vand.u32 2147483647, %v7328_v48 }
 0x17b   :  { %v9321_v36 = vcvt.s32.f32 %v7326_v32  ;;  %v7438_v16 = vadd.s32 %v7195_v43, %v7201_v55  ;;  %v1063_v58 = vadd.s32 1, %v7411_v23  ;;  %vm5606_vm13 = vcmp.lt.s32.totalorder %v5605_v18, 0 }
 0x17c   :  { %v7426_v44 = vsel %vm9237_vm2, %v9318_v59, %v7302_v40  ;;  %v9322_v40 = vand.u32 2147483647, %v7324_v6  ;;  %v1060_v42 = vmul.u32 %v1053_v60, %v1044_v53  ;;  %vm1062_vm14 = vc.u32 %v7415_v34, %v7410_v38 }
 0x17d   :  { %9319 = vst [vmem:[#allocation35_spill] sm:$0xff] %v7426_v44  ;;  %v7434_v33 = vmul.f32 %v9321_v36, %v9320_v19  ;;  %v1332_v48 = vsub.s32 32, %v1331_v47  ;;  %v1175_v51 = vsub.s32 0, %v7419_v14  ;;  %v1064_v43 = vsel %vm1062_vm14, %v1063_v58, %v7411_v23 }
 0x17e   :  { %v1324_v63 = vand.u32 8388607, %v9322_v40  ;;  %v7449_v55 = vadd.s32 127, %v977_v24  ;;  %v1065_v29 = vadd.s32 %v1064_v43, %v1060_v42  ;;  %v7453_v39 = vmul.f32 %v7062_v50, %v126_v27 }
 0x17f   :  { %v1335_v1 = vshrl.u32 %v9298_v62, %v1332_v48  ;;  %v7455_v60 = vsel %vm5606_vm13, 0, %v5605_v18  ;;  %v1338_v26 = vshrl.u32 %v9285_v12, %v1332_v48  ;;  %v1341_v46 = vshrl.u32 %v9286_v7, %v1332_v48 }
 0x180   :  { %v1344_v31 = vshrl.u32 %v9287_v5, %v1332_v48  ;;  %v1066_v53 = vadd.s32 536870912, %v1065_v29  ;;  %v1325_v59 = vor.u32 8388608, %v1324_v63  ;;  %v1334_v23 = vshll.u32 %v9290_v28, %v1331_v47 }
 0x181   :  { %v1337_v24 = vshll.u32 %v9298_v62, %v1331_v47  ;;  %v5616_v19 = vmin.u32 %v1175_v51, %v7419_v14  ;;  %v1330_v36 = vshrl.u32 %v1329_v41, 5  ;;  %v1340_v50 = vshll.u32 %v9285_v12, %v1331_v47 }
 0x182   :  { %v1343_v18 = vshll.u32 %v9286_v7, %v1331_v47  ;;  %v973_v58 = vsub.s32 32, %v7408_v8  ;;  %v7466_v40 = vshrl.u32 %v1066_v53, 30  ;;  %v1336_v27 = vor.u32 %v1335_v1, %v1334_v23 }
 0x183   :  { %v1339_v42 = vor.u32 %v1338_v26, %v1337_v24  ;;  %v1342_v43 = vor.u32 %v1341_v46, %v1340_v50  ;;  %v1346_v63 = vshll.u32 %v9287_v5, %v1331_v47  ;;  %v1347_v30 = vshrl.u32 %v9288_v11, %v1332_v48 }
 0x184   :  { %9323 = vst [vmem:[#allocation36_spill] sm:$0xff] %v7466_v40  ;;  %v1345_v37 = vor.u32 %v1344_v31, %v1343_v18  ;;  %v979_v32 = vshll.u32 %v7449_v55, 23  ;;  %v873_v41 = vsub.s32 4294967266, %v7455_v60  ;;  %v1068_v51 = vshll.u32 %v7466_v40, 30  ;;  %v3489_v18 = vld [vmem:[%s9139_s2 + $0x20] sm:$0xff] }
 0x185   :  { %v7473_v9 = vshll.u32 %v1325_v59, 8  ;;  %v1177_v44 = vclz %v5616_v19  ;;  %v1348_v52 = vor.u32 %v1347_v30, %v1346_v63  ;;  %vm1349_vm0 = vcmp.lt.s32.totalorder %v1330_v36, 1  ;;  %v4032_v40 = vld [vmem:[%s9139_s2 + $0x40] sm:$0xff] }
 0x186   :  { %v1216_v1 = vand.u32 2139095040, %v7453_v39  ;;  %v7476_v26 = vsub.s32 %v1065_v29, %v1068_v51  ;;  %vm1351_vm1 = vcmp.lt.s32.totalorder %v1330_v36, 3  ;;  %vm1352_vm3 = vcmp.lt.s32.totalorder %v1330_v36, 4 }
 0x187   :  { %v1357_v47 = vsel %vm1349_vm0, %v1336_v27, %v1339_v42  ;;  %v1354_v46 = vsel %vm1352_vm3, %v1342_v43, 2102212464  ;;  %v1358_v31 = vsel %vm1352_vm3, %v1345_v37, 920167782  ;;  %v1361_v55 = vsel %vm1349_vm0, %v1339_v42, %v1342_v43 }
 0x188   :  { %v1362_v53 = vsel %vm1352_vm3, %v1348_v52, 1326507024  ;;  %v1071_v23 = vsub.s32 0, %v7476_v26  ;;  %v1333_v59 = vshrl.u32 %v9290_v28, %v1332_v48  ;;  %vm1350_vm6 = vcmp.lt.s32.totalorder %v1330_v36, 2 }
 0x189   :  { %v1359_v30 = vsel %vm1351_vm1, %v1342_v43, %v1358_v31  ;;  %v5617_v24 = vadd.s32 4294967294, %v1177_v44  ;;  %v1363_v19 = vsel %vm1351_vm1, %v1345_v37, %v1362_v53  ;;  %v1217_v50 = vshrl.u32 %v1216_v1, 23  ;;  %v3490_v44 = vld [vmem:[%s9139_s2 + $0x28] sm:$0xff]  ;;  %v3491_v37 = vld [vmem:[%s9139_s2 + $0x30] sm:$0xff]  ;;  %v3492_v43 = vld [vmem:[%s9139_s2 + $0x38] sm:$0xff] }
 0x18a   :  { %v1360_v29 = vsel %vm1350_vm6, %v1357_v47, %v1359_v30  ;;  %v5612_v63 = vmin.u32 %v1071_v23, %v7476_v26  ;;  %v1353_v52 = vsel %vm1349_vm0, %v1333_v59, %v1336_v27  ;;  %v1355_v51 = vsel %vm1351_vm1, %v1339_v42, %v1354_v46 }
 0x18b   :  { %v1364_v48 = vsel %vm1350_vm6, %v1361_v55, %v1363_v19  ;;  %v7506_v27 = vmul.u32.u64.low %v7473_v9, %v1360_v29  ;;  %v7507_v42 = vmul.u32.u64.high %v7473_v9, %v1360_v29, %v7506_v27  ;;  %v853_v46 = vadd.s32 %v7279_v13, %v7277_v3  ;;  %v4033_v13 = vld [vmem:[%s9139_s2 + $0x48] sm:$0xff] }
 0x18c   :  { %v7502_v1 = vmul.u32.u64.low %v7473_v9, %v1364_v48  ;;  %v7503_v47 = vmul.u32.u64.high %v7473_v9, %v1364_v48, %v7502_v1  ;;  %v874_v31 = vadd.s32 127, %v873_v41  ;;  %v9219_v55 = vand.u32 2147483647, %v7453_v39 }
 0x18d   :  { %v5619_v53 = vadd.s32 4294967169, %v1217_v50  ;;  %v975_v23 = vshrl.u32 %v7438_v16, %v973_v58  ;;  %v1356_v59 = vsel %vm1350_vm6, %v1353_v52, %v1355_v51  ;;  %v6036_v30 = vpack.c.bf16 %v3490_v44, %v3489_v18 }
 0x18e   :  { %v6040_v19 = vpack.c.bf16 %v3492_v43, %v3491_v37  ;;  %v7515_v48 = vor.u32 4788187, %v979_v32  ;;  %vm5618_vm9 = vcmp.lt.s32.totalorder %v5617_v24, 0  ;;  %v1073_v1 = vclz %v5612_v63 }
 0x18f   :  { %v1223_v29 = vadd.s32 1, %v5619_v53  ;;  %v974_v3 = vshll.u32 %v7313_v20, %v7408_v8  ;;  %v869_v16 = vsub.s32 32, %v7455_v60  ;;  %vm1374_vm10 = vc.u32 %v7503_v47, %v7506_v27  ;;  %6116 = vmatprep.subr.bf16.mxu1 %v6036_v30  ;;  %6037 = vmatprep.subr.bf16.mxu0 %v6036_v30 }
 0x190   :  { %v1375_v32 = vadd.s32 1, %v7507_v42  ;;  %v875_v36 = vshll.u32 %v874_v31, 23  ;;  %v1372_v58 = vmul.u32 %v7473_v9, %v1356_v59  ;;  %v1220_v41 = vand.u32 8388607, %v9219_v55  ;;  %6118 = vmatpush3.bf16.msra.mxu1 %v6036_v30  ;;  %6039 = vmatpush3.bf16.msra.mxu0 %v6036_v30 }
 0x191   :  { %vm1224_vm11 = vcmp.gt.s32.totalorder %v1223_v29, 0  ;;  %v7533_v20 = vsel %vm5618_vm9, 0, %v5617_v24  ;;  %v7536_v18 = vpack.c.bf16 %v4033_v13, %v4032_v40  ;;  %6117 = vmatprep.subr.bf16.mxu1 %v6040_v19  ;;  %6041 = vmatprep.subr.bf16.mxu0 %v6040_v19  ;;  %v7538_v63 = vor.u32 %v975_v23, %v974_v3 }
 0x192   :  { %v1376_v8 = vsel %vm1374_vm10, %v1375_v32, %v7507_v42  ;;  %v1225_v50 = vsel %vm1224_vm11, %v1223_v29, 0  ;;  %v5613_v52 = vadd.s32 4294967294, %v1073_v1  ;;  %v7543_v37 = vshrl.u32 %v853_v46, %v869_v16 }
 0x193   :  { %9324 = vst [vmem:[#allocation37_spill] sm:$0xff] %v7536_v18  ;;  %v1377_v51 = vadd.s32 %v1376_v8, %v1372_v58  ;;  %v7547_v24 = vadd.s32 %v7360_v2, %v7365_v57  ;;  %v1227_v43 = vand.u32 31, %v1225_v50  ;;  %v7549_v40 = vor.u32 4788187, %v875_v36 }
 0x194   :  { %v7554_v31 = vadd.s32 %v7410_v38, %v7415_v34  ;;  %6119 = vmatpush3.bf16.msra.mxu1 %v6040_v19  ;;  %6043 = vmatpush3.bf16.msra.mxu0 %v6040_v19  ;;  %v1221_v23 = vor.u32 8388608, %v1220_v41  ;;  %v9222_v2 = vand.u32 2147483647, %v6615_v45  ;;  %vm5614_vm13 = vcmp.lt.s32.totalorder %v5613_v52, 0 }
 0x195   :  { %v1378_v53 = vadd.s32 536870912, %v1377_v51  ;;  %v1228_v59 = vsub.s32 32, %v1227_v43  ;;  %6053 = vmatprep.subr.bf16.mxu1 %v7536_v18  ;;  %v1230_v30 = vshll.u32 %v9290_v28, %v1227_v43  ;;  %v1233_v34 = vshll.u32 %v9298_v62, %v1227_v43 }
 0x196   :  { %v1236_v1 = vshll.u32 %v9285_v12, %v1227_v43  ;;  %v1226_v3 = vshrl.u32 %v1225_v50, 5  ;;  %v1239_v16 = vshll.u32 %v9286_v7, %v1227_v43  ;;  %v1185_v36 = vsub.s32 4294967266, %v7533_v20 }
 0x197   :  { %v7560_v57 = vshrl.u32 %v1378_v53, 30  ;;  %v1231_v38 = vshrl.u32 %v9298_v62, %v1228_v59  ;;  %v1234_v19 = vshrl.u32 %v9285_v12, %v1228_v59  ;;  %v1237_v29 = vshrl.u32 %v9286_v7, %v1228_v59 }
 0x198   :  { %v1240_v32 = vshrl.u32 %v9287_v5, %v1228_v59  ;;  %v1242_v9 = vshll.u32 %v9287_v5, %v1227_v43  ;;  %v1243_v46 = vshrl.u32 %v9288_v11, %v1228_v59  ;;  %v7577_v44 = vsel %vm5614_vm13, 0, %v5613_v52 }
 0x199   :  { %9325 = vst [vmem:[#allocation38_spill] sm:$0xff] %v7560_v57  ;;  %v1380_v13 = vshll.u32 %v7560_v57, 30  ;;  %v1232_v58 = vor.u32 %v1231_v38, %v1230_v30  ;;  %v1235_v41 = vor.u32 %v1234_v19, %v1233_v34  ;;  %v1238_v8 = vor.u32 %v1237_v29, %v1236_v1 }
 0x19a   :  { %v1241_v55 = vor.u32 %v1240_v32, %v1239_v16  ;;  %v1229_v50 = vshrl.u32 %v9290_v28, %v1228_v59  ;;  %v1261_v42 = vshll.u32 %v1221_v23, 8  ;;  %v1428_v57 = vand.u32 8388607, %v9222_v2 }
 0x19b   :  { %v7572_v53 = vsub.s32 %v1377_v51, %v1380_v13  ;;  %v1244_v34 = vor.u32 %v1243_v46, %v1242_v9  ;;  %vm1245_vm14 = vcmp.lt.s32.totalorder %v1226_v3, 1  ;;  %vm1248_vm0 = vcmp.lt.s32.totalorder %v1226_v3, 4 }
 0x19c   :  { %vm1246_vm1 = vcmp.lt.s32.totalorder %v1226_v3, 2  ;;  %vm1247_vm3 = vcmp.lt.s32.totalorder %v1226_v3, 3  ;;  %v1253_v51 = vsel %vm1245_vm14, %v1232_v58, %v1235_v41  ;;  %v1254_v5 = vsel %vm1248_vm0, %v1241_v55, 920167782 }
 0x19d   :  { %v1383_v30 = vsub.s32 0, %v7572_v53  ;;  %v1250_v43 = vsel %vm1248_vm0, %v1238_v8, 2102212464  ;;  %v1255_v52 = vsel %vm1247_vm3, %v1238_v8, %v1254_v5  ;;  %v1257_v38 = vsel %vm1245_vm14, %v1235_v41, %v1238_v8 }
 0x19e   :  { %v1081_v59 = vsub.s32 4294967266, %v7577_v44  ;;  %v1256_v23 = vsel %vm1246_vm1, %v1253_v51, %v1255_v52  ;;  %v1258_v19 = vsel %vm1248_vm0, %v1244_v34, 1326507024  ;;  %v1439_v1 = vshrl.u32 %v9298_v62, %v6771_v0 }
 0x19f   :  { %v5624_v11 = vmin.u32 %v1383_v30, %v7572_v53  ;;  %v1249_v46 = vsel %vm1245_vm14, %v1229_v50, %v1232_v58  ;;  %v1259_v29 = vsel %vm1247_vm3, %v1241_v55, %v1258_v19  ;;  %v1438_v13 = vshll.u32 %v9290_v28, %v6731_v21 }
 0x1a0   :  { %v1251_v16 = vsel %vm1247_vm3, %v1235_v41, %v1250_v43  ;;  %v1260_v32 = vsel %vm1246_vm1, %v1257_v38, %v1259_v29  ;;  %v7591_v30 = vmul.u32.u64.low %v1261_v42, %v1256_v23  ;;  %v7592_v5 = vmul.u32.u64.high %v1261_v42, %v1256_v23, %v7591_v30 }
 0x1a1   :  { %v1385_v9 = vclz %v5624_v11  ;;  %v7595_v2 = vmul.u32.u64.low %v1261_v42, %v1260_v32  ;;  %v7596_v51 = vmul.u32.u64.high %v1261_v42, %v1260_v32, %v7595_v2  ;;  %v1440_v34 = vor.u32 %v1439_v1, %v1438_v13 }
 0x1a2   :  { %v1441_v11 = vshll.u32 %v9298_v62, %v6731_v21  ;;  %v1442_v55 = vshrl.u32 %v9285_v12, %v6771_v0  ;;  %v1444_v58 = vshll.u32 %v9285_v12, %v6731_v21  ;;  %v1445_v41 = vshrl.u32 %v9286_v7, %v6771_v0 }
 0x1a3   :  { %v5625_v8 = vadd.s32 4294967294, %v1385_v9  ;;  %v9326_v50 = vsub.s32 32, %v7533_v20  ;;  %v1186_v52 = vadd.s32 127, %v1185_v36  ;;  %v1077_v2 = vsub.s32 32, %v7577_v44 }
 0x1a4   :  { %v1252_v38 = vsel %vm1246_vm1, %v1249_v46, %v1251_v16  ;;  %v1271_v23 = vadd.s32 1, %v7592_v5  ;;  %v1443_v19 = vor.u32 %v1442_v55, %v1441_v11  ;;  %v1446_v1 = vor.u32 %v1445_v41, %v1444_v58 }
 0x1a5   :  { %v1183_v43 = vshrl.u32 %v7547_v24, %v9326_v50  ;;  %vm5626_vm6 = vcmp.lt.s32.totalorder %v5625_v8, 0  ;;  %v1082_v9 = vadd.s32 127, %v1081_v59  ;;  %v1429_v29 = vor.u32 8388608, %v1428_v57 }
 0x1a6   :  { %vm1453_vm9 = vcmp.lt.s32.totalorder %v6863_v15, 1  ;;  %vm1455_vm10 = vcmp.lt.s32.totalorder %v6863_v15, 3  ;;  %v1268_v21 = vmul.u32 %v1261_v42, %v1252_v38  ;;  %vm1270_vm11 = vc.u32 %v7596_v51, %v7591_v30 }
 0x1a7   :  { %v1461_v24 = vsel %vm1453_vm9, %v1440_v34, %v1443_v19  ;;  %v1463_v3 = vsel %vm1455_vm10, %v1446_v1, %v6895_v54  ;;  %v1187_v36 = vshll.u32 %v1186_v52, 23  ;;  %v7621_v46 = vsel %vm5626_vm6, 0, %v5625_v8  ;;  %v9327_v8 = vld [vmem:[#allocation15_spill] sm:$0xff] }
 0x1a8   :  { %v1272_v57 = vsel %vm1270_vm11, %v1271_v23, %v7592_v5  ;;  %v1437_v59 = vshrl.u32 %v9290_v28, %v6771_v0  ;;  %vm1454_vm13 = vcmp.lt.s32.totalorder %v6863_v15, 2  ;;  %v1458_v42 = vsel %vm1456_vm4, %v1446_v1, 2102212464 }
 0x1a9   :  { %v1273_v13 = vadd.s32 %v1272_v57, %v1268_v21  ;;  %v1465_v16 = vsel %vm1453_vm9, %v1443_v19, %v1446_v1  ;;  %v1083_v32 = vshll.u32 %v1082_v9, 23  ;;  %v1464_v54 = vsel %vm1454_vm13, %v1461_v24, %v1463_v3  ;;  %v9328_v1 = vld [vmem:[#allocation12_spill] sm:$0xff]  ;;  %v9330_v3 = vld [vmem:[#allocation13_spill] sm:$0xff] }
 0x1aa   :  { %v1467_v5 = vsel %vm1455_vm10, %v9327_v8, %v6899_v17  ;;  %v1469_v11 = vshll.u32 %v1429_v29, 8  ;;  %v1079_v0 = vshrl.u32 %v7554_v31, %v1077_v2  ;;  %v1393_v55 = vsub.s32 4294967266, %v7621_v46 }
 0x1ab   :  { %v1274_v58 = vadd.s32 536870912, %v1273_v13  ;;  %v1468_v41 = vsel %vm1454_vm13, %v1465_v16, %v1467_v5  ;;  %v1457_v50 = vsel %vm1453_vm9, %v1437_v59, %v1440_v34  ;;  %v1459_v52 = vsel %vm1455_vm10, %v1443_v19, %v1458_v42 }
 0x1ac   :  { %v7645_v38 = vmul.u32.u64.low %v1469_v11, %v1468_v41  ;;  %v7646_v23 = vmul.u32.u64.high %v1469_v11, %v1468_v41, %v7645_v38  ;;  %vm383_vm4 = vcmp.lt.s32.totalorder %v9328_v1, 0  ;;  %v1188_v17 = vor.u32 4788187, %v1187_v36 }
 0x1ad   :  { %v7649_v9 = vshrl.u32 %v1274_v58, 30  ;;  %v7651_v31 = vmul.u32.u64.low %v1469_v11, %v1464_v54  ;;  %v7652_v2 = vmul.u32.u64.high %v1469_v11, %v1464_v54, %v7651_v31  ;;  %v983_v29 = vcvt.s32.f32 %v7538_v63 }
 0x1ae   :  { %v9329_v34 = vshll.u32 %v7355_v56, %v7455_v60  ;;  %v1078_v19 = vshll.u32 %v7476_v26, %v7577_v44  ;;  %v1084_v24 = vor.u32 4788187, %v1083_v32  ;;  %vm9227_vm14 = vcmp.lt.s32.totalorder %v9330_v3, 0  ;;  %v9335_v32 = vld [vmem:[#allocation20_spill] sm:$0xff] }
 0x1af   :  { %v9331_v36 = vshll.u32 %v7419_v14, %v7533_v20  ;;  %v1394_v59 = vadd.s32 127, %v1393_v55  ;;  %v1276_v42 = vshll.u32 %v7649_v9, 30  ;;  %v1460_v63 = vsel %vm1454_vm13, %v1457_v50, %v1459_v52  ;;  %v9337_v52 = vld [vmem:[#allocation26_spill] sm:$0xff] }
 0x1b0   :  { %v872_v21 = vor.u32 %v7543_v37, %v9329_v34  ;;  %v9332_v56 = vand.u32 2147483647, %v7417_v25  ;;  %v9333_v60 = vcvt.s32.f32 %v7383_v22  ;;  %v9334_v26 = vand.u32 2147483647, %v7515_v48  ;;  %v9336_v25 = vld [vmem:[#allocation25_spill] sm:$0xff] }
 0x1b1   :  { %v1184_v57 = vor.u32 %v1183_v43, %v9331_v36  ;;  %v1080_v16 = vor.u32 %v1079_v0, %v1078_v19  ;;  %vm1478_vm0 = vc.u32 %v7646_v23, %v7651_v31  ;;  %v877_v14 = vand.u32 2147483647, %v7549_v40 }
 0x1b2   :  { %v672_v37 = vmul.f32 %v9333_v60, %v9332_v56  ;;  %v984_v44 = vmul.f32 %v983_v29, %v9334_v26  ;;  %v1189_v20 = vand.u32 2147483647, %v1188_v17  ;;  %v7678_v43 = vsub.s32 %v1273_v13, %v1276_v42 }
 0x1b3   :  { %v1479_v15 = vadd.s32 1, %v7652_v2  ;;  %vm9229_vm1 = vcmp.lt.s32.totalorder %v9335_v32, 0  ;;  %vm9225_vm3 = vcmp.lt.s32.totalorder %v9336_v25, 0  ;;  %v879_v22 = vcvt.s32.f32 %v872_v21 }
 0x1b4   :  { %v1085_v54 = vand.u32 2147483647, %v1084_v24  ;;  %v1389_v48 = vsub.s32 32, %v7621_v46  ;;  %v1476_v8 = vmul.u32 %v1469_v11, %v1460_v63  ;;  %v1191_v5 = vcvt.s32.f32 %v1184_v57  ;;  %v9339_v63 = vld [vmem:[#allocation11_spill] sm:$0xff] }
 0x1b5   :  { %v1395_v0 = vshll.u32 %v1394_v59, 23  ;;  %v1279_v55 = vsub.s32 0, %v7678_v43  ;;  %v1480_v40 = vsel %vm1478_vm0, %v1479_v15, %v7652_v2  ;;  %v777_v13 = vxor.u32 2147483648, %v7434_v33 }
 0x1b6   :  { %v1087_v58 = vcvt.s32.f32 %v1080_v16  ;;  %v1373_v41 = vadd.s32 %v7506_v27, %v7503_v47  ;;  %v1481_v50 = vadd.s32 %v1480_v40, %v1476_v8  ;;  %vm9226_vm6 = vcmp.lt.s32.totalorder %v9337_v52, 0 }
 0x1b7   :  { %v880_v38 = vmul.f32 %v879_v22, %v877_v14  ;;  %v1192_v17 = vmul.f32 %v1191_v5, %v1189_v20  ;;  %v5620_v29 = vmin.u32 %v1279_v55, %v7678_v43  ;;  %v9338_v11 = vxor.u32 2147483648, %v7378_v4 }
 0x1b8   :  { %v1088_v2 = vmul.f32 %v1087_v58, %v1085_v54  ;;  %v1391_v21 = vshrl.u32 %v1373_v41, %v1389_v48  ;;  %v1482_v19 = vadd.s32 536870912, %v1481_v50  ;;  %v673_v24 = vxor.u32 2147483648, %v672_v37  ;;  %v9340_v48 = vld [vmem:[#allocation6_spill] sm:$0xff] }
 0x1b9   :  { %v7696_v34 = vsel %vm383_vm4, %v9338_v11, %v7378_v4  ;;  %v985_v36 = vxor.u32 2147483648, %v984_v44  ;;  %v1396_v47 = vor.u32 4788187, %v1395_v0  ;;  %v1281_v27 = vclz %v5620_v29  ;;  %v9342_v0 = vld [vmem:[#allocation7_spill] sm:$0xff] }
 0x1ba   :  { %v7701_v57 = vsel %vm9227_vm14, %v777_v13, %v7434_v33  ;;  %v1390_v59 = vshll.u32 %v7572_v53, %v7621_v46  ;;  %v7705_v42 = vshrl.u32 %v1482_v19, 30  ;;  %v1611_v4 = vsub.s32 4, %v9339_v63  ;;  %v4034_v33 = vld [vmem:[%s9139_s2 + $0x50] sm:$0xff]  ;;  %v4035_v53 = vld [vmem:[%s9139_s2 + $0x58] sm:$0xff] }
 0x1bb   :  { %v881_v56 = vxor.u32 2147483648, %v880_v38  ;;  %vm9223_vm9 = vcmp.lt.s32.totalorder %v7239_v49, 0  ;;  %v1193_v60 = vxor.u32 2147483648, %v1192_v17  ;;  %v5621_v26 = vadd.s32 4294967294, %v1281_v27  ;;  %v9344_v13 = vld [vmem:[#allocation31_spill] sm:$0xff] }
 0x1bc   :  { %vm9224_vm10 = vcmp.lt.s32.totalorder %v7261_v10, 0  ;;  %v1089_v16 = vxor.u32 2147483648, %v1088_v2  ;;  %v1392_v14 = vor.u32 %v1391_v21, %v1390_v59  ;;  %v1484_v46 = vshll.u32 %v7705_v42, 30 }
 0x1bd   :  { %v7719_v20 = vsel %vm9229_vm1, %v673_v24, %v672_v37  ;;  %v7723_v15 = vsel %vm9225_vm3, %v985_v36, %v984_v44  ;;  %v1397_v22 = vand.u32 2147483647, %v1396_v47  ;;  %vm5622_vm11 = vcmp.lt.s32.totalorder %v5621_v26, 0  ;;  %v9348_v24 = vld [vmem:[#allocation9_spill] sm:$0xff] }
 0x1be   :  { %v7725_v54 = vsub.s32 %v1481_v50, %v1484_v46  ;;  %v9341_v8 = vand.u32 2147483647, %v9340_v48  ;;  %v1612_v5 = vsel %vm1527_vm15, %v1611_v4, %v9339_v63  ;;  %v1715_v55 = vsub.s32 4, %v9342_v0  ;;  %v9349_v63 = vld [vmem:[#allocation17_spill] sm:$0xff] }
 0x1bf   :  { %v7735_v37 = vsel %vm9226_vm6, %v881_v56, %v880_v38  ;;  %v7739_v44 = vsel %vm9223_vm9, %v1193_v60, %v1192_v17  ;;  %v7741_v40 = vpack.c.bf16 %v4035_v53, %v4034_v33  ;;  %v7747_v41 = vsel %vm9224_vm10, %v1089_v16, %v1088_v2  ;;  %v9346_v17 = vld [vmem:[#allocation4_spill] sm:$0xff]  ;;  %v9352_v53 = vld [vmem:[#allocation19_spill] sm:$0xff] }
 0x1c0   :  { %vm1526_vm13 = vcmp.le.f32.partialorder %v9341_v8, 0.7853982  ;;  %v1399_v50 = vcvt.s32.f32 %v1392_v14  ;;  %v7749_v29 = vsel %vm5622_vm11, 0, %v5621_v26  ;;  %v1487_v11 = vsub.s32 0, %v7725_v54 }
 0x1c1   :  { %9343 = vst [vmem:[#allocation15_spill] sm:$0xff] %v7741_v40  ;;  %v1613_v58 = vsel %vm1526_vm13, %v9340_v48, %v9344_v13  ;;  %v1269_v38 = vadd.s32 %v7591_v30, %v7596_v51  ;;  %v7754_v21 = vsel %vm1526_vm13, 0, %v1612_v5  ;;  %v9347_v19 = vand.u32 2147483647, %v9346_v17  ;;  %v9350_v51 = vld [vmem:[#allocation22_spill] sm:$0xff] }
 0x1c2   :  { %9345 = vst [vmem:[#allocation12_spill] sm:$0xff] %v7754_v21  ;;  %v9228_v36 = vand.u32 2147483647, %v9348_v24  ;;  %v7759_v47 = vmul.f32 %v1399_v50, %v1397_v22  ;;  %v5628_v2 = vmin.u32 %v1487_v11, %v7725_v54  ;;  %6251 = vcosq.f32 %v1613_v58 }
 0x1c3   :  { %vm1630_vm15 = vcmp.le.f32.partialorder %v9347_v19, 0.7853982  ;;  %v1716_v27 = vsel %vm1631_vm5, %v1715_v55, %v9342_v0  ;;  %v1289_v59 = vsub.s32 4294967266, %v7749_v29  ;;  %v191_v4 = vshrl.u32 %v9298_v62, %v9350_v51 }
 0x1c4   :  { %v1717_v30 = vsel %vm1630_vm15, %v9346_v17, %v9349_v63  ;;  %v194_v56 = vshrl.u32 %v9285_v12, %v9350_v51  ;;  %v1477_v60 = vadd.s32 %v7651_v31, %v7646_v23  ;;  %v1489_v26 = vclz %v5628_v2  ;;  %v9356_v63 = vld [vmem:[#allocation18_spill] sm:$0xff] }
 0x1c5   :  { %6253 = vsinq.f32 %v1613_v58  ;;  %v7775_v16 = vand.u32 3, %v7754_v21  ;;  %v7777_v14 = vsel %vm1630_vm15, 0, %v1716_v27  ;;  %v180_v33 = vand.u32 8388607, %v9228_v36 }
 0x1c6   :  { %9351 = vst [vmem:[#allocation13_spill] sm:$0xff] %v7777_v14  ;;  %v190_v46 = vshll.u32 %v9290_v28, %v9352_v53  ;;  %v193_v22 = vshll.u32 %v9298_v62, %v9352_v53  ;;  %vm1423_vm5 = vcmp.lt.s32.totalorder %v6615_v45, 0  ;;  %v5629_v8 = vadd.s32 4294967294, %v1489_v26  ;;  %v9357_v26 = vld [vmem:[#allocation28_spill] sm:$0xff] }
 0x1c7   :  { %6255 = vcosq.f32 %v1717_v30  ;;  %v196_v23 = vshll.u32 %v9285_v12, %v9352_v53  ;;  %v197_v31 = vshrl.u32 %v9286_v7, %v9350_v51  ;;  %v1285_v5 = vsub.s32 32, %v7749_v29 }
 0x1c8   :  { %v1290_v0 = vadd.s32 127, %v1289_v59  ;;  %v192_v55 = vor.u32 %v191_v4, %v190_v46  ;;  %v195_v13 = vor.u32 %v194_v56, %v193_v22  ;;  %vm5630_vm0 = vcmp.lt.s32.totalorder %v5629_v8, 0 }
 0x1c9   :  { %6257 = vsinq.f32 %v1717_v30  ;;  %v7792_v58 = vand.u32 3, %v7777_v14  ;;  %v198_v62 = vor.u32 %v197_v31, %v196_v23  ;;  %v9353_v50 = vand.u32 2147483647, %v6615_v45  ;;  %v9359_v23 = vld [vmem:[#allocation29_spill] sm:$0xff]  ;;  %v9360_v31 = vld [vmem:[#allocation24_spill] sm:$0xff] }
 0x1ca   :  { %v1492_v12 = vsel %vm5630_vm0, 0, %v5629_v8  ;;  %v1507_v7 = vsub.s32 4, %v7705_v42  ;;  %v181_v19 = vor.u32 8388608, %v180_v33  ;;  %v189_v2 = vshrl.u32 %v9290_v28, %v9350_v51 }
 0x1cb   :  { %vm7796_vm11 = vcmp.le.f32.partialorder %v9353_v50, 0.7853982  ;;  %v1493_v27 = vsub.s32 32, %v1492_v12  ;;  %v1497_v59 = vsub.s32 4294967266, %v1492_v12  ;;  %vm205_vm13 = vcmp.lt.s32.totalorder %v9356_v63, 1 }
 0x1cc   :  { %vm207_vm15 = vcmp.lt.s32.totalorder %v9356_v63, 3  ;;  %v1287_v30 = vshrl.u32 %v1269_v38, %v1285_v5  ;;  %v1291_v4 = vshll.u32 %v1290_v0, 23  ;;  %v213_v56 = vsel %vm205_vm13, %v192_v55, %v195_v13  ;;  %v7810_v46 = vpop.eup %6251 }
 0x1cd   :  { %v215_v53 = vsel %vm207_vm15, %v198_v62, %v9357_v26  ;;  %9358 = vst [vmem:[#allocation25_spill] sm:$0xff] %v7810_v46  ;;  %v1494_v33 = vshll.u32 %v7725_v54, %v1492_v12  ;;  %v1495_v28 = vshrl.u32 %v1477_v60, %v1493_v27  ;;  %v1498_v51 = vadd.s32 127, %v1497_v59 }
 0x1ce   :  { %vm206_vm0 = vcmp.lt.s32.totalorder %v9356_v63, 2  ;;  %v210_v22 = vsel %vm208_vm8, %v198_v62, 2102212464  ;;  %v217_v8 = vsel %vm205_vm13, %v195_v13, %v198_v62  ;;  %v219_v5 = vsel %vm207_vm15, %v9360_v31, %v9359_v23  ;;  %v9369_v63 = vld [vmem:[#allocation21_spill] sm:$0xff] }
 0x1cf   :  { %v216_v38 = vsel %vm206_vm0, %v213_v56, %v215_v53  ;;  %v7824_v0 = vpop.eup %6253  ;;  %v1496_v54 = vor.u32 %v1495_v28, %v1494_v33  ;;  %v1499_v60 = vshll.u32 %v1498_v51, 23  ;;  %v220_v50 = vsel %vm206_vm0, %v217_v8, %v219_v5 }
 0x1d0   :  { %9361 = vst [vmem:[#allocation26_spill] sm:$0xff] %v7824_v0  ;;  %v221_v12 = vshll.u32 %v181_v19, 8  ;;  %v1401_v27 = vxor.u32 2147483648, %v7759_v47  ;;  %v1286_v59 = vshll.u32 %v7678_v43, %v7749_v29  ;;  %v1508_v62 = vsel %vm1423_vm5, %v1507_v7, %v7705_v42 }
 0x1d1   :  { %v209_v56 = vsel %vm205_vm13, %v189_v2, %v192_v55  ;;  %v7836_v26 = vpop.eup %6255  ;;  %v1500_v53 = vor.u32 4788187, %v1499_v60  ;;  %vm3275_vm8 = vcmp.eq.s32.totalorder %v7775_v16, 0  ;;  %vm3278_vm9 = vcmp.eq.s32.totalorder %v7775_v16, 2 }
 0x1d2   :  { %9362 = vst [vmem:[#allocation11_spill] sm:$0xff] %v7836_v26  ;;  %v211_v19 = vsel %vm207_vm15, %v195_v13, %v210_v22  ;;  %v7842_v33 = vmul.u32.u64.low %v221_v12, %v220_v50  ;;  %v7843_v28 = vmul.u32.u64.high %v221_v12, %v220_v50, %v7842_v33  ;;  %v1288_v43 = vor.u32 %v1287_v30, %v1286_v59  ;;  %v9364_v30 = vld [vmem:[#allocation5_spill] sm:$0xff] }
 0x1d3   :  { %vm3378_vm10 = vcmp.eq.s32.totalorder %v7792_v58, 0  ;;  %v7846_v42 = vmul.u32.u64.low %v221_v12, %v216_v38  ;;  %v7847_v29 = vmul.u32.u64.high %v221_v12, %v216_v38, %v7846_v42  ;;  %v7850_v55 = vpop.eup %6257  ;;  %v1292_v7 = vor.u32 4788187, %v1291_v4  ;;  %v9368_v38 = vld [vmem:[#allocation8_spill] sm:$0xff] }
 0x1d4   :  { %9363 = vst [vmem:[#allocation7_spill] sm:$0xff] %v7850_v55  ;;  %v1501_v2 = vand.u32 2147483647, %v1500_v53  ;;  %v1503_v51 = vcvt.s32.f32 %v1496_v54  ;;  %v1510_v8 = vsel %vm7796_vm11, 0, %v1508_v62  ;;  %vm3381_vm13 = vcmp.eq.s32.totalorder %v7792_v58, 2 }
 0x1d5   :  { %v212_v13 = vsel %vm206_vm0, %v209_v56, %v211_v19  ;;  %v9365_v22 = vand.u32 2147483647, %v9364_v30  ;;  %v1819_v31 = vsub.s32 4, %v9368_v38  ;;  %vm9230_vm3 = vcmp.lt.s32.totalorder %v7324_v6, 0 }
 0x1d6   :  { %v1504_v4 = vmul.f32 %v1503_v51, %v1501_v2  ;;  %v9236_v5 = vxor.u32 2147483648, %v7810_v46  ;;  %vm3274_vm6 = vcmp.lt.s32.totalorder %v7775_v16, 2  ;;  %vm230_vm14 = vc.u32 %v7843_v28, %v7846_v42 }
 0x1d7   :  { %vm7859_vm15 = vcmp.le.f32.partialorder %v9365_v22, 0.7853982  ;;  %v1295_v60 = vcvt.s32.f32 %v1288_v43  ;;  %v1514_v50 = vadd.s32 3, %v1510_v8  ;;  %v9238_v59 = vxor.u32 2147483648, %v7824_v0 }
 0x1d8   :  { %v1821_v54 = vsel %vm7859_vm15, %v9364_v30, %v9369_v63  ;;  %v231_v62 = vadd.s32 1, %v7847_v29  ;;  %v1293_v56 = vand.u32 2147483647, %v1292_v7  ;;  %v1505_v53 = vxor.u32 2147483648, %v1504_v4  ;;  %v9370_v7 = vld [vmem:[#allocation14_spill] sm:$0xff] }
 0x1d9   :  { %v9235_v19 = vxor.u32 2147483648, %v7850_v55  ;;  %v228_v33 = vmul.u32 %v221_v12, %v212_v13  ;;  %v9234_v2 = vxor.u32 2147483648, %v7836_v26  ;;  %v1820_v22 = vsel %vm1735_vm7, %v1819_v31, %v9368_v38 }
 0x1da   :  { %v232_v51 = vsel %vm230_vm14, %v231_v62, %v7847_v29  ;;  %6259 = vcosq.f32 %v1821_v54  ;;  %v1506_v43 = vsel %vm1423_vm5, %v1505_v53, %v1504_v4  ;;  %vm9232_vm0 = vweird.f32 %v9340_v48 }
 0x1db   :  { %v233_v63 = vadd.s32 %v232_v51, %v228_v33  ;;  %6261 = vsinq.f32 %v1821_v54  ;;  %v363_v36 = vsub.s32 4, %v9370_v7  ;;  %vm9233_vm1 = vcmp.lt.s32.totalorder %v7453_v39, 0 }
 0x1dc   :  { %v1509_v12 = vsel %vm7796_vm11, %v6615_v45, %v1506_v43  ;;  %v7889_v29 = vand.u32 3, %v1510_v8  ;;  %v3277_v13 = vsel %vm3275_vm8, %v7810_v46, %v9238_v59  ;;  %v3280_v38 = vsel %vm3278_vm9, %v9236_v5, %v7824_v0 }
 0x1dd   :  { %v1296_v31 = vmul.f32 %v1295_v60, %v1293_v56  ;;  %6263 = vcosq.f32 %v1509_v12  ;;  %v3380_v11 = vsel %vm3378_vm10, %v7836_v26, %v9235_v19  ;;  %v234_v8 = vadd.s32 536870912, %v233_v63  ;;  %v9384_v19 = vld [vmem:[#allocation10_spill] sm:$0xff] }
 0x1de   :  { %6265 = vsinq.f32 %v1509_v12  ;;  %v3383_v4 = vsel %vm3381_vm13, %v9234_v2, %v7850_v55  ;;  %v7913_v54 = vsel %vm7859_vm15, 0, %v1820_v22  ;;  %v9372_v60 = vand.u32 2147483647, %v6663_v35 }
 0x1df   :  { %9371 = vst [vmem:[#allocation31_spill] sm:$0xff] %v7913_v54  ;;  %v7921_v56 = vand.u32 3, %v1514_v50  ;;  %v7923_v53 = vshrl.u32 %v234_v8, 30  ;;  %v364_v33 = vsel %vm279_vm12, %v363_v36, %v9370_v7  ;;  %v7937_v51 = vsel %vm9230_vm3, %v1401_v27, %v7759_v47  ;;  %v9378_v27 = vld [vmem:[#allocation23_spill] sm:$0xff] }
 0x1e0   :  { %vm7917_vm7 = vcmp.le.f32.partialorder %v9372_v60, 0.7853982  ;;  %v3281_v50 = vsel %vm3274_vm6, %v3277_v13, %v3280_v38  ;;  %vm9231_vm14 = vweird.f32 %v9346_v17  ;;  %vm3377_vm9 = vcmp.lt.s32.totalorder %v7792_v58, 2 }
 0x1e1   :  { %v365_v23 = vsel %vm7917_vm7, %v6663_v35, %v7288_v61  ;;  %v1297_v36 = vxor.u32 2147483648, %v1296_v31  ;;  %vm3175_vm12 = vcmp.eq.s32.totalorder %v7889_v29, 2  ;;  %v3384_v22 = vsel %vm3377_vm9, %v3380_v11, %v3383_v4 }
 0x1e2   :  { %v236_v61 = vshll.u32 %v7923_v53, 30  ;;  %v7946_v43 = vand.u32 3, %v7913_v54  ;;  %vm3172_vm10 = vcmp.eq.s32.totalorder %v7889_v29, 0  ;;  %vm175_vm5 = vcmp.lt.s32.totalorder %v9348_v24, 0 }
 0x1e3   :  { %v366_v47 = vsel %vm7917_vm7, 0, %v364_v33  ;;  %6267 = vcosq.f32 %v365_v23  ;;  %v9375_v16 = vand.u32 2147483647, %v9328_v1  ;;  %v467_v7 = vsub.s32 4, %v9378_v27 }
 0x1e4   :  { %vm1516_vm11 = vcmp.lt.s32.totalorder %v7921_v56, 2  ;;  %vm3171_vm8 = vcmp.lt.s32.totalorder %v7889_v29, 2  ;;  %vm9252_vm13 = vcmask 261120   ;;  %v7961_v12 = vsub.s32 %v233_v63, %v236_v61  ;;  %v7967_v38 = vpop.eup %6259 }
 0x1e5   :  { %vm7954_vm6 = vcmp.le.f32.partialorder %v9375_v16, 0.7853982  ;;  %6269 = vsinq.f32 %v365_v23  ;;  %9379 = vst [vmem:[#allocation9_spill] sm:$0xff] %v7967_v38  ;;  %vm1513_vm15 = vweird.f32 %v6615_v45  ;;  %vm1517_vm7 = vcmp.eq.s32.totalorder %v7921_v56, 0  ;;  %v7976_v8 = vpop.eup %6261 }
 0x1e6   :  { %v469_v13 = vsel %vm7954_vm6, %v9328_v1, %v7696_v34  ;;  %vm1520_vm9 = vcmp.eq.s32.totalorder %v7921_v56, 2  ;;  %v3282_v11 = vsel %vm9232_vm0, nan, %v3281_v50  ;;  %v3385_v63 = vsel %vm9231_vm14, nan, %v3384_v22  ;;  %9380 = vst [vmem:[#allocation17_spill] sm:$0xff] %v7976_v8 }
 0x1e7   :  { %v7980_v4 = vsel %vm9233_vm1, %v1297_v36, %v1296_v31  ;;  %v9381_v34 = vand.u32 2147483647, %v9348_v24  ;;  %v7990_v62 = vadd.s32 %v7846_v42, %v7843_v28  ;;  %v239_v33 = vsub.s32 0, %v7961_v12  ;;  %v6264_v36 = vpop.eup %6263 }
 0x1e8   :  { %v370_v23 = vadd.s32 3, %v366_v47  ;;  %v7994_v50 = vand.u32 3, %v366_v47  ;;  %v468_v31 = vsel %vm383_vm4, %v467_v7, %v9378_v27  ;;  %6271 = vcosq.f32 %v469_v13  ;;  %v6266_v28 = vpop.eup %6265 }
 0x1e9   :  { %vm7984_vm3 = vcmp.le.f32.partialorder %v9381_v34, 0.7853982  ;;  %v5580_v22 = vmin.u32 %v239_v33, %v7961_v12  ;;  %v259_v61 = vsub.s32 4, %v7923_v53  ;;  %vm3481_vm0 = vcmp.eq.s32.totalorder %v7946_v43, 0 }
 0x1ea   :  { %6273 = vsinq.f32 %v469_v13  ;;  %v1521_v42 = vxor.u32 2147483648, %v6264_v36  ;;  %vm3484_vm1 = vcmp.eq.s32.totalorder %v7946_v43, 2  ;;  %v1518_v34 = vxor.u32 2147483648, %v6266_v28 }
 0x1eb   :  { %v241_v2 = vclz %v5580_v22  ;;  %vm9246_vm4 = vweird.f32 %v9364_v30  ;;  %v8006_v27 = vand.u32 3, %v370_v23  ;;  %v8010_v7 = vsel %vm7954_vm6, 0, %v468_v31  ;;  %v9388_v23 = vld [vmem:[#allocation16_spill] sm:$0xff] }
 0x1ec   :  { %v1522_v13 = vsel %vm1520_vm9, %v1521_v42, %v6266_v28  ;;  %v3177_v33 = vsel %vm3175_vm12, %v1521_v42, %v6266_v28  ;;  %vm2042_vm14 = vcmp.eq.s32.totalorder %v7994_v50, 2  ;;  %v9385_v5 = vand.u32 2147483647, %v9384_v19 }
 0x1ed   :  { %v571_v59 = vsub.s32 4, %v9388_v23  ;;  %v1519_v58 = vsel %vm1517_vm7, %v6264_v36, %v1518_v34  ;;  %v3174_v31 = vsel %vm3172_vm10, %v6264_v36, %v1518_v34  ;;  %v5581_v47 = vadd.s32 4294967294, %v241_v2  ;;  %v8032_v42 = vpop.eup %6267  ;;  %v9392_v34 = vld [vmem:[#allocation35_spill] sm:$0xff] }
 0x1ee   :  { %vm8019_vm2 = vcmp.le.f32.partialorder %v9385_v5, 0.7853982  ;;  %v260_v28 = vsel %vm175_vm5, %v259_v61, %v7923_v53  ;;  %vm2039_vm12 = vcmp.eq.s32.totalorder %v7994_v50, 0  ;;  %v1523_v5 = vsel %vm1516_vm11, %v1519_v58, %v1522_v13 }
 0x1ef   :  { %v3178_v16 = vsel %vm3171_vm8, %v3174_v31, %v3177_v33  ;;  %v9389_v17 = vxor.u32 2147483648, %v7976_v8  ;;  %v9390_v36 = vxor.u32 2147483648, %v7967_v38  ;;  %v8048_v61 = vpop.eup %6269  ;;  %v8052_v56 = vsel %vm1513_vm15, nan, %v1523_v5 }
 0x1f0   :  { %9391 = vst [vmem:[#allocation22_spill] sm:$0xff] %v8052_v56  ;;  %v3179_v29 = vsel %vm1513_vm15, nan, %v3178_v16  ;;  %vm5582_vm10 = vcmp.lt.s32.totalorder %v5581_v47, 0  ;;  %v262_v33 = vsel %vm7984_vm3, 0, %v260_v28  ;;  %v8064_v58 = vand.u32 3, %v8010_v7 }
 0x1f1   :  { %v3483_v2 = vsel %vm3481_vm0, %v7967_v38, %v9389_v17  ;;  %v3486_v53 = vsel %vm3484_vm1, %v9390_v36, %v7976_v8  ;;  %v573_v17 = vsel %vm8019_vm2, %v9384_v19, %v9392_v34  ;;  %5898 = vmatprep.mubr.msk.f32.mxu1 %vm9252_vm13, %v3179_v29  ;;  %v244_v13 = vsel %vm5582_vm10, 0, %v5581_v47 }
 0x1f2   :  { %vm9393_vm1 = vcmp.lt.s32.totalorder %v9384_v19, 0  ;;  %5899 = vmatmul.mubr.msk.f32.vlgmr.msra.gmra.mrb[0].mxu1 %vm9252_vm13, %v3282_v11  ;;  %v245_v16 = vsub.s32 32, %v244_v13  ;;  %v249_v31 = vsub.s32 4294967266, %v244_v13  ;;  %vm9394_vm0 = vcmp.lt.s32.totalorder %v7946_v43, 2  ;;  %v8074_v47 = vpop.eup %6271 }
 0x1f3   :  { %v572_v45 = vsel %vm9393_vm1, %v571_v59, %v9388_v23  ;;  %v3487_v5 = vsel %vm9394_vm0, %v3483_v2, %v3486_v53  ;;  %v377_v36 = vxor.u32 2147483648, %v8032_v42  ;;  %vm2038_vm6 = vcmp.lt.s32.totalorder %v7994_v50, 2  ;;  %5901 = vmatprep.mubr.msk.f32.mxu1 %vm9252_vm13, %v3385_v63  ;;  %6055 = vmatpush3.bf16.msra.mxu1 %v7536_v18  ;;  %v8089_v63 = vld [vmem:[%s9140_s1] sm:$0xff] }
 0x1f4   :  { %vm373_vm11 = vcmp.eq.s32.totalorder %v8006_v27, 0  ;;  %v374_v59 = vxor.u32 2147483648, %v8048_v61  ;;  %vm376_vm8 = vcmp.eq.s32.totalorder %v8006_v27, 2  ;;  %6275 = vcosq.f32 %v573_v17  ;;  %v8081_v11 = vpop.eup %6273  ;;  %6057 = vmatprep.subr.bf16.mxu1 %v7741_v40  ;;  %9395 = vst [vmem:[#allocation19_spill] sm:$0xff] %v8089_v63 }
 0x1f5   :  { %v246_v43 = vshll.u32 %v7961_v12, %v244_v13  ;;  %v247_v23 = vshrl.u32 %v7990_v62, %v245_v16  ;;  %v250_v28 = vadd.s32 127, %v249_v31  ;;  %6277 = vsinq.f32 %v573_v17  ;;  %v8123_v31 = vld [vmem:[%s9140_s1 + $0x8] sm:$0xff] }
 0x1f6   :  { %v266_v2 = vadd.s32 3, %v262_v33  ;;  %v8091_v53 = vand.u32 3, %v262_v33  ;;  %v3488_v29 = vsel %vm9246_vm4, nan, %v3487_v5  ;;  %vm9251_vm15 = vweird.f32 %v6663_v35  ;;  %9399 = vst [vmem:[#allocation18_spill] sm:$0xff] %v8123_v31 }
 0x1f7   :  { %vm372_vm7 = vcmp.lt.s32.totalorder %v8006_v27, 2  ;;  %v8099_v12 = vsel %vm8019_vm2, 0, %v572_v45  ;;  %v248_v62 = vor.u32 %v247_v23, %v246_v43  ;;  %v251_v34 = vshll.u32 %v250_v28, 23  ;;  %5902 = vmatmul.mubr.msk.f32.gmra.mrb[2].mxu1 %vm9252_vm13, %v3488_v29  ;;  %v9400_v23 = vld [vmem:[#allocation30_spill] sm:$0xff]  ;;  %v9404_v45 = vld [vmem:[#allocation27_spill] sm:$0xff] }
 0x1f8   :  { %v2044_v17 = vsel %vm2042_vm14, %v377_v36, %v8048_v61  ;;  %vm2141_vm9 = vcmp.lt.s32.totalorder %v8064_v58, 2  ;;  %v9396_v13 = vand.u32 2147483647, %v9335_v32  ;;  %v2041_v22 = vsel %vm2039_vm12, %v8032_v42, %v374_v59  ;;  %6059 = vmatpush3.bf16.msra.mxu1 %v7741_v40  ;;  %5944 = vmatprep.mubr.msk.f32.mxu1 %vm9252_vm13, %v8089_v63 }
 0x1f9   :  { %v252_v43 = vor.u32 4788187, %v251_v34  ;;  %v675_v28 = vsub.s32 4, %v9400_v23  ;;  %v9401_v29 = vand.u32 2147483647, %v9330_v3  ;;  %6061 = vmatprep.subr.bf16.mxu1 %v7536_v18  ;;  %v378_v16 = vsel %vm376_vm8, %v377_v36, %v8048_v61 }
 0x1fa   :  { %vm8108_vm10 = vcmp.le.f32.partialorder %v9396_v13, 0.7853982  ;;  %v779_v63 = vsub.s32 4, %v9404_v45  ;;  %v255_v30 = vcvt.s32.f32 %v248_v62  ;;  %vm9250_vm14 = vweird.f32 %v9328_v1 }
 0x1fb   :  { %v677_v5 = vsel %vm8108_vm10, %v9335_v32, %v7719_v20  ;;  %vm8132_vm2 = vcmp.le.f32.partialorder %v9401_v29, 0.7853982  ;;  %v253_v34 = vand.u32 2147483647, %v252_v43  ;;  %v375_v29 = vsel %vm373_vm11, %v8032_v42, %v374_v59  ;;  %5945 = vmatmul.mubr.msk.f32.vlgmr.msra.gmra.mrb[4].mxu1 %vm9252_vm13, %v8123_v31 }
 0x1fc   :  { %6279 = vcosq.f32 %v677_v5  ;;  %v781_v20 = vsel %vm8132_vm2, %v9330_v3, %v7701_v57  ;;  %v2045_v61 = vsel %vm2038_vm6, %v2041_v22, %v2044_v17  ;;  %vm2142_vm12 = vcmp.eq.s32.totalorder %v8064_v58, 0  ;;  %6063 = vmatpush3.bf16.msra.mxu1 %v7536_v18 }
 0x1fd   :  { %6281 = vsinq.f32 %v677_v5  ;;  %vm2145_vm1 = vcmp.eq.s32.totalorder %v8064_v58, 2  ;;  %v256_v57 = vmul.f32 %v255_v30, %v253_v34  ;;  %v9405_v36 = vxor.u32 2147483648, %v8081_v11  ;;  %6065 = vmatprep.subr.bf16.mxu1 %v7741_v40 }
 0x1fe   :  { %6283 = vcosq.f32 %v781_v20  ;;  %v9406_v59 = vxor.u32 2147483648, %v8074_v47  ;;  %vm9407_vm0 = vcmp.lt.s32.totalorder %v9335_v32, 0  ;;  %v8166_v17 = vpop.eup %6275  ;;  %v8168_v22 = vand.u32 3, %v266_v2 }
 0x1ff   :  { %6285 = vsinq.f32 %v781_v20  ;;  %v2144_v42 = vsel %vm2142_vm12, %v8074_v47, %v9405_v36  ;;  %v676_v50 = vsel %vm9407_vm0, %v675_v28, %v9400_v23  ;;  %vm9408_vm6 = vcmp.lt.s32.totalorder %v9330_v3, 0  ;;  %v9412_v20 = vld [vmem:[#allocation33_spill] sm:$0xff]  ;;  %v8180_v36 = vpop.eup %6277 }
 0x200   :  { %v2147_v62 = vsel %vm2145_vm1, %v9406_v59, %v8081_v11  ;;  %v780_v30 = vsel %vm9408_vm6, %v779_v63, %v9404_v45  ;;  %v9409_v5 = vand.u32 2147483647, %v9337_v52  ;;  %v883_v34 = vsub.s32 4, %v9412_v20  ;;  %6067 = vmatpush3.bf16.msra.mxu1 %v7741_v40 }
 0x201   :  { %v257_v23 = vxor.u32 2147483648, %v256_v57  ;;  %v8184_v28 = vsel %vm372_vm7, %v375_v29, %v378_v16  ;;  %v8188_v2 = vsel %vm9251_vm15, nan, %v2045_v61  ;;  %v2148_v45 = vsel %vm2141_vm9, %v2144_v42, %v2147_v62  ;;  %6069 = vmatprep.subr.bf16.mxu1 %v7536_v18  ;;  %v9417_v42 = vld [vmem:[#allocation32_spill] sm:$0xff] }
 0x202   :  { %vm8175_vm11 = vcmp.le.f32.partialorder %v9409_v5, 0.7853982  ;;  %v2243_v59 = vand.u32 3, %v8099_v12  ;;  %v8199_v5 = vsel %vm8108_vm10, 0, %v676_v50  ;;  %v9242_v16 = vxor.u32 2147483648, %v8166_v17 }
 0x203   :  { %v885_v63 = vsel %vm8175_vm11, %v9337_v52, %v7735_v37  ;;  %v258_v27 = vsel %vm175_vm5, %v257_v23, %v256_v57  ;;  %v8207_v37 = vsel %vm8132_vm2, 0, %v780_v30  ;;  %v9243_v33 = vxor.u32 2147483648, %v8180_v36 }
 0x204   :  { %6287 = vcosq.f32 %v885_v63  ;;  %v261_v58 = vsel %vm7984_vm3, %v9348_v24, %v258_v27  ;;  %vm9413_vm8 = vcmp.lt.s32.totalorder %v9337_v52, 0  ;;  %v9414_v61 = vand.u32 2147483647, %v9336_v25 }
 0x205   :  { %6289 = vsinq.f32 %v885_v63  ;;  %v884_v29 = vsel %vm9413_vm8, %v883_v34, %v9412_v20  ;;  %vm577_vm7 = vweird.f32 %v9384_v19  ;;  %v2346_v60 = vand.u32 3, %v8199_v5  ;;  %v9471_v19 = vld [vmem:[#allocation20_spill] sm:$0xff] }
 0x206   :  { %vm8219_vm5 = vcmp.le.f32.partialorder %v9414_v61, 0.7853982  ;;  %v8223_v13 = vpop.eup %6279  ;;  %6291 = vcosq.f32 %v261_v58  ;;  %v987_v62 = vsub.s32 4, %v9417_v42  ;;  %v8236_v20 = vsel %vm9250_vm14, nan, %v2148_v45 }
 0x207   :  { %v989_v50 = vsel %vm8219_vm5, %v9336_v25, %v7723_v15  ;;  %v8232_v30 = vpop.eup %6281  ;;  %6293 = vsinq.f32 %v261_v58  ;;  %vm2248_vm3 = vcmp.eq.s32.totalorder %v2243_v59, 2  ;;  %v8239_v34 = vand.u32 3, %v8207_v37 }
 0x208   :  { %v8241_v23 = vpop.eup %6283  ;;  %vm2244_vm9 = vcmp.lt.s32.totalorder %v2243_v59, 2  ;;  %vm2245_vm10 = vcmp.eq.s32.totalorder %v2243_v59, 0  ;;  %v2250_v63 = vsel %vm2248_vm3, %v9242_v16, %v8180_v36  ;;  %v8248_v15 = vsel %vm8175_vm11, 0, %v884_v29  ;;  %v9419_v16 = vld [vmem:[#allocation36_spill] sm:$0xff] }
 0x209   :  { %v8250_v27 = vpop.eup %6285  ;;  %v2247_v45 = vsel %vm2245_vm10, %v8166_v17, %v9243_v33  ;;  %6295 = vcosq.f32 %v989_v50  ;;  %vm1939_vm2 = vcmp.eq.s32.totalorder %v8091_v53, 2  ;;  %vm9271_vm12 = vweird.f32 %v9335_v32 }
 0x20a   :  { %vm2347_vm1 = vcmp.lt.s32.totalorder %v2346_v60, 2  ;;  %vm2348_vm0 = vcmp.eq.s32.totalorder %v2346_v60, 0  ;;  %vm9418_vm6 = vcmp.lt.s32.totalorder %v9336_v25, 0  ;;  %6297 = vsinq.f32 %v989_v50 }
 0x20b   :  { %v988_v43 = vsel %vm9418_vm6, %v987_v62, %v9417_v42  ;;  %vm1936_vm11 = vcmp.eq.s32.totalorder %v8091_v53, 0  ;;  %vm2351_vm8 = vcmp.eq.s32.totalorder %v2346_v60, 2  ;;  %vm2450_vm3 = vcmp.lt.s32.totalorder %v8239_v34, 2 }
 0x20c   :  { %v8265_v29 = vand.u32 3, %v8248_v15  ;;  %v1091_v33 = vsub.s32 4, %v9419_v16  ;;  %vm1935_vm10 = vcmp.lt.s32.totalorder %v8091_v53, 2  ;;  %v2251_v61 = vsel %vm2244_vm9, %v2247_v45, %v2250_v63 }
 0x20d   :  { %v9258_v58 = vxor.u32 2147483648, %v8250_v27  ;;  %v9420_v42 = vand.u32 2147483647, %v7261_v10  ;;  %vm265_vm4 = vweird.f32 %v9348_v24  ;;  %v9423_v18 = vxor.u32 2147483648, %v8232_v30 }
 0x20e   :  { %v8278_v50 = vpop.eup %6287  ;;  %v9424_v59 = vxor.u32 2147483648, %v8223_v13  ;;  %v8290_v45 = vsel %vm8219_vm5, 0, %v988_v43  ;;  %vm2451_vm14 = vcmp.eq.s32.totalorder %v8239_v34, 0  ;;  %v8305_v57 = vsel %vm577_vm7, nan, %v2251_v61 }
 0x20f   :  { %vm8274_vm6 = vcmp.le.f32.partialorder %v9420_v42, 0.7853982  ;;  %v2350_v31 = vsel %vm2348_vm0, %v8223_v13, %v9423_v18  ;;  %v8296_v40 = vpop.eup %6289  ;;  %vm2454_vm0 = vcmp.eq.s32.totalorder %v8239_v34, 2  ;;  %vm2553_vm5 = vcmp.lt.s32.totalorder %v8265_v29, 2  ;;  %v1837_v34 = vld [vmem:[%s9139_s2] sm:$0xff] }
 0x210   :  { %v2353_v63 = vsel %vm2351_vm8, %v9424_v59, %v8232_v30  ;;  %v1093_v42 = vsel %vm8274_vm6, %v7261_v10, %v7747_v41  ;;  %vm9425_vm8 = vcmp.lt.s32.totalorder %v7261_v10, 0  ;;  %vm2554_vm15 = vcmp.eq.s32.totalorder %v8265_v29, 0  ;;  %v6292_v41 = vpop.eup %6291 }
 0x211   :  { %v1092_v18 = vsel %vm9425_vm8, %v1091_v33, %v9419_v16  ;;  %6299 = vcosq.f32 %v1093_v42  ;;  %vm269_vm13 = vcmp.eq.s32.totalorder %v8168_v22, 0  ;;  %vm272_vm9 = vcmp.eq.s32.totalorder %v8168_v22, 2  ;;  %v6294_v48 = vpop.eup %6293 }
 0x212   :  { %6301 = vsinq.f32 %v1093_v42  ;;  %v2354_v43 = vsel %vm2347_vm1, %v2350_v31, %v2353_v63  ;;  %v2453_v16 = vsel %vm2451_vm14, %v8241_v23, %v9258_v58  ;;  %v9426_v33 = vxor.u32 2147483648, %v8241_v23  ;;  %v9430_v58 = vld [vmem:[#allocation34_spill] sm:$0xff] }
 0x213   :  { %v8319_v59 = vand.u32 3, %v8290_v45  ;;  %v273_v42 = vxor.u32 2147483648, %v6292_v41  ;;  %v8325_v31 = vsel %vm8274_vm6, 0, %v1092_v18  ;;  %v270_v60 = vxor.u32 2147483648, %v6294_v48  ;;  %v8335_v26 = vpop.eup %6295 }
 0x214   :  { %v2456_v61 = vsel %vm2454_vm0, %v9426_v33, %v8250_v27  ;;  %vm2557_vm14 = vcmp.eq.s32.totalorder %v8265_v29, 2  ;;  %v9427_v63 = vand.u32 2147483647, %v7239_v49  ;;  %v1195_v56 = vsub.s32 4, %v9430_v58  ;;  %v8347_v38 = vpop.eup %6297 }
 0x215   :  { %v1941_v8 = vsel %vm1939_vm2, %v273_v42, %v6294_v48  ;;  %v2355_v62 = vsel %vm9271_vm12, nan, %v2354_v43  ;;  %v2457_v18 = vsel %vm2450_vm3, %v2453_v16, %v2456_v61  ;;  %v1938_v55 = vsel %vm1936_vm11, %v6292_v41, %v270_v60 }
 0x216   :  { %vm8330_vm1 = vcmp.le.f32.partialorder %v9427_v63, 0.7853982  ;;  %vm2657_vm6 = vcmp.eq.s32.totalorder %v8319_v59, 0  ;;  %vm2660_vm2 = vcmp.eq.s32.totalorder %v8319_v59, 2  ;;  %v8354_v46 = vand.u32 3, %v8325_v31 }
 0x217   :  { %v1197_v63 = vsel %vm8330_vm1, %v7239_v49, %v7739_v44  ;;  %v1838_v44 = vld [vmem:[%s9139_s2 + $0x8] sm:$0xff]  ;;  %vm268_vm3 = vcmp.lt.s32.totalorder %v8168_v22, 2  ;;  %v1942_v43 = vsel %vm1935_vm10, %v1938_v55, %v1941_v8  ;;  %vm889_vm11 = vweird.f32 %v9337_v52  ;;  %v9477_v52 = vld [vmem:[#allocation12_spill] sm:$0xff] }
 0x218   :  { %v9431_v16 = vxor.u32 2147483648, %v8296_v40  ;;  %v9432_v0 = vxor.u32 2147483648, %v8278_v50  ;;  %vm2656_vm0 = vcmp.lt.s32.totalorder %v8319_v59, 2  ;;  %6303 = vcosq.f32 %v1197_v63 }
 0x219   :  { %v1943_v55 = vsel %vm265_vm4, nan, %v1942_v43  ;;  %vm9433_vm10 = vweird.f32 %v9330_v3  ;;  %vm9434_vm8 = vcmp.lt.s32.totalorder %v7239_v49, 0  ;;  %6305 = vsinq.f32 %v1197_v63 }
 0x21a   :  { %v2556_v61 = vsel %vm2554_vm15, %v8278_v50, %v9431_v16  ;;  %v2559_v54 = vsel %vm2557_vm14, %v9432_v0, %v8296_v40  ;;  %v2458_v8 = vsel %vm9433_vm10, nan, %v2457_v18  ;;  %v1196_v53 = vsel %vm9434_vm8, %v1195_v56, %v9430_v58 }
 0x21b   :  { %vm9435_vm15 = vcmask 261120   ;;  %v998_v16 = vxor.u32 2147483648, %v8347_v38  ;;  %v1001_v0 = vxor.u32 2147483648, %v8335_v26  ;;  %v6044_v14 = vpack.c.bf16 %v1838_v44, %v1837_v34  ;;  %v8393_v43 = vpop.eup %6299  ;;  %v9446_v44 = vld [vmem:[#allocation38_spill] sm:$0xff] }
 0x21c   :  { %5880 = vmatprep.mubr.msk.f32.mxu0 %vm9435_vm15, %v1943_v55  ;;  %v9436_v21 = vand.u32 2147483647, %v7453_v39  ;;  %vm9439_vm10 = vmmov %vm9435_vm15  ;;  %v2560_v56 = vsel %vm2553_vm5, %v2556_v61, %v2559_v54  ;;  %vm993_vm8 = vweird.f32 %v9336_v25  ;;  %vm2760_vm15 = vcmp.eq.s32.totalorder %v8354_v46, 0  ;;  %v8406_v18 = vpop.eup %6301 }
 0x21d   :  { %5881 = vmatmul.mubr.msk.f32.vlgmr.msra.gmra.mrb[0].mxu0 %vm9439_vm10, %v8188_v2  ;;  %v1299_v58 = vsub.s32 4, %v7649_v9  ;;  %v271_v63 = vsel %vm269_vm13, %v6292_v41, %v270_v60  ;;  %v274_v2 = vsel %vm272_vm9, %v273_v42, %v6294_v48  ;;  %vm9440_vm5 = vmmov %vm9439_vm10  ;;  %vm1097_vm10 = vweird.f32 %v7261_v10  ;;  %6045 = vmatprep.subr.bf16.mxu0 %v6044_v14  ;;  %v1840_v41 = vld [vmem:[%s9139_s2 + $0x18] sm:$0xff] }
 0x21e   :  { %vm8389_vm14 = vcmp.le.f32.partialorder %v9436_v21, 0.7853982  ;;  %5883 = vmatprep.mubr.msk.f32.mxu0 %vm9440_vm5, %v8236_v20  ;;  %v9272_v54 = vxor.u32 2147483648, %v8393_v43  ;;  %vm2763_vm12 = vcmp.eq.s32.totalorder %v8354_v46, 2  ;;  %v8420_v29 = vsel %vm8330_vm1, 0, %v1196_v53  ;;  %6047 = vmatpush3.bf16.msra.mxu0 %v6044_v14  ;;  %v1839_v20 = vld [vmem:[%s9139_s2 + $0x10] sm:$0xff]  ;;  %vm9445_vm1 = vmmov %vm9440_vm5 }
 0x21f   :  { %v1301_v21 = vsel %vm8389_vm14, %v7453_v39, %v7980_v4  ;;  %v1102_v4 = vxor.u32 2147483648, %v8406_v18  ;;  %vm9441_vm13 = vcmp.lt.s32.totalorder %v7453_v39, 0  ;;  %v2659_v42 = vsel %vm2657_vm6, %v8335_v26, %v998_v16 }
 0x220   :  { %v1300_v48 = vsel %vm9441_vm13, %v1299_v58, %v7649_v9  ;;  %6307 = vcosq.f32 %v1301_v21  ;;  %v2662_v9 = vsel %vm2660_vm2, %v1001_v0, %v8347_v38  ;;  %v9442_v14 = vand.u32 2147483647, %v7324_v6  ;;  %vm9447_vm2 = vmmov %vm9445_vm1 }
 0x221   :  { %6309 = vsinq.f32 %v1301_v21  ;;  %5884 = vmatmul.mubr.msk.f32.gmra.mrb[2].mxu0 %vm9445_vm1, %v8305_v57  ;;  %v2762_v33 = vsel %vm2760_vm15, %v8393_v43, %v1102_v4  ;;  %v2765_v34 = vsel %vm2763_vm12, %v9272_v54, %v8406_v18  ;;  %vm1201_vm6 = vweird.f32 %v7239_v49 }
 0x222   :  { %vm8443_vm9 = vcmp.le.f32.partialorder %v9442_v14, 0.7853982  ;;  %v1403_v61 = vsub.s32 4, %v9446_v44  ;;  %5886 = vmatprep.mubr.msk.f32.mxu0 %vm9447_vm2, %v2355_v62  ;;  %v2861_v57 = vand.u32 3, %v8420_v29  ;;  %v8467_v53 = vsel %vm8389_vm14, 0, %v1300_v48 }
 0x223   :  { %v1405_v55 = vsel %vm8443_vm9, %v7324_v6, %v7937_v51  ;;  %v6048_v58 = vpack.c.bf16 %v1840_v41, %v1839_v20  ;;  %v275_v21 = vsel %vm268_vm3, %v271_v63, %v274_v2  ;;  %v2561_v14 = vsel %vm889_vm11, nan, %v2560_v56  ;;  %v8476_v51 = vpop.eup %6303  ;;  %vm9449_vm3 = vmmov %vm9445_vm1 }
 0x224   :  { %6311 = vcosq.f32 %v1405_v55  ;;  %v2663_v54 = vsel %vm2656_vm0, %v2659_v42, %v2662_v9  ;;  %vm2759_vm12 = vcmp.lt.s32.totalorder %v8354_v46, 2  ;;  %vm9448_vm14 = vcmp.lt.s32.totalorder %v7324_v6, 0  ;;  %v8482_v63 = vpop.eup %6305  ;;  %vm9450_vm0 = vmmov %vm9445_vm1 }
 0x225   :  { %v2766_v62 = vsel %vm2759_vm12, %v2762_v33, %v2765_v34  ;;  %v1404_v32 = vsel %vm9448_vm14, %v1403_v61, %v9446_v44  ;;  %6313 = vsinq.f32 %v1405_v55  ;;  %6049 = vmatprep.subr.bf16.mxu0 %v6048_v58  ;;  %v474_v22 = vadd.s32 3, %v8010_v7  ;;  %5887 = vmatmul.mubr.msk.f32.gmra.mrb[4].mxu0 %vm9449_vm3, %v2458_v8  ;;  %vm9451_vm13 = vmmov %vm9450_vm0 }
 0x226   :  { %v1209_v59 = vxor.u32 2147483648, %v8476_v51  ;;  %v2964_v56 = vand.u32 3, %v8467_v53  ;;  %v8489_v46 = vsel %vm8443_vm9, 0, %v1404_v32  ;;  %v578_v2 = vadd.s32 3, %v8099_v12  ;;  %5889 = vmatprep.mubr.msk.f32.mxu0 %vm9450_vm0, %v2561_v14  ;;  %6051 = vmatpush3.bf16.msra.mxu0 %v6048_v58  ;;  %vm9452_vm2 = vmmov %vm9450_vm0 }
 0x227   :  { %v8494_v48 = vsel %vm265_vm4, nan, %v275_v21  ;;  %v2664_v7 = vsel %vm993_vm8, nan, %v2663_v54  ;;  %v1206_v8 = vxor.u32 2147483648, %v8482_v63  ;;  %vm2866_vm15 = vcmp.eq.s32.totalorder %v2861_v57, 2 }
 0x228   :  { %v2767_v20 = vsel %vm1097_vm10, nan, %v2766_v62  ;;  %vm2863_vm5 = vcmp.eq.s32.totalorder %v2861_v57, 0  ;;  %v2868_v12 = vsel %vm2866_vm15, %v1209_v59, %v8482_v63  ;;  %v682_v24 = vadd.s32 3, %v8199_v5 }
 0x229   :  { %vm2862_vm4 = vcmp.lt.s32.totalorder %v2861_v57, 2  ;;  %v2865_v41 = vsel %vm2863_vm5, %v8476_v51, %v1206_v8  ;;  %v3067_v54 = vand.u32 3, %v8489_v46  ;;  %v475_v42 = vand.u32 3, %v474_v22  ;;  %5890 = vmatmul.mubr.msk.f32.gmra.mrb[6].mxu0 %vm9451_vm13, %v2664_v7  ;;  %vm9453_vm5 = vmmov %vm9452_vm2 }
 0x22a   :  { %v8510_v9 = vpop.eup %6307  ;;  %v2869_v60 = vsel %vm2862_vm4, %v2865_v41, %v2868_v12  ;;  %vm1305_vm9 = vweird.f32 %v7453_v39  ;;  %vm2965_vm1 = vcmp.lt.s32.totalorder %v2964_v56, 2  ;;  %v579_v33 = vand.u32 3, %v578_v2  ;;  %5892 = vmatprep.mubr.msk.f32.mxu0 %vm9452_vm2, %v2767_v20  ;;  %v9489_v39 = vld [vmem:[#allocation7_spill] sm:$0xff] }
 0x22b   :  { %v8514_v34 = vpop.eup %6309  ;;  %v2870_v5 = vsel %vm1201_vm6, nan, %v2869_v60  ;;  %v1313_v44 = vxor.u32 2147483648, %v8510_v9  ;;  %vm2966_vm12 = vcmp.eq.s32.totalorder %v2964_v56, 0  ;;  %vm2969_vm14 = vcmp.eq.s32.totalorder %v2964_v56, 2 }
 0x22c   :  { %v1310_v61 = vxor.u32 2147483648, %v8514_v34  ;;  %v8521_v55 = vand.u32 3, %v682_v24  ;;  %v786_v57 = vadd.s32 3, %v8207_v37  ;;  %v890_v58 = vadd.s32 3, %v8248_v15 }
 0x22d   :  { %v2971_v14 = vsel %vm2969_vm14, %v1313_v44, %v8514_v34  ;;  %vm3072_vm3 = vcmp.eq.s32.totalorder %v3067_v54, 2  ;;  %vm477_vm0 = vcmp.eq.s32.totalorder %v475_v42, 0  ;;  %vm480_vm15 = vcmp.eq.s32.totalorder %v475_v42, 2  ;;  %5893 = vmatmul.mubr.msk.f32.gmra.mrb[8].mxu0 %vm9453_vm5, %v2870_v5 }
 0x22e   :  { %v8525_v21 = vpop.eup %6311  ;;  %v2968_v62 = vsel %vm2966_vm12, %v8510_v9, %v1310_v61  ;;  %v9454_v37 = vxor.u32 2147483648, %v8081_v11  ;;  %vm581_vm4 = vcmp.eq.s32.totalorder %v579_v33, 0  ;;  %v9455_v7 = vxor.u32 2147483648, %v8074_v47 }
 0x22f   :  { %v1417_v32 = vxor.u32 2147483648, %v8525_v21  ;;  %v8538_v22 = vpop.eup %6313  ;;  %v2972_v2 = vsel %vm2965_vm1, %v2968_v62, %v2971_v14  ;;  %v9456_v12 = vxor.u32 2147483648, %v8180_v36  ;;  %vm584_vm13 = vcmp.eq.s32.totalorder %v579_v33, 2  ;;  %vm9458_vm1 = vmmov %vm9452_vm2 }
 0x230   :  { %v479_v15 = vsel %vm477_vm0, %v8074_v47, %v9454_v37  ;;  %v482_v20 = vsel %vm480_vm15, %v9455_v7, %v8081_v11  ;;  %v2973_v41 = vsel %vm1305_vm9, nan, %v2972_v2  ;;  %v1414_v60 = vxor.u32 2147483648, %v8538_v22 }
 0x231   :  { %v583_v24 = vsel %vm581_vm4, %v8166_v17, %v9456_v12  ;;  %v3074_v5 = vsel %vm3072_vm3, %v1417_v32, %v8538_v22  ;;  %v9457_v56 = vxor.u32 2147483648, %v8166_v17  ;;  %5895 = vmatprep.mubr.msk.f32.mxu0 %vm9458_vm1, %v2973_v41  ;;  %vm1409_vm2 = vweird.f32 %v7324_v6  ;;  %vm9459_vm4 = vmmov %vm9458_vm1 }
 0x232   :  { %vm3069_vm12 = vcmp.eq.s32.totalorder %v3067_v54, 0  ;;  %vm476_vm14 = vcmp.lt.s32.totalorder %v475_v42, 2  ;;  %v787_v47 = vand.u32 3, %v786_v57  ;;  %vm3068_vm0 = vcmp.lt.s32.totalorder %v3067_v54, 2 }
 0x233   :  { %v586_v14 = vsel %vm584_vm13, %v9457_v56, %v8180_v36  ;;  %v3071_v11 = vsel %vm3069_vm12, %v8525_v21, %v1414_v60  ;;  %v483_v62 = vsel %vm476_vm14, %v479_v15, %v482_v20  ;;  %vm580_vm15 = vcmp.lt.s32.totalorder %v579_v33, 2  ;;  %vm9462_vm12 = vmmov %vm9459_vm4 }
 0x234   :  { %v3075_v37 = vsel %vm3068_vm0, %v3071_v11, %v3074_v5  ;;  %v587_v2 = vsel %vm580_vm15, %v583_v24, %v586_v14  ;;  %vm685_vm3 = vcmp.eq.s32.totalorder %v8521_v55, 0  ;;  %v891_v17 = vand.u32 3, %v890_v58 }
 0x235   :  { %v3076_v36 = vsel %vm1409_vm2, nan, %v3075_v37  ;;  %vm688_vm5 = vcmp.eq.s32.totalorder %v8521_v55, 2  ;;  %v994_v42 = vadd.s32 3, %v8290_v45  ;;  %v1098_v54 = vadd.s32 3, %v8325_v31 }
 0x236   :  { %5896 = vmatmul.mubr.msk.f32.gmra.mrb[10].mxu0 %vm9459_vm4, %v3076_v36  ;;  %v9460_v57 = vxor.u32 2147483648, %v8232_v30  ;;  %v9461_v15 = vxor.u32 2147483648, %v8223_v13  ;;  %vm789_vm13 = vcmp.eq.s32.totalorder %v787_v47, 0  ;;  %vm792_vm1 = vcmp.eq.s32.totalorder %v787_v47, 2 }
 0x237   :  { %5912 = vmatprep.mubr.msk.f32.mxu0 %vm9462_vm12, %v8494_v48  ;;  %v9463_v58 = vxor.u32 2147483648, %v8250_v27  ;;  %v9464_v31 = vxor.u32 2147483648, %v8241_v23  ;;  %vm893_vm14 = vcmp.eq.s32.totalorder %v891_v17, 0  ;;  %vm896_vm0 = vcmp.eq.s32.totalorder %v891_v17, 2 }
 0x238   :  { %v687_v33 = vsel %vm685_vm3, %v8223_v13, %v9460_v57  ;;  %v690_v7 = vsel %vm688_vm5, %v9461_v15, %v8232_v30  ;;  %v9465_v12 = vxor.u32 2147483648, %v8296_v40  ;;  %v9466_v30 = vxor.u32 2147483648, %v8278_v50  ;;  %vm9469_vm5 = vmmov %vm9459_vm4 }
 0x239   :  { %v791_v45 = vsel %vm789_vm13, %v8241_v23, %v9463_v58  ;;  %v794_v20 = vsel %vm792_vm1, %v9464_v31, %v8250_v27  ;;  %v995_v41 = vand.u32 3, %v994_v42  ;;  %v1202_v48 = vadd.s32 3, %v8420_v29  ;;  %vm9470_vm12 = vmmov %vm9469_vm5  ;;  %v9481_v42 = vld [vmem:[#allocation31_spill] sm:$0xff] }
 0x23a   :  { %v895_v13 = vsel %vm893_vm14, %v8278_v50, %v9465_v12  ;;  %v898_v24 = vsel %vm896_vm0, %v9466_v30, %v8296_v40  ;;  %vm9467_vm15 = vweird.f32 %v6663_v35  ;;  %vm9468_vm3 = vweird.f32 %v9328_v1  ;;  %v9491_v58 = vld [vmem:[#allocation11_spill] sm:$0xff]  ;;  %v9494_v30 = vld [vmem:[#allocation22_spill] sm:$0xff] }
 0x23b   :  { %v380_v5 = vsel %vm9467_vm15, nan, %v8184_v28  ;;  %v484_v23 = vsel %vm9468_vm3, nan, %v483_v62  ;;  %v1099_v27 = vand.u32 3, %v1098_v54  ;;  %vm684_vm4 = vcmp.lt.s32.totalorder %v8521_v55, 2 }
 0x23c   :  { %5913 = vmatmul.mubr.msk.f32.vlgmr.msra.gmra.mrb[0].mxu0 %vm9469_vm5, %v380_v5  ;;  %vm788_vm13 = vcmp.lt.s32.totalorder %v787_v47, 2  ;;  %vm892_vm1 = vcmp.lt.s32.totalorder %v891_v17, 2  ;;  %v1306_v50 = vadd.s32 3, %v8467_v53  ;;  %v588_v40 = vsel %vm577_vm7, nan, %v587_v2  ;;  %v9479_v2 = vld [vmem:[#allocation13_spill] sm:$0xff] }
 0x23d   :  { %5915 = vmatprep.mubr.msk.f32.mxu0 %vm9470_vm12, %v484_v23  ;;  %v691_v29 = vsel %vm684_vm4, %v687_v33, %v690_v7  ;;  %v795_v35 = vsel %vm788_vm13, %v791_v45, %v794_v20  ;;  %v899_v28 = vsel %vm892_vm1, %v895_v13, %v898_v24  ;;  %vm997_vm14 = vcmp.eq.s32.totalorder %v995_v41, 0  ;;  %vm9474_vm4 = vmmov %vm9469_vm5  ;;  %v9497_v5 = vld [vmem:[#allocation9_spill] sm:$0xff] }
 0x23e   :  { %vm1000_vm0 = vcmp.eq.s32.totalorder %v995_v41, 2  ;;  %v1203_v1 = vand.u32 3, %v1202_v48  ;;  %v1410_v56 = vadd.s32 3, %v8489_v46  ;;  %v999_v55 = vsel %vm997_vm14, %v8335_v26, %v998_v16 }
 0x23f   :  { %v1002_v53 = vsel %vm1000_vm0, %v1001_v0, %v8347_v38  ;;  %vm1101_vm15 = vcmp.eq.s32.totalorder %v1099_v27, 0  ;;  %vm1104_vm3 = vcmp.eq.s32.totalorder %v1099_v27, 2  ;;  %vm9472_vm7 = vweird.f32 %v9471_v19 }
 0x240   :  { %5916 = vmatmul.mubr.msk.f32.gmra.mrb[2].mxu0 %vm9469_vm5, %v588_v40  ;;  %v692_v14 = vsel %vm9472_vm7, nan, %v691_v29  ;;  %v1103_v47 = vsel %vm1101_vm15, %v8393_v43, %v1102_v4  ;;  %v9473_v46 = vxor.u32 2147483648, %v8393_v43  ;;  %v1307_v16 = vand.u32 3, %v1306_v50  ;;  %vm9476_vm15 = vmmov %vm9474_vm4  ;;  %v9499_v50 = vld [vmem:[#allocation6_spill] sm:$0xff]  ;;  %v9502_v29 = vld [vmem:[#allocation4_spill] sm:$0xff] }
 0x241   :  { %5918 = vmatprep.mubr.msk.f32.mxu0 %vm9474_vm4, %v692_v14  ;;  %vm9475_vm13 = vweird.f32 %v9330_v3  ;;  %vm996_vm1 = vcmp.lt.s32.totalorder %v995_v41, 2  ;;  %v900_v38 = vsel %vm889_vm11, nan, %v899_v28  ;;  %vm1100_vm12 = vcmp.lt.s32.totalorder %v1099_v27, 2  ;;  %vm9478_vm11 = vmmov %vm9474_vm4  ;;  %v9495_v41 = vld [vmem:[#allocation17_spill] sm:$0xff] }
 0x242   :  { %v1106_v11 = vsel %vm1104_vm3, %v9473_v46, %v8406_v18  ;;  %v796_v26 = vsel %vm9475_vm13, nan, %v795_v35  ;;  %v1003_v0 = vsel %vm996_vm1, %v999_v55, %v1002_v53  ;;  %vm1205_vm14 = vcmp.eq.s32.totalorder %v1203_v1, 0  ;;  %vm9480_vm1 = vmmov %vm9478_vm11 }
 0x243   :  { %v1107_v62 = vsel %vm1100_vm12, %v1103_v47, %v1106_v11  ;;  %v1207_v4 = vsel %vm1205_vm14, %v8476_v51, %v1206_v8  ;;  %vm1208_vm0 = vcmp.eq.s32.totalorder %v1203_v1, 2  ;;  %v1411_v43 = vand.u32 3, %v1410_v56  ;;  %vm9482_vm14 = vmmov %vm9480_vm1  ;;  %v8691_v47 = vld [vmem:[%s9138_s4 + $0x2] ss:$0 sm:$0xff] }
 0x244   :  { %5919 = vmatmul.mubr.msk.f32.gmra.mrb[4].mxu0 %vm9476_vm15, %v796_v26  ;;  %v1210_v3 = vsel %vm1208_vm0, %v1209_v59, %v8482_v63  ;;  %vm1309_vm3 = vcmp.eq.s32.totalorder %v1307_v16, 0  ;;  %vm1312_vm5 = vcmp.eq.s32.totalorder %v1307_v16, 2  ;;  %v1618_v18 = vadd.s32 3, %v9477_v52 }
 0x245   :  { %5921 = vmatprep.mubr.msk.f32.mxu0 %vm9478_vm11, %v900_v38  ;;  %v1311_v37 = vsel %vm1309_vm3, %v8510_v9, %v1310_v61  ;;  %v1314_v8 = vsel %vm1312_vm5, %v1313_v44, %v8514_v34  ;;  %v1722_v17 = vadd.s32 3, %v9479_v2  ;;  %v1004_v51 = vsel %vm993_vm8, nan, %v1003_v0  ;;  %vm9484_vm3 = vmmov %vm9480_vm1 }
 0x246   :  { %vm1204_vm7 = vcmp.lt.s32.totalorder %v1203_v1, 2  ;;  %v1108_v63 = vsel %vm1097_vm10, nan, %v1107_v62  ;;  %vm1308_vm4 = vcmp.lt.s32.totalorder %v1307_v16, 2  ;;  %vm1413_vm13 = vcmp.eq.s32.totalorder %v1411_v43, 0  ;;  %vm9483_vm10 = vmmov %vm9480_vm1  ;;  %v9505_v1 = vld [vmem:[#allocation5_spill] sm:$0xff] }
 0x247   :  { %v1211_v59 = vsel %vm1204_vm7, %v1207_v4, %v1210_v3  ;;  %v1315_v36 = vsel %vm1308_vm4, %v1311_v37, %v1314_v8  ;;  %vm1416_vm12 = vcmp.eq.s32.totalorder %v1411_v43, 2  ;;  %v1619_v61 = vand.u32 3, %v1618_v18  ;;  %vm9493_vm11 = vmmov %vm9480_vm1  ;;  %v8712_v37 = vld [vmem:[%s9138_s4] ss:$0 sm:$0xff]  ;;  %v3888_v8 = vpop.permute.xlu1 %3887 }
 0x248   :  { %5922 = vmatmul.mubr.msk.f32.gmra.mrb[6].mxu0 %vm9480_vm1, %v1004_v51  ;;  %v1826_v9 = vadd.s32 3, %v9481_v42  ;;  %v1415_v25 = vsel %vm1413_vm13, %v8525_v21, %v1414_v60  ;;  %v1418_v10 = vsel %vm1416_vm12, %v1417_v32, %v8538_v22  ;;  %v1723_v34 = vand.u32 3, %v1722_v17  ;;  %v9485_v60 = vld [vmem:[#allocation26_spill] sm:$0xff]  ;;  %v9487_v21 = vld [vmem:[#allocation25_spill] sm:$0xff]  ;;  %v3883_v17 = vpop.permute.xlu0 %3882 }
 0x249   :  { %5924 = vmatprep.mubr.msk.f32.mxu0 %vm9482_vm14, %v1108_v63  ;;  %v1212_v44 = vsel %vm1201_vm6, nan, %v1211_v59  ;;  %v1316_v54 = vsel %vm1305_vm9, nan, %v1315_v36  ;;  %vm1412_vm8 = vcmp.lt.s32.totalorder %v1411_v43, 2  ;;  %vm1621_vm0 = vcmp.eq.s32.totalorder %v1619_v61, 0  ;;  %vm9501_vm14 = vmmov %vm9480_vm1 }
 0x24a   :  { %v1419_v57 = vsel %vm1412_vm8, %v1415_v25, %v1418_v10  ;;  %vm1624_vm15 = vcmp.eq.s32.totalorder %v1619_v61, 2  ;;  %v1827_v33 = vand.u32 3, %v1826_v9  ;;  %v9486_v15 = vxor.u32 2147483648, %v9485_v60  ;;  %v8727_v9 = vld [vmem:[%s9138_s4 + $0x1] ss:$0 sm:$0xff]  ;;  %s6450_s4 = smov 32  }
 0x24b   :  { %v9488_v49 = vxor.u32 2147483648, %v9487_v21  ;;  %vm1725_vm6 = vcmp.eq.s32.totalorder %v1723_v34, 0  ;;  %vm1728_vm5 = vcmp.eq.s32.totalorder %v1723_v34, 2  ;;  %v9490_v7 = vxor.u32 2147483648, %v9489_v39 }
 0x24c   :  { %5925 = vmatmul.mubr.msk.f32.gmra.mrb[8].mxu0 %vm9483_vm10, %v1212_v44  ;;  %v1623_v32 = vsel %vm1621_vm0, %v9487_v21, %v9486_v15  ;;  %v9492_v31 = vxor.u32 2147483648, %v9491_v58  ;;  %v1420_v12 = vsel %vm1409_vm2, nan, %v1419_v57  ;;  %vm1620_vm9 = vcmp.lt.s32.totalorder %v1619_v61, 2  ;;  %vm9504_vm10 = vmmov %vm9480_vm1 }
 0x24d   :  { %5927 = vmatprep.mubr.msk.f32.mxu0 %vm9484_vm3, %v1316_v54  ;;  %v1626_v22 = vsel %vm1624_vm15, %v9488_v49, %v9485_v60  ;;  %v1727_v45 = vsel %vm1725_vm6, %v9491_v58, %v9490_v7  ;;  %vm1724_vm7 = vcmp.lt.s32.totalorder %v1723_v34, 2  ;;  %vm1829_vm4 = vcmp.eq.s32.totalorder %v1827_v33, 0  ;;  %vm9507_vm15 = vmmov %vm9480_vm1 }
 0x24e   :  { %v1730_v20 = vsel %vm1728_vm5, %v9492_v31, %v9489_v39  ;;  %v1627_v13 = vsel %vm1620_vm9, %v1623_v32, %v1626_v22  ;;  %vm1832_vm13 = vcmp.eq.s32.totalorder %v1827_v33, 2  ;;  %v9496_v48 = vxor.u32 2147483648, %v9495_v41  ;;  %vm9510_vm3 = vmmov %vm9480_vm1 }
 0x24f   :  { %v1731_v24 = vsel %vm1724_vm7, %v1727_v45, %v1730_v20  ;;  %v9498_v27 = vxor.u32 2147483648, %v9497_v5  ;;  %vm9500_vm2 = vweird.f32 %v9499_v50  ;;  %vm1828_vm12 = vcmp.lt.s32.totalorder %v1827_v33, 2  ;;  %vm9511_vm6 = vmmov %vm9480_vm1 }
 0x250   :  { %5928 = vmatmul.mubr.msk.f32.gmra.mrb[10].mxu0 %vm9493_vm11, %v1420_v12  ;;  %v1831_v23 = vsel %vm1829_vm4, %v9497_v5, %v9496_v48  ;;  %v1628_v40 = vsel %vm9500_vm2, nan, %v1627_v13  ;;  %vm9503_vm8 = vweird.f32 %v9502_v29  ;;  %vm9506_vm0 = vweird.f32 %v9505_v1  ;;  %v9508_v5 = vld [vmem:[#allocation19_spill] sm:$0xff]  ;;  %vm9514_vm5 = vmmov %vm9480_vm1 }
 0x251   :  { %5930 = vmatprep.mubr.msk.f32.mxu0 %vm9480_vm1, %v9494_v30  ;;  %v1834_v6 = vsel %vm1832_vm13, %v9498_v27, %v9495_v41  ;;  %v1732_v35 = vsel %vm9503_vm8, nan, %v1731_v24  ;;  %v3965_v63 = vmul.f32 %v8712_v37, %v3888_v8  ;;  %v3964_v59 = vmul.f32 %v8712_v37, %v3883_v17  ;;  %v6429_v8 = vld [vmem:[%s9137_s0 + $0x18] sm:$0xff]  ;;  %vm9515_vm9 = vmmov %vm9480_vm1 }
 0x252   :  { %v1835_v28 = vsel %vm1828_vm12, %v1831_v23, %v1834_v6  ;;  %v9509_v23 = vld [vmem:[#allocation18_spill] sm:$0xff]  ;;  %vm9516_vm11 = vmmov %vm9480_vm1 }
 0x253   :  { %v1836_v56 = vsel %vm9506_vm0, nan, %v1835_v28  ;;  %vm9517_vm7 = vmmov %vm9480_vm1 }
 0x254   :  { %5931 = vmatmul.mubr.msk.f32.gmra.mrb[12].mxu0 %vm9501_vm14, %v1628_v40  ;;  %vm9518_vm4 = vmmov %vm9480_vm1 }
 0x255   :  { %5933 = vmatprep.mubr.msk.f32.mxu0 %vm9504_vm10, %v1732_v35  ;;  %vm9519_vm13 = vmmov %vm9480_vm1 }
 0x256   :  { %vm9520_vm2 = vmmov %vm9480_vm1 }
 0x257   :  { %vm9521_vm12 = vmmov %vm9480_vm1 }
 0x258   :  { %5934 = vmatmul.mubr.msk.f32.gmra.mrb[14].mxu0 %vm9507_vm15, %v1836_v56  ;;  %vm9522_vm14 = vmmov %vm9480_vm1 }
 0x259   :  { %vm9523_vm8 = vmmov %vm9480_vm1 }
 0x25a   :  { %vm9524_vm10 = vmmov %vm9480_vm1 }
 0x25b   :  { %vm9525_vm0 = vmmov %vm9480_vm1 }
 0x25c   :  { %vm9526_vm15 = vmmov %vm9525_vm0 }
 0x2c5   :  { %v5900_v55 = vpop.f32.mrb[0].mxu1 }
 0x2c6   :  { %v3668_v53 = vpop.f32.mrb[1].mxu1 }
 0x2ca   :  { %v5903_v19 = vpop.f32.mrb[2].mxu1 }
 0x2cb   :  { %v3678_v14 = vpop.f32.mrb[3].mxu1 }
 0x2ce   :  { %v5946_v46 = vpop.f32.mrb[4].mxu1 }
 0x2cf   :  { %v4124_v11 = vadd.f32 %v5946_v46, %v8691_v47  ;;  %v4118_v16 = vpop.f32.mrb[5].mxu1 }
 0x2d0   :  { %v4119_v26 = vadd.f32 %v8691_v47, %v4118_v16 }
 0x2d1   :  { %4145 = vrot.lane.b32.xlu1 %v4124_v11, %s6449_s8 }
 0x2d2   :  { %4143 = vrot.lane.b32.xlu0 %v4119_v26, %s6449_s8 }
 0x30f   :  { %v5914_v38 = vpop.f32.mrb[0].mxu0 }
 0x310   :  { %v3801_v0 = vpop.f32.mrb[1].mxu0  ;;  %v3981_v61 = vadd.f32 %v5914_v38, %v3965_v63 }
 0x311   :  { %v3980_v25 = vadd.f32 %v3964_v59, %v3801_v0  ;;  %v6428_v0 = vld [vmem:[%s9137_s0 + $0x10] sm:$0xff]  ;;  %v9512_v59 = vld [vmem:[#allocation37_spill] sm:$0xff] }
 0x312   :  { %v4001_v34 = vadd.f32 %v8727_v9, %v3981_v61  ;;  %v9513_v61 = vld [vmem:[#allocation15_spill] sm:$0xff] }
 0x313   :  { %v8697_v62 = vpop.f32.mrb[2].mxu0  ;;  %v4000_v57 = vadd.f32 %v8727_v9, %v3980_v25 }
 0x314   :  { %v8699_v4 = vpop.f32.mrb[3].mxu0  ;;  %v4128_v15 = vadd.f32 %v4124_v11, %v4001_v34 }
 0x315   :  { %v4127_v49 = vadd.f32 %v4119_v26, %v4000_v57 }
 0x316   :  { %v5745_v39 = vmul.f32 -1.442695, %v4128_v15 }
 0x317   :  { %v8701_v43 = vpop.f32.mrb[4].mxu0  ;;  %v5744_v7 = vmul.f32 -1.442695, %v4127_v49 }
 0x318   :  { %v8703_v3 = vpop.f32.mrb[5].mxu0  ;;  %6315 = vpow2.f32 %v5745_v39 }
 0x319   :  { %6317 = vpow2.f32 %v5744_v7 }
 0x31b   :  { %v8705_v52 = vpop.f32.mrb[6].mxu0 }
 0x31c   :  { %v8707_v18 = vpop.f32.mrb[7].mxu0 }
 0x31f   :  { %v8714_v2 = vpop.f32.mrb[8].mxu0 }
 0x320   :  { %v8716_v51 = vpop.f32.mrb[9].mxu0 }
 0x322   :  { %v6316_v58 = vpop.eup %6315 }
 0x323   :  { %v8720_v36 = vpop.f32.mrb[10].mxu0  ;;  %v6318_v45 = vpop.eup %6317  ;;  %v4136_v31 = vadd.f32 1.0, %v6316_v58 }
 0x324   :  { %v8722_v42 = vpop.f32.mrb[11].mxu0  ;;  %v4135_v20 = vadd.f32 1.0, %v6318_v45 }
 0x325   :  { %6319 = vrcp.f32 %v4136_v31 }
 0x326   :  { %6321 = vrcp.f32 %v4135_v20 }
 0x327   :  { %v5932_v10 = vpop.f32.mrb[12].mxu0 }
 0x328   :  { %v8730_v44 = vadd.f32 %v5932_v10, %v5900_v55  ;;  %v3861_v54 = vpop.f32.mrb[13].mxu0 }
 0x329   :  { %v8733_v33 = vadd.f32 %v3861_v54, %v3668_v53 }
 0x32b   :  { %v5935_v60 = vpop.f32.mrb[14].mxu0 }
 0x32c   :  { %v8735_v21 = vadd.f32 %v5935_v60, %v5903_v19  ;;  %v3871_v32 = vpop.f32.mrb[15].mxu0 }
 0x32d   :  { %v8737_v22 = vadd.f32 %v3871_v32, %v3678_v14 }
 0x32f   :  { %v6320_v12 = vpop.eup %6319 }
 0x330   :  { %v6322_v30 = vpop.eup %6321  ;;  %v4164_v46 = vsub.f32 1.0, %v6320_v12 }
 0x331   :  { %v4163_v1 = vsub.f32 1.0, %v6322_v30 }
 0x343   :  { %v4146_v13 = vpop.permute.xlu1 %4145 }
 0x344   :  { %v4150_v24 = vmul.f32 %v6320_v12, %v4146_v13  ;;  %v4144_v41 = vpop.permute.xlu0 %4143 }
 0x345   :  { %v4149_v48 = vmul.f32 %v6322_v30, %v4144_v41 }
 0x346   :  { %4155 = vrot.lane.b32.xlu1 %v4150_v24, %s6449_s8 }
 0x347   :  { %4153 = vrot.lane.b32.xlu0 %v4149_v48, %s6449_s8 }
 0x34a   :  { %4175 = vrot.lane.b32.xlu1 %v9508_v5, %s6450_s4 }
 0x34e   :  { %4177 = vrot.lane.b32.xlu1 %v9509_v23, %s6450_s4 }
 0x3b8   :  { %v4156_v27 = vpop.permute.xlu1 %4155 }
 0x3b9   :  { %v4154_v6 = vpop.permute.xlu0 %4153  ;;  %v4160_v40 = vadd.f32 %v4156_v27, %v4001_v34 }
 0x3ba   :  { %v4159_v50 = vadd.f32 %v4154_v6, %v4000_v57 }
 0x3bc   :  { %6323 = vtanh.f32 %v4159_v50  ;;  %v4176_v28 = vpop.permute.xlu1 %4175 }
 0x3bd   :  { %6325 = vtanh.f32 %v4160_v40  ;;  %v4181_v55 = vmul.f32 %v6322_v30, %v4176_v28 }
 0x3c0   :  { %v4178_v19 = vpop.permute.xlu1 %4177 }
 0x3c1   :  { %v4182_v16 = vmul.f32 %v6320_v12, %v4178_v19 }
 0x3c6   :  { %v6324_v29 = vpop.eup %6323 }
 0x3c7   :  { %4167 = vrot.lane.b32.xlu0 %v6324_v29, %s6451_s13  ;;  %v6326_v35 = vpop.eup %6325 }
 0x3cb   :  { %4169 = vrot.lane.b32.xlu0 %v6326_v35, %s6451_s13 }
 0x439   :  { %v4168_v56 = vpop.permute.xlu0 %4167 }
 0x43a   :  { %v4173_v53 = vmul.f32 %v4168_v56, %v4163_v1 }
 0x43c   :  { %v8747_v14 = vadd.f32 %v4181_v55, %v4173_v53 }
 0x43d   :  { %v4170_v11 = vpop.permute.xlu0 %4169 }
 0x43e   :  { %v4174_v26 = vmul.f32 %v4170_v11, %v4164_v46  ;;  %4209 = vrot.lane.b32.xlu0 %v8747_v14, %s6451_s13 }
 0x440   :  { %v8751_v38 = vadd.f32 %v4182_v16, %v4174_v26 }
 0x442   :  { %3892 = vperm.xlu0 %6213, %v6428_v0   ;;  %4211 = vrot.lane.b32.xlu1 %v8751_v38, %s6451_s13 }
 0x446   :  { %3897 = vperm.xlu1 %6214, %v6429_v8   ;;  %v6430_v8 = vld [vmem:[%s9137_s0 + $0x28] sm:$0xff] }
 0x4b0   :  { %v4210_v17 = vpop.permute.xlu0 %4209 }
 0x4b1   :  { %5955 = vmatprep.mubr.msk.f32.mxu1 %vm9510_vm3, %v4210_v17  ;;  %v6431_v17 = vld [vmem:[%s9137_s0 + $0x20] sm:$0xff]  ;;  %vm9527_vm3 = vmmov %vm9525_vm0 }
 0x4b4   :  { %v4212_v63 = vpop.permute.xlu1 %4211 }
 0x4b5   :  { %5956 = vmatmul.mubr.msk.f32.vlgmr.msra.gmra.mrb[6].mxu1 %vm9511_vm6, %v4212_v63  ;;  %vm9528_vm6 = vmmov %vm9525_vm0 }
 0x4b6   :  { %6071 = vmatpush3.bf16.msra.mxu1 %v9512_v59 }
 0x4b7   :  { %6073 = vmatprep.subr.bf16.mxu1 %v9513_v61 }
 0x4ba   :  { %6075 = vmatpush3.bf16.msra.mxu1 %v9513_v61 }
 0x4bb   :  { %6077 = vmatprep.subr.bf16.mxu1 %v9512_v59 }
 0x4c1   :  { %v3893_v60 = vpop.permute.xlu0 %3892 }
 0x4c2   :  { %v3966_v32 = vmul.f32 %v8712_v37, %v3893_v60 }
 0x4c4   :  { %v3982_v39 = vadd.f32 %v3966_v32, %v8699_v4 }
 0x4c5   :  { %v3898_v57 = vpop.permute.xlu1 %3897 }
 0x4c6   :  { %v3967_v15 = vmul.f32 %v8712_v37, %v3898_v57  ;;  %v4002_v58 = vadd.f32 %v8727_v9, %v3982_v39 }
 0x4c8   :  { %v3983_v49 = vadd.f32 %v8697_v62, %v3967_v15 }
 0x4ca   :  { %v4003_v7 = vadd.f32 %v8727_v9, %v3983_v49 }
 0x588   :  { %v5957_v25 = vpop.f32.mrb[6].mxu1 }
 0x589   :  { %v4289_v10 = vadd.f32 %v5957_v25, %v8691_v47  ;;  %v4283_v34 = vpop.f32.mrb[7].mxu1 }
 0x58a   :  { %v4284_v54 = vadd.f32 %v8691_v47, %v4283_v34 }
 0x58b   :  { %4310 = vrot.lane.b32.xlu1 %v4289_v10, %s6449_s8  ;;  %v4293_v45 = vadd.f32 %v4289_v10, %v4003_v7 }
 0x58c   :  { %4308 = vrot.lane.b32.xlu0 %v4284_v54, %s6449_s8  ;;  %v4292_v31 = vadd.f32 %v4284_v54, %v4002_v58 }
 0x58d   :  { %v5749_v20 = vmul.f32 -1.442695, %v4293_v45 }
 0x58e   :  { %v5748_v12 = vmul.f32 -1.442695, %v4292_v31 }
 0x58f   :  { %6327 = vpow2.f32 %v5749_v20 }
 0x590   :  { %6329 = vpow2.f32 %v5748_v12 }
 0x599   :  { %v6328_v13 = vpop.eup %6327 }
 0x59a   :  { %v6330_v30 = vpop.eup %6329  ;;  %v4301_v24 = vadd.f32 1.0, %v6328_v13 }
 0x59b   :  { %v4300_v41 = vadd.f32 1.0, %v6330_v30 }
 0x59c   :  { %6331 = vrcp.f32 %v4301_v24 }
 0x59d   :  { %6333 = vrcp.f32 %v4300_v41 }
 0x5a6   :  { %v6332_v48 = vpop.eup %6331 }
 0x5a7   :  { %v6334_v5 = vpop.eup %6333  ;;  %v4329_v1 = vsub.f32 1.0, %v6332_v48  ;;  %v4341_v53 = vmul.f32 %v6332_v48, %v8751_v38 }
 0x5a8   :  { %v4328_v55 = vsub.f32 1.0, %v6334_v5  ;;  %v4340_v11 = vmul.f32 %v6334_v5, %v8747_v14 }
 0x5fd   :  { %v4311_v62 = vpop.permute.xlu1 %4310 }
 0x5fe   :  { %v4315_v4 = vmul.f32 %v6332_v48, %v4311_v62  ;;  %v4309_v23 = vpop.permute.xlu0 %4308 }
 0x5ff   :  { %v4314_v27 = vmul.f32 %v6334_v5, %v4309_v23 }
 0x600   :  { %4320 = vrot.lane.b32.xlu1 %v4315_v4, %s6449_s8 }
 0x601   :  { %4318 = vrot.lane.b32.xlu0 %v4314_v27, %s6449_s8 }
 0x672   :  { %v4321_v6 = vpop.permute.xlu1 %4320 }
 0x673   :  { %v4325_v50 = vadd.f32 %v4321_v6, %v4003_v7  ;;  %v4319_v40 = vpop.permute.xlu0 %4318 }
 0x674   :  { %v4324_v29 = vadd.f32 %v4319_v40, %v4002_v58 }
 0x675   :  { %6335 = vtanh.f32 %v4325_v50 }
 0x676   :  { %6337 = vtanh.f32 %v4324_v29 }
 0x67f   :  { %v6336_v35 = vpop.eup %6335 }
 0x680   :  { %v6338_v28 = vpop.eup %6337  ;;  %4334 = vrot.lane.b32.xlu1 %v6336_v35, %s6451_s13 }
 0x681   :  { %4332 = vrot.lane.b32.xlu0 %v6338_v28, %s6451_s13 }
 0x6f2   :  { %v4335_v56 = vpop.permute.xlu1 %4334 }
 0x6f3   :  { %v4339_v19 = vmul.f32 %v4335_v56, %v4329_v1  ;;  %v4333_v46 = vpop.permute.xlu0 %4332 }
 0x6f4   :  { %v4338_v16 = vmul.f32 %v4333_v46, %v4328_v55 }
 0x6f5   :  { %v8783_v26 = vadd.f32 %v4341_v53, %v4339_v19 }
 0x6f6   :  { %v8785_v0 = vadd.f32 %v4340_v11, %v4338_v16 }
 0x6f7   :  { %4362 = vrot.lane.b32.xlu1 %v8783_v26, %s6451_s13 }
 0x6f8   :  { %4360 = vrot.lane.b32.xlu0 %v8785_v0, %s6451_s13 }
 0x6fb   :  { %3907 = vperm.xlu1 %6214, %v6430_v8  }
 0x6fc   :  { %3902 = vperm.xlu0 %6213, %v6431_v17   ;;  %v6432_v17 = vld [vmem:[%s9137_s0 + $0x38] sm:$0xff] }
 0x769   :  { %v4363_v25 = vpop.permute.xlu1 %4362 }
 0x76a   :  { %v4361_v63 = vpop.permute.xlu0 %4360 }
 0x76b   :  { %5966 = vmatprep.mubr.msk.f32.mxu1 %vm9514_vm5, %v4361_v63  ;;  %v6433_v63 = vld [vmem:[%s9137_s0 + $0x30] sm:$0xff]  ;;  %vm9529_vm5 = vmmov %vm9525_vm0 }
 0x76c   :  { %5967 = vmatmul.mubr.msk.f32.vlgmr.msra.gmra.mrb[8].mxu1 %vm9515_vm9, %v4363_v25  ;;  %vm9530_vm9 = vmmov %vm9525_vm0 }
 0x76d   :  { %6079 = vmatpush3.bf16.msra.mxu1 %v9512_v59 }
 0x76e   :  { %6081 = vmatprep.subr.bf16.mxu1 %v9513_v61 }
 0x771   :  { %6083 = vmatpush3.bf16.msra.mxu1 %v9513_v61 }
 0x772   :  { %6085 = vmatprep.subr.bf16.mxu1 %v9512_v59 }
 0x77a   :  { %v3908_v60 = vpop.permute.xlu1 %3907 }
 0x77b   :  { %v3903_v15 = vpop.permute.xlu0 %3902  ;;  %v3969_v32 = vmul.f32 %v8712_v37, %v3908_v60 }
 0x77c   :  { %v3968_v49 = vmul.f32 %v8712_v37, %v3903_v15 }
 0x77d   :  { %v3985_v39 = vadd.f32 %v8701_v43, %v3969_v32 }
 0x77e   :  { %v3984_v7 = vadd.f32 %v3968_v49, %v8703_v3 }
 0x77f   :  { %v4005_v58 = vadd.f32 %v8727_v9, %v3985_v39 }
 0x780   :  { %v4004_v45 = vadd.f32 %v8727_v9, %v3984_v7 }
 0x83f   :  { %v5968_v10 = vpop.f32.mrb[8].mxu1 }
 0x840   :  { %v4440_v34 = vadd.f32 %v5968_v10, %v8691_v47  ;;  %v4434_v54 = vpop.f32.mrb[9].mxu1 }
 0x841   :  { %v4435_v57 = vadd.f32 %v8691_v47, %v4434_v54 }
 0x842   :  { %4461 = vrot.lane.b32.xlu1 %v4440_v34, %s6449_s8  ;;  %v4444_v31 = vadd.f32 %v4440_v34, %v4005_v58 }
 0x843   :  { %4459 = vrot.lane.b32.xlu0 %v4435_v57, %s6449_s8  ;;  %v4443_v20 = vadd.f32 %v4435_v57, %v4004_v45 }
 0x844   :  { %v5753_v12 = vmul.f32 -1.442695, %v4444_v31 }
 0x845   :  { %v5752_v13 = vmul.f32 -1.442695, %v4443_v20 }
 0x846   :  { %6339 = vpow2.f32 %v5753_v12 }
 0x847   :  { %6341 = vpow2.f32 %v5752_v13 }
 0x850   :  { %v6340_v30 = vpop.eup %6339 }
 0x851   :  { %v6342_v24 = vpop.eup %6341  ;;  %v4452_v41 = vadd.f32 1.0, %v6340_v30 }
 0x852   :  { %v4451_v48 = vadd.f32 1.0, %v6342_v24 }
 0x853   :  { %6343 = vrcp.f32 %v4452_v41 }
 0x854   :  { %6345 = vrcp.f32 %v4451_v48 }
 0x85d   :  { %v6344_v62 = vpop.eup %6343 }
 0x85e   :  { %v6346_v5 = vpop.eup %6345  ;;  %v4480_v28 = vsub.f32 1.0, %v6344_v62  ;;  %v4492_v55 = vmul.f32 %v6344_v62, %v8783_v26 }
 0x85f   :  { %v4479_v56 = vsub.f32 1.0, %v6346_v5  ;;  %v4491_v46 = vmul.f32 %v6346_v5, %v8785_v0 }
 0x8b4   :  { %v4462_v43 = vpop.permute.xlu1 %4461 }
 0x8b5   :  { %v4466_v3 = vmul.f32 %v6344_v62, %v4462_v43  ;;  %v4460_v4 = vpop.permute.xlu0 %4459 }
 0x8b6   :  { %v4465_v23 = vmul.f32 %v6346_v5, %v4460_v4 }
 0x8b7   :  { %4471 = vrot.lane.b32.xlu1 %v4466_v3, %s6449_s8 }
 0x8b8   :  { %4469 = vrot.lane.b32.xlu0 %v4465_v23, %s6449_s8 }
 0x929   :  { %v4472_v27 = vpop.permute.xlu1 %4471 }
 0x92a   :  { %v4476_v6 = vadd.f32 %v4472_v27, %v4005_v58  ;;  %v4470_v50 = vpop.permute.xlu0 %4469 }
 0x92b   :  { %v4475_v40 = vadd.f32 %v4470_v50, %v4004_v45 }
 0x92c   :  { %6347 = vtanh.f32 %v4476_v6 }
 0x92d   :  { %6349 = vtanh.f32 %v4475_v40 }
 0x936   :  { %v6348_v29 = vpop.eup %6347 }
 0x937   :  { %v6350_v35 = vpop.eup %6349  ;;  %4485 = vrot.lane.b32.xlu1 %v6348_v29, %s6451_s13 }
 0x938   :  { %4483 = vrot.lane.b32.xlu0 %v6350_v35, %s6451_s13 }
 0x9a9   :  { %v4486_v1 = vpop.permute.xlu1 %4485 }
 0x9aa   :  { %v4490_v53 = vmul.f32 %v4486_v1, %v4480_v28  ;;  %v4484_v19 = vpop.permute.xlu0 %4483 }
 0x9ab   :  { %v4489_v11 = vmul.f32 %v4484_v19, %v4479_v56 }
 0x9ac   :  { %v8819_v16 = vadd.f32 %v4492_v55, %v4490_v53 }
 0x9ad   :  { %v8821_v8 = vadd.f32 %v4491_v46, %v4489_v11 }
 0x9ae   :  { %4513 = vrot.lane.b32.xlu1 %v8819_v16, %s6451_s13 }
 0x9af   :  { %4511 = vrot.lane.b32.xlu0 %v8821_v8, %s6451_s13 }
 0x9b2   :  { %3917 = vperm.xlu1 %6214, %v6432_v17  }
 0x9b3   :  { %3912 = vperm.xlu0 %6213, %v6433_v63   ;;  %v6434_v63 = vld [vmem:[%s9137_s0 + $0x48] sm:$0xff] }
 0xa20   :  { %v4514_v10 = vpop.permute.xlu1 %4513 }
 0xa21   :  { %v4512_v25 = vpop.permute.xlu0 %4511 }
 0xa22   :  { %5977 = vmatprep.mubr.msk.f32.mxu1 %vm9516_vm11, %v4512_v25  ;;  %v6435_v25 = vld [vmem:[%s9137_s0 + $0x40] sm:$0xff]  ;;  %vm9531_vm11 = vmmov %vm9525_vm0 }
 0xa23   :  { %5978 = vmatmul.mubr.msk.f32.vlgmr.msra.gmra.mrb[10].mxu1 %vm9517_vm7, %v4514_v10  ;;  %vm9532_vm7 = vmmov %vm9525_vm0 }
 0xa24   :  { %6087 = vmatpush3.bf16.msra.mxu1 %v9512_v59 }
 0xa25   :  { %6089 = vmatprep.subr.bf16.mxu1 %v9513_v61 }
 0xa28   :  { %6091 = vmatpush3.bf16.msra.mxu1 %v9513_v61 }
 0xa29   :  { %6093 = vmatprep.subr.bf16.mxu1 %v9512_v59 }
 0xa31   :  { %v3918_v15 = vpop.permute.xlu1 %3917 }
 0xa32   :  { %v3913_v32 = vpop.permute.xlu0 %3912  ;;  %v3971_v49 = vmul.f32 %v8712_v37, %v3918_v15 }
 0xa33   :  { %v3970_v39 = vmul.f32 %v8712_v37, %v3913_v32 }
 0xa34   :  { %v3987_v7 = vadd.f32 %v8705_v52, %v3971_v49 }
 0xa35   :  { %v3986_v58 = vadd.f32 %v3970_v39, %v8707_v18 }
 0xa36   :  { %v4007_v45 = vadd.f32 %v8727_v9, %v3987_v7 }
 0xa37   :  { %v4006_v31 = vadd.f32 %v8727_v9, %v3986_v58 }
 0xaf6   :  { %v5979_v34 = vpop.f32.mrb[10].mxu1 }
 0xaf7   :  { %v4591_v54 = vadd.f32 %v5979_v34, %v8691_v47  ;;  %v4585_v57 = vpop.f32.mrb[11].mxu1 }
 0xaf8   :  { %v4586_v60 = vadd.f32 %v8691_v47, %v4585_v57 }
 0xaf9   :  { %4612 = vrot.lane.b32.xlu1 %v4591_v54, %s6449_s8  ;;  %v4595_v20 = vadd.f32 %v4591_v54, %v4007_v45 }
 0xafa   :  { %4610 = vrot.lane.b32.xlu0 %v4586_v60, %s6449_s8  ;;  %v4594_v12 = vadd.f32 %v4586_v60, %v4006_v31 }
 0xafb   :  { %v5757_v13 = vmul.f32 -1.442695, %v4595_v20 }
 0xafc   :  { %v5756_v30 = vmul.f32 -1.442695, %v4594_v12 }
 0xafd   :  { %6351 = vpow2.f32 %v5757_v13 }
 0xafe   :  { %6353 = vpow2.f32 %v5756_v30 }
 0xb07   :  { %v6352_v24 = vpop.eup %6351 }
 0xb08   :  { %v6354_v41 = vpop.eup %6353  ;;  %v4603_v48 = vadd.f32 1.0, %v6352_v24 }
 0xb09   :  { %v4602_v62 = vadd.f32 1.0, %v6354_v41 }
 0xb0a   :  { %6355 = vrcp.f32 %v4603_v48 }
 0xb0b   :  { %6357 = vrcp.f32 %v4602_v62 }
 0xb14   :  { %v6356_v43 = vpop.eup %6355 }
 0xb15   :  { %v6358_v5 = vpop.eup %6357  ;;  %v4631_v35 = vsub.f32 1.0, %v6356_v43  ;;  %v4643_v56 = vmul.f32 %v6356_v43, %v8819_v16 }
 0xb16   :  { %v4630_v1 = vsub.f32 1.0, %v6358_v5  ;;  %v4642_v19 = vmul.f32 %v6358_v5, %v8821_v8 }
 0xb6b   :  { %v4613_v52 = vpop.permute.xlu1 %4612 }
 0xb6c   :  { %v4617_v18 = vmul.f32 %v6356_v43, %v4613_v52  ;;  %v4611_v3 = vpop.permute.xlu0 %4610 }
 0xb6d   :  { %v4616_v4 = vmul.f32 %v6358_v5, %v4611_v3 }
 0xb6e   :  { %4622 = vrot.lane.b32.xlu1 %v4617_v18, %s6449_s8 }
 0xb6f   :  { %4620 = vrot.lane.b32.xlu0 %v4616_v4, %s6449_s8 }
 0xbe0   :  { %v4623_v23 = vpop.permute.xlu1 %4622 }
 0xbe1   :  { %v4627_v27 = vadd.f32 %v4623_v23, %v4007_v45  ;;  %v4621_v6 = vpop.permute.xlu0 %4620 }
 0xbe2   :  { %v4626_v50 = vadd.f32 %v4621_v6, %v4006_v31 }
 0xbe3   :  { %6359 = vtanh.f32 %v4627_v27 }
 0xbe4   :  { %6361 = vtanh.f32 %v4626_v50 }
 0xbed   :  { %v6360_v40 = vpop.eup %6359 }
 0xbee   :  { %v6362_v29 = vpop.eup %6361  ;;  %4636 = vrot.lane.b32.xlu1 %v6360_v40, %s6451_s13 }
 0xbef   :  { %4634 = vrot.lane.b32.xlu0 %v6362_v29, %s6451_s13 }
 0xc60   :  { %v4637_v28 = vpop.permute.xlu1 %4636 }
 0xc61   :  { %v4641_v55 = vmul.f32 %v4637_v28, %v4631_v35  ;;  %v4635_v53 = vpop.permute.xlu0 %4634 }
 0xc62   :  { %v4640_v46 = vmul.f32 %v4635_v53, %v4630_v1 }
 0xc63   :  { %v8855_v11 = vadd.f32 %v4643_v56, %v4641_v55 }
 0xc64   :  { %v8857_v17 = vadd.f32 %v4642_v19, %v4640_v46 }
 0xc65   :  { %4664 = vrot.lane.b32.xlu1 %v8855_v11, %s6451_s13 }
 0xc66   :  { %4662 = vrot.lane.b32.xlu0 %v8857_v17, %s6451_s13 }
 0xc69   :  { %3927 = vperm.xlu1 %6214, %v6434_v63  }
 0xc6a   :  { %3922 = vperm.xlu0 %6213, %v6435_v25   ;;  %v6436_v25 = vld [vmem:[%s9137_s0 + $0x58] sm:$0xff] }
 0xcd7   :  { %v4665_v34 = vpop.permute.xlu1 %4664 }
 0xcd8   :  { %v4663_v10 = vpop.permute.xlu0 %4662 }
 0xcd9   :  { %5988 = vmatprep.mubr.msk.f32.mxu1 %vm9518_vm4, %v4663_v10  ;;  %v6437_v10 = vld [vmem:[%s9137_s0 + $0x50] sm:$0xff]  ;;  %vm9533_vm4 = vmmov %vm9525_vm0 }
 0xcda   :  { %5989 = vmatmul.mubr.msk.f32.vlgmr.msra.gmra.mrb[12].mxu1 %vm9519_vm13, %v4665_v34  ;;  %vm9534_vm13 = vmmov %vm9525_vm0 }
 0xcdb   :  { %6095 = vmatpush3.bf16.msra.mxu1 %v9512_v59 }
 0xcdc   :  { %6097 = vmatprep.subr.bf16.mxu1 %v9513_v61 }
 0xcdf   :  { %6099 = vmatpush3.bf16.msra.mxu1 %v9513_v61 }
 0xce0   :  { %6101 = vmatprep.subr.bf16.mxu1 %v9512_v59 }
 0xce8   :  { %v3928_v32 = vpop.permute.xlu1 %3927 }
 0xce9   :  { %v3923_v49 = vpop.permute.xlu0 %3922  ;;  %v3973_v39 = vmul.f32 %v8712_v37, %v3928_v32 }
 0xcea   :  { %v3972_v7 = vmul.f32 %v8712_v37, %v3923_v49 }
 0xceb   :  { %v3989_v58 = vadd.f32 %v8714_v2, %v3973_v39 }
 0xcec   :  { %v3988_v45 = vadd.f32 %v3972_v7, %v8716_v51 }
 0xced   :  { %v4009_v31 = vadd.f32 %v8727_v9, %v3989_v58 }
 0xcee   :  { %v4008_v20 = vadd.f32 %v8727_v9, %v3988_v45 }
 0xdad   :  { %v5990_v54 = vpop.f32.mrb[12].mxu1 }
 0xdae   :  { %v4742_v57 = vadd.f32 %v5990_v54, %v8691_v47  ;;  %v4736_v60 = vpop.f32.mrb[13].mxu1 }
 0xdaf   :  { %v4737_v15 = vadd.f32 %v8691_v47, %v4736_v60 }
 0xdb0   :  { %4763 = vrot.lane.b32.xlu1 %v4742_v57, %s6449_s8  ;;  %v4746_v12 = vadd.f32 %v4742_v57, %v4009_v31 }
 0xdb1   :  { %4761 = vrot.lane.b32.xlu0 %v4737_v15, %s6449_s8  ;;  %v4745_v13 = vadd.f32 %v4737_v15, %v4008_v20 }
 0xdb2   :  { %v5761_v30 = vmul.f32 -1.442695, %v4746_v12 }
 0xdb3   :  { %v5760_v24 = vmul.f32 -1.442695, %v4745_v13 }
 0xdb4   :  { %6363 = vpow2.f32 %v5761_v30 }
 0xdb5   :  { %6365 = vpow2.f32 %v5760_v24 }
 0xdbe   :  { %v6364_v41 = vpop.eup %6363 }
 0xdbf   :  { %v6366_v48 = vpop.eup %6365  ;;  %v4754_v62 = vadd.f32 1.0, %v6364_v41 }
 0xdc0   :  { %v4753_v43 = vadd.f32 1.0, %v6366_v48 }
 0xdc1   :  { %6367 = vrcp.f32 %v4754_v62 }
 0xdc2   :  { %6369 = vrcp.f32 %v4753_v43 }
 0xdcb   :  { %v6368_v52 = vpop.eup %6367 }
 0xdcc   :  { %v6370_v5 = vpop.eup %6369  ;;  %v4782_v29 = vsub.f32 1.0, %v6368_v52  ;;  %v4794_v1 = vmul.f32 %v6368_v52, %v8855_v11 }
 0xdcd   :  { %v4781_v28 = vsub.f32 1.0, %v6370_v5  ;;  %v4793_v53 = vmul.f32 %v6370_v5, %v8857_v17 }
 0xe22   :  { %v4764_v2 = vpop.permute.xlu1 %4763 }
 0xe23   :  { %v4768_v51 = vmul.f32 %v6368_v52, %v4764_v2  ;;  %v4762_v18 = vpop.permute.xlu0 %4761 }
 0xe24   :  { %v4767_v3 = vmul.f32 %v6370_v5, %v4762_v18 }
 0xe25   :  { %4773 = vrot.lane.b32.xlu1 %v4768_v51, %s6449_s8 }
 0xe26   :  { %4771 = vrot.lane.b32.xlu0 %v4767_v3, %s6449_s8 }
 0xe97   :  { %v4774_v4 = vpop.permute.xlu1 %4773 }
 0xe98   :  { %v4778_v23 = vadd.f32 %v4774_v4, %v4009_v31  ;;  %v4772_v27 = vpop.permute.xlu0 %4771 }
 0xe99   :  { %v4777_v6 = vadd.f32 %v4772_v27, %v4008_v20 }
 0xe9a   :  { %6371 = vtanh.f32 %v4778_v23 }
 0xe9b   :  { %6373 = vtanh.f32 %v4777_v6 }
 0xea4   :  { %v6372_v50 = vpop.eup %6371 }
 0xea5   :  { %v6374_v40 = vpop.eup %6373  ;;  %4787 = vrot.lane.b32.xlu1 %v6372_v50, %s6451_s13 }
 0xea6   :  { %4785 = vrot.lane.b32.xlu0 %v6374_v40, %s6451_s13 }
 0xf17   :  { %v4788_v35 = vpop.permute.xlu1 %4787 }
 0xf18   :  { %v4792_v56 = vmul.f32 %v4788_v35, %v4782_v29  ;;  %v4786_v55 = vpop.permute.xlu0 %4785 }
 0xf19   :  { %v4791_v19 = vmul.f32 %v4786_v55, %v4781_v28 }
 0xf1a   :  { %v8891_v46 = vadd.f32 %v4794_v1, %v4792_v56 }
 0xf1b   :  { %v8893_v63 = vadd.f32 %v4793_v53, %v4791_v19 }
 0xf1c   :  { %4815 = vrot.lane.b32.xlu1 %v8891_v46, %s6451_s13 }
 0xf1d   :  { %4813 = vrot.lane.b32.xlu0 %v8893_v63, %s6451_s13 }
 0xf20   :  { %3937 = vperm.xlu1 %6214, %v6436_v25  }
 0xf21   :  { %3932 = vperm.xlu0 %6213, %v6437_v10   ;;  %v6438_v10 = vld [vmem:[%s9137_s0 + $0x68] sm:$0xff] }
 0xf8e   :  { %v4816_v54 = vpop.permute.xlu1 %4815 }
 0xf8f   :  { %v4814_v34 = vpop.permute.xlu0 %4813 }
 0xf90   :  { %5999 = vmatprep.mubr.msk.f32.mxu1 %vm9480_vm1, %v4814_v34  ;;  %v6439_v34 = vld [vmem:[%s9137_s0 + $0x60] sm:$0xff]  ;;  %vm9535_vm1 = vmmov %vm9525_vm0 }
 0xf91   :  { %6000 = vmatmul.mubr.msk.f32.vlgmr.msra.gmra.mrb[14].mxu1 %vm9520_vm2, %v4816_v54  ;;  %vm9536_vm2 = vmmov %vm9525_vm0 }
 0xf92   :  { %6103 = vmatpush3.bf16.msra.mxu1 %v9512_v59 }
 0xf93   :  { %6105 = vmatprep.subr.bf16.mxu1 %v9513_v61 }
 0xf96   :  { %6107 = vmatpush3.bf16.msra.mxu1 %v9513_v61 }
 0xf97   :  { %6109 = vmatprep.subr.bf16.mxu1 %v9512_v59 }
 0xf9f   :  { %v3938_v49 = vpop.permute.xlu1 %3937 }
 0xfa0   :  { %v3933_v39 = vpop.permute.xlu0 %3932  ;;  %v3975_v7 = vmul.f32 %v8712_v37, %v3938_v49 }
 0xfa1   :  { %v3974_v58 = vmul.f32 %v8712_v37, %v3933_v39 }
 0xfa2   :  { %v3991_v45 = vadd.f32 %v8720_v36, %v3975_v7 }
 0xfa3   :  { %v3990_v31 = vadd.f32 %v3974_v58, %v8722_v42 }
 0xfa4   :  { %v4011_v20 = vadd.f32 %v8727_v9, %v3991_v45 }
 0xfa5   :  { %v4010_v12 = vadd.f32 %v8727_v9, %v3990_v31 }
0x1064   :  { %v6001_v57 = vpop.f32.mrb[14].mxu1 }
0x1065   :  { %v4893_v60 = vadd.f32 %v6001_v57, %v8691_v47  ;;  %v4887_v15 = vpop.f32.mrb[15].mxu1 }
0x1066   :  { %v4888_v32 = vadd.f32 %v8691_v47, %v4887_v15 }
0x1067   :  { %4914 = vrot.lane.b32.xlu1 %v4893_v60, %s6449_s8  ;;  %v4897_v13 = vadd.f32 %v4893_v60, %v4011_v20 }
0x1068   :  { %4912 = vrot.lane.b32.xlu0 %v4888_v32, %s6449_s8  ;;  %v4896_v30 = vadd.f32 %v4888_v32, %v4010_v12 }
0x1069   :  { %v5765_v24 = vmul.f32 -1.442695, %v4897_v13 }
0x106a   :  { %v5764_v41 = vmul.f32 -1.442695, %v4896_v30 }
0x106b   :  { %6375 = vpow2.f32 %v5765_v24 }
0x106c   :  { %6377 = vpow2.f32 %v5764_v41 }
0x1075   :  { %v6376_v48 = vpop.eup %6375 }
0x1076   :  { %v6378_v62 = vpop.eup %6377  ;;  %v4905_v43 = vadd.f32 1.0, %v6376_v48 }
0x1077   :  { %v4904_v52 = vadd.f32 1.0, %v6378_v62 }
0x1078   :  { %6379 = vrcp.f32 %v4905_v43 }
0x1079   :  { %6381 = vrcp.f32 %v4904_v52 }
0x1082   :  { %v6380_v2 = vpop.eup %6379 }
0x1083   :  { %v6382_v5 = vpop.eup %6381  ;;  %v4933_v40 = vsub.f32 1.0, %v6380_v2  ;;  %v4945_v28 = vmul.f32 %v6380_v2, %v8891_v46 }
0x1084   :  { %v4932_v35 = vsub.f32 1.0, %v6382_v5  ;;  %v4944_v55 = vmul.f32 %v6382_v5, %v8893_v63 }
0x10d9   :  { %v4915_v36 = vpop.permute.xlu1 %4914 }
0x10da   :  { %v4919_v42 = vmul.f32 %v6380_v2, %v4915_v36  ;;  %v4913_v51 = vpop.permute.xlu0 %4912 }
0x10db   :  { %v4918_v18 = vmul.f32 %v6382_v5, %v4913_v51 }
0x10dc   :  { %4924 = vrot.lane.b32.xlu1 %v4919_v42, %s6449_s8 }
0x10dd   :  { %4922 = vrot.lane.b32.xlu0 %v4918_v18, %s6449_s8 }
0x114e   :  { %v4925_v3 = vpop.permute.xlu1 %4924 }
0x114f   :  { %v4929_v4 = vadd.f32 %v4925_v3, %v4011_v20  ;;  %v4923_v23 = vpop.permute.xlu0 %4922 }
0x1150   :  { %v4928_v27 = vadd.f32 %v4923_v23, %v4010_v12 }
0x1151   :  { %6383 = vtanh.f32 %v4929_v4 }
0x1152   :  { %6385 = vtanh.f32 %v4928_v27 }
0x115b   :  { %v6384_v6 = vpop.eup %6383 }
0x115c   :  { %v6386_v50 = vpop.eup %6385  ;;  %4938 = vrot.lane.b32.xlu1 %v6384_v6, %s6451_s13 }
0x115d   :  { %4936 = vrot.lane.b32.xlu0 %v6386_v50, %s6451_s13 }
0x11ce   :  { %v4939_v29 = vpop.permute.xlu1 %4938 }
0x11cf   :  { %v4943_v1 = vmul.f32 %v4939_v29, %v4933_v40  ;;  %v4937_v56 = vpop.permute.xlu0 %4936 }
0x11d0   :  { %v4942_v53 = vmul.f32 %v4937_v56, %v4932_v35 }
0x11d1   :  { %v8927_v19 = vadd.f32 %v4945_v28, %v4943_v1 }
0x11d2   :  { %v8929_v25 = vadd.f32 %v4944_v55, %v4942_v53  ;;  %v6440_v53 = vld [vmem:[%s9137_s0 + $0x78] sm:$0xff] }
0x11d3   :  { %4966 = vrot.lane.b32.xlu1 %v8927_v19, %s6451_s13 }
0x11d4   :  { %4964 = vrot.lane.b32.xlu0 %v8929_v25, %s6451_s13 }
0x11d7   :  { %3947 = vperm.xlu1 %6214, %v6438_v10   ;;  %v6441_v10 = vld [vmem:[%s9137_s0 + $0x70] sm:$0xff] }
0x11d8   :  { %3942 = vperm.xlu0 %6213, %v6439_v34  }
0x1245   :  { %v4967_v57 = vpop.permute.xlu1 %4966 }
0x1246   :  { %v4965_v54 = vpop.permute.xlu0 %4964 }
0x1247   :  { %6010 = vmatprep.mubr.msk.f32.mxu1 %vm9521_vm12, %v4965_v54  ;;  %vm9537_vm12 = vmmov %vm9525_vm0 }
0x1248   :  { %6011 = vmatmul.mubr.msk.f32.vlgmr.msra.gmra.mrb[16].mxu1 %vm9522_vm14, %v4967_v57  ;;  %vm9538_vm14 = vmmov %vm9525_vm0 }
0x1249   :  { %6111 = vmatpush3.bf16.msra.mxu1 %v9512_v59 }
0x124a   :  { %6113 = vmatprep.subr.bf16.mxu1 %v9513_v61 }
0x124d   :  { %6115 = vmatpush3.bf16.msra.mxu1 %v9513_v61 }
0x1256   :  { %v3948_v39 = vpop.permute.xlu1 %3947 }
0x1257   :  { %v3943_v7 = vpop.permute.xlu0 %3942  ;;  %v3977_v58 = vmul.f32 %v8712_v37, %v3948_v39 }
0x1258   :  { %v3976_v59 = vmul.f32 %v8712_v37, %v3943_v7 }
0x1259   :  { %v3993_v45 = vadd.f32 %v3977_v58, %v8730_v44 }
0x125a   :  { %v3992_v61 = vadd.f32 %v3976_v59, %v8733_v33 }
0x125b   :  { %v4013_v31 = vadd.f32 %v8727_v9, %v3993_v45 }
0x125c   :  { %v4012_v20 = vadd.f32 %v8727_v9, %v3992_v61 }
0x131b   :  { %v6012_v60 = vpop.f32.mrb[16].mxu1 }
0x131c   :  { %v5044_v15 = vadd.f32 %v6012_v60, %v8691_v47  ;;  %v5038_v32 = vpop.f32.mrb[17].mxu1 }
0x131d   :  { %v5039_v49 = vadd.f32 %v8691_v47, %v5038_v32 }
0x131e   :  { %5065 = vrot.lane.b32.xlu1 %v5044_v15, %s6449_s8  ;;  %v5048_v12 = vadd.f32 %v5044_v15, %v4013_v31 }
0x131f   :  { %5063 = vrot.lane.b32.xlu0 %v5039_v49, %s6449_s8  ;;  %v5047_v13 = vadd.f32 %v5039_v49, %v4012_v20 }
0x1320   :  { %v5769_v30 = vmul.f32 -1.442695, %v5048_v12 }
0x1321   :  { %v5768_v24 = vmul.f32 -1.442695, %v5047_v13 }
0x1322   :  { %6387 = vpow2.f32 %v5769_v30 }
0x1323   :  { %6389 = vpow2.f32 %v5768_v24 }
0x132c   :  { %v6388_v41 = vpop.eup %6387 }
0x132d   :  { %v6390_v48 = vpop.eup %6389  ;;  %v5056_v62 = vadd.f32 1.0, %v6388_v41 }
0x132e   :  { %v5055_v43 = vadd.f32 1.0, %v6390_v48 }
0x132f   :  { %6391 = vrcp.f32 %v5056_v62 }
0x1330   :  { %6393 = vrcp.f32 %v5055_v43 }
0x1339   :  { %v6392_v52 = vpop.eup %6391 }
0x133a   :  { %v6394_v2 = vpop.eup %6393  ;;  %v5084_v27 = vsub.f32 1.0, %v6392_v52  ;;  %v5096_v40 = vmul.f32 %v6392_v52, %v8927_v19 }
0x133b   :  { %v5083_v50 = vsub.f32 1.0, %v6394_v2  ;;  %v5095_v28 = vmul.f32 %v6394_v2, %v8929_v25 }
0x1390   :  { %v5066_v44 = vpop.permute.xlu1 %5065 }
0x1391   :  { %v5070_v33 = vmul.f32 %v6392_v52, %v5066_v44  ;;  %v5064_v36 = vpop.permute.xlu0 %5063  ;;  %v4038_v44 = vld [vmem:[%s9140_s1 + $0x10] sm:$0xff] }
0x1392   :  { %v5069_v5 = vmul.f32 %v6394_v2, %v5064_v36 }
0x1393   :  { %5075 = vrot.lane.b32.xlu1 %v5070_v33, %s6449_s8 }
0x1394   :  { %5073 = vrot.lane.b32.xlu0 %v5069_v5, %s6449_s8 }
0x1405   :  { %v5076_v42 = vpop.permute.xlu1 %5075 }
0x1406   :  { %v5080_v51 = vadd.f32 %v5076_v42, %v4013_v31  ;;  %v5074_v18 = vpop.permute.xlu0 %5073 }
0x1407   :  { %v5079_v3 = vadd.f32 %v5074_v18, %v4012_v20 }
0x1408   :  { %6395 = vtanh.f32 %v5080_v51 }
0x1409   :  { %6397 = vtanh.f32 %v5079_v3 }
0x1412   :  { %v6396_v4 = vpop.eup %6395 }
0x1413   :  { %v6398_v23 = vpop.eup %6397  ;;  %5089 = vrot.lane.b32.xlu1 %v6396_v4, %s6451_s13 }
0x1414   :  { %5087 = vrot.lane.b32.xlu0 %v6398_v23, %s6451_s13 }
0x1485   :  { %v5090_v6 = vpop.permute.xlu1 %5089 }
0x1486   :  { %v5094_v29 = vmul.f32 %v5090_v6, %v5084_v27  ;;  %v5088_v35 = vpop.permute.xlu0 %5087 }
0x1487   :  { %v5093_v1 = vmul.f32 %v5088_v35, %v5083_v50 }
0x1488   :  { %v8962_v56 = vadd.f32 %v5096_v40, %v5094_v29 }
0x1489   :  { %v8964_v55 = vadd.f32 %v5095_v28, %v5093_v1 }
0x148a   :  { %5117 = vrot.lane.b32.xlu1 %v8962_v56, %s6451_s13 }
0x148b   :  { %5115 = vrot.lane.b32.xlu0 %v8964_v55, %s6451_s13 }
0x148e   :  { %3957 = vperm.xlu1 %6214, %v6440_v53  }
0x148f   :  { %3952 = vperm.xlu0 %6213, %v6441_v10  }
0x14fc   :  { %v5118_v54 = vpop.permute.xlu1 %5117 }
0x14fd   :  { %v5116_v34 = vpop.permute.xlu0 %5115 }
0x14fe   :  { %6021 = vmatprep.mubr.msk.f32.mxu1 %vm9523_vm8, %v5116_v34  ;;  %vm9539_vm8 = vmmov %vm9525_vm0 }
0x14ff   :  { %6022 = vmatmul.mubr.msk.f32.vlgmr.msra.gmra.mrb[18].mxu1 %vm9524_vm10, %v5118_v54  ;;  %vm9540_vm10 = vmmov %vm9525_vm0 }
0x150d   :  { %v3958_v49 = vpop.permute.xlu1 %3957 }
0x150e   :  { %v3953_v39 = vpop.permute.xlu0 %3952  ;;  %v3979_v7 = vmul.f32 %v8712_v37, %v3958_v49 }
0x150f   :  { %v3978_v58 = vmul.f32 %v8712_v37, %v3953_v39 }
0x1510   :  { %v3995_v59 = vadd.f32 %v3979_v7, %v8735_v21 }
0x1511   :  { %v3994_v45 = vadd.f32 %v3978_v58, %v8737_v22 }
0x1512   :  { %v4015_v61 = vadd.f32 %v8727_v9, %v3995_v59 }
0x1513   :  { %v4014_v31 = vadd.f32 %v8727_v9, %v3994_v45  ;;  %v4039_v9 = vld [vmem:[%s9140_s1 + $0x18] sm:$0xff] }
0x15d2   :  { %v6023_v57 = vpop.f32.mrb[18].mxu1 }
0x15d3   :  { %v5195_v60 = vadd.f32 %v6023_v57, %v8691_v47  ;;  %v5189_v15 = vpop.f32.mrb[19].mxu1 }
0x15d4   :  { %v5190_v32 = vadd.f32 %v8691_v47, %v5189_v15 }
0x15d5   :  { %5216 = vrot.lane.b32.xlu1 %v5195_v60, %s6449_s8  ;;  %v5199_v20 = vadd.f32 %v5195_v60, %v4015_v61 }
0x15d6   :  { %5214 = vrot.lane.b32.xlu0 %v5190_v32, %s6449_s8  ;;  %v5198_v47 = vadd.f32 %v5190_v32, %v4014_v31 }
0x15d7   :  { %v5773_v12 = vmul.f32 -1.442695, %v5199_v20 }
0x15d8   :  { %v5772_v13 = vmul.f32 -1.442695, %v5198_v47 }
0x15d9   :  { %6399 = vpow2.f32 %v5773_v12 }
0x15da   :  { %6401 = vpow2.f32 %v5772_v13 }
0x15e3   :  { %v6400_v30 = vpop.eup %6399 }
0x15e4   :  { %v6402_v24 = vpop.eup %6401  ;;  %v5207_v41 = vadd.f32 1.0, %v6400_v30 }
0x15e5   :  { %v5206_v48 = vadd.f32 1.0, %v6402_v24 }
0x15e6   :  { %6403 = vrcp.f32 %v5207_v41 }
0x15e7   :  { %6405 = vrcp.f32 %v5206_v48 }
0x15f0   :  { %v6404_v37 = vpop.eup %6403 }
0x15f1   :  { %v6406_v62 = vpop.eup %6405  ;;  %v5247_v35 = vmul.f32 %v6404_v37, %v8962_v56 }
0x15f2   :  { %v5234_v29 = vsub.f32 1.0, %v6406_v62 }
0x1647   :  { %v5217_v21 = vpop.permute.xlu1 %5216 }
0x1648   :  { %v5221_v22 = vmul.f32 %v6404_v37, %v5217_v21  ;;  %v5215_v43 = vpop.permute.xlu0 %5214 }
0x1649   :  { %v5220_v52 = vmul.f32 %v6406_v62, %v5215_v43 }
0x164a   :  { %5226 = vrot.lane.b32.xlu1 %v5221_v22, %s6449_s8 }
0x164b   :  { %5224 = vrot.lane.b32.xlu0 %v5220_v52, %s6449_s8 }
0x164e   :  { %4189 = vrot.lane.b32.xlu1 %v4039_v9, %s6450_s4  ;;  %v5310_v9 = vld [vmem:[%s9141_s3] sm:$0xff] }
0x164f   :  { %4187 = vrot.lane.b32.xlu0 %v4038_v44, %s6450_s4  ;;  %v5311_v44 = vld [vmem:[%s9141_s3 + $0x8] sm:$0xff] }
0x16bc   :  { %v5227_v2 = vpop.permute.xlu1 %5226 }
0x16bd   :  { %v5231_v33 = vadd.f32 %v5227_v2, %v4015_v61  ;;  %v5225_v36 = vpop.permute.xlu0 %5224  ;;  %v5312_v2 = vld [vmem:[%s9141_s3 + $0x10] sm:$0xff] }
0x16be   :  { %v5230_v5 = vadd.f32 %v5225_v36, %v4014_v31  ;;  %v5313_v36 = vld [vmem:[%s9141_s3 + $0x18] sm:$0xff] }
0x16bf   :  { %6407 = vtanh.f32 %v5231_v33  ;;  %v5318_v33 = vpack.c.bf16 %v5311_v44, %v5310_v9 }
0x16c0   :  { %6409 = vtanh.f32 %v5230_v5  ;;  %v4190_v51 = vpop.permute.xlu1 %4189  ;;  %v5319_v5 = vpack.c.bf16 %v5313_v36, %v5312_v2 }
0x16c1   :  { %v4188_v3 = vpop.permute.xlu0 %4187  ;;  %v4194_v4 = vadd.f32 %v4190_v51, %v8751_v38  ;;  %v4345_v27 = vadd.f32 %v8783_v26, %v4190_v51  ;;  %v4496_v50 = vadd.f32 %v8819_v16, %v4190_v51  ;;  %v4798_v26 = vadd.f32 %v8891_v46, %v4190_v51  ;;  %6028 = vmatprep.mubr.msk.bf16.mxu0 %vm9539_vm8, %v5318_v33 }
0x16c2   :  { %v4193_v23 = vadd.f32 %v4188_v3, %v8747_v14  ;;  %v4344_v6 = vadd.f32 %v8785_v0, %v4188_v3  ;;  %v4495_v40 = vadd.f32 %v8821_v8, %v4188_v3  ;;  %v4647_v14 = vadd.f32 %v8855_v11, %v4190_v51 }
0x16c3   :  { %v4646_v38 = vadd.f32 %v8857_v17, %v4188_v3  ;;  %v4797_v0 = vadd.f32 %v8893_v63, %v4188_v3  ;;  %v4949_v16 = vadd.f32 %v8927_v19, %v4190_v51  ;;  %v4948_v8 = vadd.f32 %v8929_v25, %v4188_v3 }
0x16c4   :  { %v5100_v11 = vadd.f32 %v8962_v56, %v4190_v51  ;;  %v5099_v17 = vadd.f32 %v8964_v55, %v4188_v3  ;;  %v5235_v46 = vsub.f32 1.0, %v6404_v37  ;;  %v5246_v25 = vmul.f32 %v6406_v62, %v8964_v55 }
0x16c9   :  { %v6408_v42 = vpop.eup %6407 }
0x16ca   :  { %v6410_v18 = vpop.eup %6409  ;;  %5240 = vrot.lane.b32.xlu1 %v6408_v42, %s6451_s13  ;;  %v5314_v42 = vld [vmem:[%s9141_s3 + $0x20] sm:$0xff] }
0x16cb   :  { %5238 = vrot.lane.b32.xlu0 %v6410_v18, %s6451_s13 }
0x16ce   :  { %4199 = vrot.lane.b32.xlu1 %v4194_v4, %s6451_s13 }
0x16cf   :  { %4197 = vrot.lane.b32.xlu0 %v4193_v23, %s6451_s13 }
0x16d2   :  { %4350 = vrot.lane.b32.xlu1 %v4345_v27, %s6451_s13  ;;  %v5316_v27 = vld [vmem:[%s9141_s3 + $0x30] sm:$0xff] }
0x16d3   :  { %4348 = vrot.lane.b32.xlu0 %v4344_v6, %s6451_s13 }
0x16d6   :  { %4501 = vrot.lane.b32.xlu1 %v4496_v50, %s6451_s13  ;;  %v5317_v50 = vld [vmem:[%s9141_s3 + $0x38] sm:$0xff] }
0x16d7   :  { %4499 = vrot.lane.b32.xlu0 %v4495_v40, %s6451_s13 }
0x16da   :  { %4652 = vrot.lane.b32.xlu1 %v4647_v14, %s6451_s13  ;;  %v6453_v14 = vmov 65  }
0x16db   :  { %4650 = vrot.lane.b32.xlu0 %v4646_v38, %s6451_s13  ;;  %v5513_v38 = vld [vmem:[%s9141_s3] sm:$0x1] }
0x16de   :  { %4803 = vrot.lane.b32.xlu1 %v4798_v26, %s6451_s13  ;;  %v6454_v26 = vmov 66  }
0x16df   :  { %4801 = vrot.lane.b32.xlu0 %v4797_v0, %s6451_s13 }
0x16e2   :  { %4954 = vrot.lane.b32.xlu1 %v4949_v16, %s6451_s13 }
0x16e3   :  { %4952 = vrot.lane.b32.xlu0 %v4948_v8, %s6451_s13 }
0x16e6   :  { %5105 = vrot.lane.b32.xlu1 %v5100_v11, %s6451_s13 }
0x16e7   :  { %5103 = vrot.lane.b32.xlu0 %v5099_v17, %s6451_s13 }
0x173c   :  { %v5241_v63 = vpop.permute.xlu1 %5240 }
0x173d   :  { %v5245_v19 = vmul.f32 %v5241_v63, %v5235_v46  ;;  %v5239_v28 = vpop.permute.xlu0 %5238  ;;  %v5321_v63 = vpack.c.bf16 %v5317_v50, %v5316_v27 }
0x173e   :  { %v5244_v1 = vmul.f32 %v5239_v28, %v5234_v29 }
0x173f   :  { %v5249_v53 = vadd.f32 %v5247_v35, %v5245_v19 }
0x1740   :  { %v5248_v10 = vadd.f32 %v5246_v25, %v5244_v1  ;;  %v4200_v34 = vpop.permute.xlu1 %4199 }
0x1741   :  { %v5251_v54 = vadd.f32 %v5249_v53, %v4190_v51  ;;  %4204 = vst.msk [vmem:[#allocation3 + $0x8] sm:$0xff] %vm9525_vm0, %v4200_v34  ;;  %v4198_v57 = vpop.permute.xlu0 %4197  ;;  %v5315_v51 = vld [vmem:[%s9141_s3 + $0x28] sm:$0xff] }
0x1742   :  { %v5250_v60 = vadd.f32 %v5248_v10, %v4188_v3  ;;  %4203 = vst.msk [vmem:[#allocation3] sm:$0xff] %vm9526_vm15, %v4198_v57  ;;  %v5320_v18 = vpack.c.bf16 %v5315_v51, %v5314_v42  ;;  %v6452_v3 = vmov 64   ;;  %vm9541_vm15 = vmmov %vm9525_vm0 }
0x1743   :  { %5256 = vrot.lane.b32.xlu1 %v5251_v54, %s6451_s13 }
0x1744   :  { %v4351_v15 = vpop.permute.xlu1 %4350  ;;  %5254 = vrot.lane.b32.xlu0 %v5250_v60, %s6451_s13  ;;  %6215 = vset.pattern.permute.xlu1 %v6452_v3 }
0x1745   :  { %4355 = vst.msk [vmem:[#allocation3 + $0x18] sm:$0xff] %vm9527_vm3, %v4351_v15  ;;  %v4349_v56 = vpop.permute.xlu0 %4348  ;;  %vm9542_vm3 = vmmov %vm9525_vm0 }
0x1746   :  { %4354 = vst.msk [vmem:[#allocation3 + $0x10] sm:$0xff] %vm9528_vm6, %v4349_v56  ;;  %vm9543_vm6 = vmmov %vm9525_vm0 }
0x1747   :  { %5326 = vperm.xlu1 %6215, %v5310_v9  }
0x1748   :  { %v4502_v55 = vpop.permute.xlu1 %4501  ;;  %v5263_v47 = vld [vmem:[#allocation3 + $0x8] sm:$0xff] }
0x1749   :  { %4506 = vst.msk [vmem:[#allocation3 + $0x28] sm:$0xff] %vm9529_vm5, %v4502_v55  ;;  %v4500_v32 = vpop.permute.xlu0 %4499  ;;  %v5262_v20 = vld [vmem:[#allocation3] sm:$0xff] }
0x174a   :  { %4505 = vst.msk [vmem:[#allocation3 + $0x20] sm:$0xff] %vm9530_vm9, %v4500_v32 }
0x174b   :  { %5331 = vperm.xlu1 %6215, %v5311_v44  }
0x174c   :  { %v4653_v49 = vpop.permute.xlu1 %4652  ;;  %v5265_v13 = vld [vmem:[#allocation3 + $0x18] sm:$0xff] }
0x174d   :  { %4657 = vst.msk [vmem:[#allocation3 + $0x38] sm:$0xff] %vm9531_vm11, %v4653_v49  ;;  %v4651_v39 = vpop.permute.xlu0 %4650  ;;  %v5264_v12 = vld [vmem:[#allocation3 + $0x10] sm:$0xff] }
0x174e   :  { %4656 = vst.msk [vmem:[#allocation3 + $0x30] sm:$0xff] %vm9532_vm7, %v4651_v39 }
0x174f   :  { %5336 = vperm.xlu1 %6215, %v5312_v2  }
0x1750   :  { %v4804_v7 = vpop.permute.xlu1 %4803  ;;  %v5267_v24 = vld [vmem:[#allocation3 + $0x28] sm:$0xff] }
0x1751   :  { %4808 = vst.msk [vmem:[#allocation3 + $0x48] sm:$0xff] %vm9533_vm4, %v4804_v7  ;;  %v4802_v58 = vpop.permute.xlu0 %4801  ;;  %v5266_v30 = vld [vmem:[#allocation3 + $0x20] sm:$0xff] }
0x1752   :  { %4807 = vst.msk [vmem:[#allocation3 + $0x40] sm:$0xff] %vm9534_vm13, %v4802_v58 }
0x1753   :  { %5341 = vperm.xlu1 %6215, %v5313_v36  }
0x1754   :  { %v4955_v59 = vpop.permute.xlu1 %4954  ;;  %v5269_v48 = vld [vmem:[#allocation3 + $0x38] sm:$0xff] }
0x1755   :  { %4959 = vst.msk [vmem:[#allocation3 + $0x58] sm:$0xff] %vm9535_vm1, %v4955_v59  ;;  %v4953_v45 = vpop.permute.xlu0 %4952  ;;  %v5268_v41 = vld [vmem:[#allocation3 + $0x30] sm:$0xff] }
0x1756   :  { %4958 = vst.msk [vmem:[#allocation3 + $0x50] sm:$0xff] %vm9536_vm2, %v4953_v45 }
0x1757   :  { %5346 = vperm.xlu1 %6215, %v5314_v42  }
0x1758   :  { %v5106_v61 = vpop.permute.xlu1 %5105  ;;  %v5271_v21 = vld [vmem:[#allocation3 + $0x48] sm:$0xff] }
0x1759   :  { %5110 = vst.msk [vmem:[#allocation3 + $0x68] sm:$0xff] %vm9537_vm12, %v5106_v61  ;;  %v5104_v31 = vpop.permute.xlu0 %5103  ;;  %v5270_v37 = vld [vmem:[#allocation3 + $0x40] sm:$0xff] }
0x175a   :  { %5109 = vst.msk [vmem:[#allocation3 + $0x60] sm:$0xff] %vm9538_vm14, %v5104_v31 }
0x175b   :  { %5351 = vperm.xlu1 %6215, %v5315_v51  }
0x175c   :  { %v5273_v22 = vld [vmem:[#allocation3 + $0x58] sm:$0xff] }
0x175d   :  { %v5272_v62 = vld [vmem:[#allocation3 + $0x50] sm:$0xff] }
0x175f   :  { %5356 = vperm.xlu1 %6215, %v5316_v27  }
0x1760   :  { %v5275_v52 = vld [vmem:[#allocation3 + $0x68] sm:$0xff] }
0x1761   :  { %v5274_v43 = vld [vmem:[#allocation3 + $0x60] sm:$0xff] }
0x1762   :  { %5278 = vxpose.xlu0.b32.start [1/16] (narrow) %v5262_v20, 32 }
0x1763   :  { %5361 = vperm.xlu1 %6215, %v5317_v50  }
0x1766   :  { %5279 = vxpose.xlu0.b32.cont [2/16] (narrow) %v5263_v47, 32 }
0x1767   :  { %6216 = vset.pattern.permute.xlu1 %v6453_v14 }
0x1768   :  { %5515 = vperm.xlu1 %6216, %v5310_v9  }
0x176a   :  { %5280 = vxpose.xlu0.b32.cont [3/16] (narrow) %v5264_v12, 32 }
0x176c   :  { %5519 = vperm.xlu1 %6216, %v5311_v44  }
0x176e   :  { %5281 = vxpose.xlu0.b32.cont [4/16] (narrow) %v5265_v13, 32 }
0x1770   :  { %5523 = vperm.xlu1 %6216, %v5312_v2  }
0x1772   :  { %5282 = vxpose.xlu0.b32.cont [5/16] (narrow) %v5266_v30, 32 }
0x1774   :  { %5527 = vperm.xlu1 %6216, %v5313_v36  }
0x1776   :  { %5283 = vxpose.xlu0.b32.cont [6/16] (narrow) %v5267_v24, 32 }
0x1778   :  { %5531 = vperm.xlu1 %6216, %v5314_v42  }
0x177a   :  { %5284 = vxpose.xlu0.b32.cont [7/16] (narrow) %v5268_v41, 32 }
0x177c   :  { %5535 = vperm.xlu1 %6216, %v5315_v51  }
0x177e   :  { %5285 = vxpose.xlu0.b32.cont [8/16] (narrow) %v5269_v48, 32 }
0x1780   :  { %5539 = vperm.xlu1 %6216, %v5316_v27  }
0x1782   :  { %5286 = vxpose.xlu0.b32.cont [9/16] (narrow) %v5270_v37, 32 }
0x1784   :  { %5543 = vperm.xlu1 %6216, %v5317_v50  }
0x1786   :  { %5287 = vxpose.xlu0.b32.cont [10/16] (narrow) %v5271_v21, 32 }
0x1788   :  { %6217 = vset.pattern.permute.xlu1 %v6454_v26 }
0x1789   :  { %5569 = vperm.xlu1 %6217, %v5513_v38  }
0x178a   :  { %5288 = vxpose.xlu0.b32.cont [11/16] (narrow) %v5272_v62, 32 }
0x178e   :  { %5289 = vxpose.xlu0.b32.cont [12/16] (narrow) %v5273_v22, 32 }
0x1792   :  { %5290 = vxpose.xlu0.b32.cont [13/16] (narrow) %v5274_v43, 32 }
0x1796   :  { %5291 = vxpose.xlu0.b32.cont [14/16] (narrow) %v5275_v52, 32 }
0x17b5   :  { %v5257_v4 = vpop.permute.xlu1 %5256 }
0x17b6   :  { %5261 = vst.msk [vmem:[#allocation3 + $0x78] sm:$0xff] %vm9540_vm10, %v5257_v4  ;;  %v5255_v23 = vpop.permute.xlu0 %5254 }
0x17b7   :  { %5260 = vst.msk [vmem:[#allocation3 + $0x70] sm:$0xff] %vm9525_vm0, %v5255_v23 }
0x17bd   :  { %v5277_v40 = vld [vmem:[#allocation3 + $0x78] sm:$0xff] }
0x17be   :  { %v5276_v6 = vld [vmem:[#allocation3 + $0x70] sm:$0xff] }
0x17bf   :  { %5292 = vxpose.xlu0.b32.cont [15/16] (narrow) %v5276_v6, 32 }
0x17c3   :  { %5293 = vxpose.xlu0.b32.end [16/16] (narrow) %v5277_v40, 32 }
0x17c6   :  { %v5327_v29 = vpop.permute.xlu1 %5326 }
0x17ca   :  { %v5332_v35 = vpop.permute.xlu1 %5331 }
0x17ce   :  { %v5337_v19 = vpop.permute.xlu1 %5336 }
0x17d2   :  { %v5342_v28 = vpop.permute.xlu1 %5341 }
0x17d6   :  { %v5347_v25 = vpop.permute.xlu1 %5346 }
0x17da   :  { %v5352_v1 = vpop.permute.xlu1 %5351 }
0x17de   :  { %v5357_v53 = vpop.permute.xlu1 %5356 }
0x17e2   :  { %v5362_v10 = vpop.permute.xlu1 %5361 }
0x17e7   :  { %v9079_v54 = vpop.permute.xlu1 %5515 }
0x17eb   :  { %v9095_v31 = vpop.permute.xlu1 %5519 }
0x17ec   :  { %6218 = vset.pattern.permute.xlu0 %v6454_v26 }
0x1807   :  { %v5294_v0 = vpop.trf.xlu0 }
0x180b   :  { %v5295_v16 = vpop.trf.xlu0 }
0x180c   :  { %v5322_v8 = vpack.c.bf16 %v5295_v16, %v5294_v0 }
0x180e   :  { %6024 = vmatprep.subr.bf16.mxu0 %v5322_v8 }
0x180f   :  { %6025 = vmatpush3.bf16.msra.mxu0 %v5322_v8  ;;  %v5296_v11 = vpop.trf.xlu0 }
0x1813   :  { %v5297_v17 = vpop.trf.xlu0 }
0x1814   :  { %v5323_v46 = vpack.c.bf16 %v5297_v17, %v5296_v11 }
0x1816   :  { %6026 = vmatprep.subr.bf16.mxu0 %v5323_v46 }
0x1817   :  { %6027 = vmatpush3.bf16.msra.mxu0 %v5323_v46 }
0x181a   :  { %6029 = vmatmul.mubr.msk.bf16.vlgmr.msra.gmra.mrb[16].mxu0 %vm9541_vm15, %v5319_v5 }
0x181b   :  { %6032 = vmatprep.mubr.msk.bf16.mxu0 %vm9542_vm3, %v5320_v18  ;;  %v5524_v18 = vpop.permute.xlu1 %5523 }
0x181f   :  { %v5528_v0 = vpop.permute.xlu1 %5527 }
0x1822   :  { %6033 = vmatmul.mubr.msk.bf16.gmra.mrb[20].mxu0 %vm9543_vm6, %v5321_v63 }
0x18ed   :  { %v6030_v34 = vpop.f32.mrb[16].mxu0 }
0x18ee   :  { %v9081_v57 = vadd.f32 %v6030_v34, %v5337_v19  ;;  %v5410_v60 = vpop.f32.mrb[17].mxu0 }
0x18ef   :  { %v9083_v15 = vadd.f32 %v5410_v60, %v5327_v29  ;;  %v6031_v56 = vpop.f32.mrb[18].mxu0 }
0x18f0   :  { %v5451_v55 = vmul.f32 0.044715, %v9081_v57  ;;  %v9086_v32 = vadd.f32 %v6031_v56, %v5342_v28  ;;  %v5413_v49 = vpop.f32.mrb[19].mxu0 }
0x18f1   :  { %v5449_v39 = vmul.f32 0.044715, %v9083_v15  ;;  %v9089_v7 = vadd.f32 %v5413_v49, %v5332_v35  ;;  %v5441_v34 = vmul.f32 0.5, %v9083_v15  ;;  %v5443_v49 = vmul.f32 0.5, %v9081_v57 }
0x18f2   :  { %v5452_v58 = vmul.f32 0.044715, %v9086_v32  ;;  %v5459_v59 = vmul.f32 %v5451_v55, %v9081_v57 }
0x18f3   :  { %v5450_v45 = vmul.f32 0.044715, %v9089_v7  ;;  %v5457_v61 = vmul.f32 %v5449_v39, %v9083_v15 }
0x18f4   :  { %v5467_v20 = vmul.f32 %v5459_v59, %v9081_v57  ;;  %v5460_v47 = vmul.f32 %v5452_v58, %v9086_v32  ;;  %v5442_v58 = vmul.f32 0.5, %v9089_v7 }
0x18f5   :  { %v5465_v12 = vmul.f32 %v5457_v61, %v9083_v15  ;;  %v6034_v13 = vpop.f32.mrb[20].mxu0  ;;  %v5458_v30 = vmul.f32 %v5450_v45, %v9089_v7 }
0x18f6   :  { %v9101_v24 = vadd.f32 %v6034_v13, %v5357_v53  ;;  %v5426_v41 = vpop.f32.mrb[21].mxu0  ;;  %v5475_v48 = vadd.f32 %v5467_v20, %v9081_v57  ;;  %v5468_v37 = vmul.f32 %v5460_v47, %v9086_v32  ;;  %v5532_v53 = vpop.permute.xlu1 %5531  ;;  %v5444_v47 = vmul.f32 0.5, %v9086_v32 }
0x18f7   :  { %v5473_v21 = vadd.f32 %v5465_v12, %v9083_v15  ;;  %v9106_v62 = vadd.f32 %v5426_v41, %v5347_v25  ;;  %v6035_v22 = vpop.f32.mrb[22].mxu0  ;;  %v5466_v43 = vmul.f32 %v5458_v30, %v9089_v7 }
0x18f8   :  { %v5455_v52 = vmul.f32 0.044715, %v9101_v24  ;;  %v9110_v9 = vadd.f32 %v6035_v22, %v5362_v10  ;;  %v5429_v44 = vpop.f32.mrb[23].mxu0  ;;  %v5483_v2 = vmul.f32 0.7978846, %v5475_v48  ;;  %v5476_v33 = vadd.f32 %v5468_v37, %v9086_v32 }
0x18f9   :  { %v5481_v36 = vmul.f32 0.7978846, %v5473_v21  ;;  %v5453_v5 = vmul.f32 0.044715, %v9106_v62  ;;  %v5474_v42 = vadd.f32 %v5466_v43, %v9089_v7  ;;  %v5430_v51 = vadd.f32 %v5429_v44, %v5352_v1 }
0x18fa   :  { %v5456_v3 = vmul.f32 0.044715, %v9110_v9  ;;  %6411 = vtanh.f32 %v5483_v2  ;;  %v5484_v4 = vmul.f32 0.7978846, %v5476_v33  ;;  %v5463_v50 = vmul.f32 %v5455_v52, %v9101_v24  ;;  %v5536_v12 = vpop.permute.xlu1 %5535 }
0x18fb   :  { %6413 = vtanh.f32 %v5481_v36  ;;  %v5482_v23 = vmul.f32 0.7978846, %v5474_v42  ;;  %v5454_v27 = vmul.f32 0.044715, %v5430_v51  ;;  %v5461_v6 = vmul.f32 %v5453_v5, %v9106_v62 }
0x18fc   :  { %6415 = vtanh.f32 %v5484_v4  ;;  %v5471_v38 = vmul.f32 %v5463_v50, %v9101_v24  ;;  %v5464_v26 = vmul.f32 %v5456_v3, %v9110_v9  ;;  %v5445_v57 = vmul.f32 0.5, %v9106_v62 }
0x18fd   :  { %6417 = vtanh.f32 %v5482_v23  ;;  %v5469_v40 = vmul.f32 %v5461_v6, %v9106_v62  ;;  %v5462_v14 = vmul.f32 %v5454_v27, %v5430_v51  ;;  %v5446_v43 = vmul.f32 0.5, %v5430_v51 }
0x18fe   :  { %v5479_v11 = vadd.f32 %v5471_v38, %v9101_v24  ;;  %v5472_v17 = vmul.f32 %v5464_v26, %v9110_v9  ;;  %v5447_v52 = vmul.f32 0.5, %v9101_v24  ;;  %v5540_v5 = vpop.permute.xlu1 %5539 }
0x18ff   :  { %v5477_v16 = vadd.f32 %v5469_v40, %v9106_v62  ;;  %v5470_v8 = vmul.f32 %v5462_v14, %v5430_v51 }
0x1900   :  { %v5487_v29 = vmul.f32 0.7978846, %v5479_v11  ;;  %v5480_v35 = vadd.f32 %v5472_v17, %v9110_v9 }
0x1901   :  { %v5485_v46 = vmul.f32 0.7978846, %v5477_v16  ;;  %v5478_v63 = vadd.f32 %v5470_v8, %v5430_v51 }
0x1902   :  { %v5488_v25 = vmul.f32 0.7978846, %v5480_v35  ;;  %v5544_v24 = vpop.permute.xlu1 %5543 }
0x1903   :  { %6419 = vtanh.f32 %v5485_v46  ;;  %v5486_v19 = vmul.f32 0.7978846, %v5478_v63 }
0x1904   :  { %v6412_v28 = vpop.eup %6411  ;;  %6421 = vtanh.f32 %v5487_v29 }
0x1905   :  { %v6414_v1 = vpop.eup %6413  ;;  %6423 = vtanh.f32 %v5486_v19  ;;  %v5499_v56 = vadd.f32 1.0, %v6412_v28 }
0x1906   :  { %v6416_v10 = vpop.eup %6415  ;;  %v5497_v60 = vadd.f32 1.0, %v6414_v1  ;;  %6425 = vtanh.f32 %v5488_v25 }
0x1907   :  { %v6418_v55 = vpop.eup %6417  ;;  %v5500_v45 = vadd.f32 1.0, %v6416_v10  ;;  %v5507_v20 = vmul.f32 %v5499_v56, %v5443_v49 }
0x1908   :  { %v5505_v39 = vmul.f32 %v5497_v60, %v5441_v34  ;;  %v5498_v59 = vadd.f32 1.0, %v6418_v55 }
0x1909   :  { %v5508_v30 = vmul.f32 %v5500_v45, %v5444_v47  ;;  %v5548_v21 = vmul.f32 %v5524_v18, %v5507_v20 }
0x190a   :  { %v5506_v61 = vmul.f32 %v5498_v59, %v5442_v58  ;;  %v5546_v13 = vmul.f32 %v9079_v54, %v5505_v39 }
0x190b   :  { %v5549_v33 = vmul.f32 %v5528_v0, %v5508_v30 }
0x190c   :  { %v5547_v15 = vmul.f32 %v9095_v31, %v5506_v61  ;;  %v5448_v31 = vmul.f32 0.5, %v9110_v9  ;;  %v5570_v9 = vpop.permute.xlu1 %5569 }
0x190d   :  { %v6420_v41 = vpop.eup %6419 }
0x190e   :  { %v6422_v48 = vpop.eup %6421  ;;  %v5554_v37 = vadd.f32 %v5547_v15, %v5546_v13  ;;  %v5501_v22 = vadd.f32 1.0, %v6420_v41 }
0x190f   :  { %v6424_v7 = vpop.eup %6423  ;;  %v5503_v44 = vadd.f32 1.0, %v6422_v48 }
0x1910   :  { %v6426_v2 = vpop.eup %6425  ;;  %v5555_v32 = vadd.f32 %v5554_v37, %v5548_v21  ;;  %v5509_v36 = vmul.f32 %v5501_v22, %v5445_v57  ;;  %v5502_v54 = vadd.f32 1.0, %v6424_v7 }
0x1911   :  { %v5504_v42 = vadd.f32 1.0, %v6426_v2  ;;  %v5511_v23 = vmul.f32 %v5503_v44, %v5447_v52 }
0x1912   :  { %v5556_v3 = vadd.f32 %v5555_v32, %v5549_v33  ;;  %v5550_v4 = vmul.f32 %v5532_v53, %v5509_v36  ;;  %v5510_v18 = vmul.f32 %v5502_v54, %v5446_v43 }
0x1913   :  { %v5512_v6 = vmul.f32 %v5504_v42, %v5448_v31  ;;  %v5552_v50 = vmul.f32 %v5540_v5, %v5511_v23 }
0x1914   :  { %v5557_v62 = vadd.f32 %v5556_v3, %v5550_v4  ;;  %v5551_v27 = vmul.f32 %v5536_v12, %v5510_v18 }
0x1915   :  { %v5553_v14 = vmul.f32 %v5544_v24, %v5512_v6 }
0x1916   :  { %v5558_v51 = vadd.f32 %v5557_v62, %v5551_v27 }
0x1918   :  { %v5559_v40 = vadd.f32 %v5558_v51, %v5552_v50 }
0x191a   :  { %v5560_v38 = vadd.f32 %v5559_v40, %v5553_v14 }
0x191c   :  { %v5561_v26 = vrot.slane %v5560_v38, 4 }
0x191e   :  { %v5562_v0 = vadd.f32 %v5561_v26, %v5560_v38 }
0x1920   :  { %v5563_v16 = vrot.slane %v5562_v0, 2 }
0x1922   :  { %v5564_v8 = vadd.f32 %v5563_v16, %v5562_v0 }
0x1924   :  { %v5565_v11 = vrot.slane %v5564_v8, 1 }
0x1926   :  { %v5566_v17 = vadd.f32 %v5565_v11, %v5564_v8 }
0x1928   :  { %v5572_v46 = vadd.f32 %v5570_v9, %v5566_v17 }
0x192a   :  { %5573 = vst [vmem:[%s9142_s5] sm:$0x1] %v5572_v46 }

</bundles_post_ra>
